<compile_context>
chip_gen: v7x
topology: tpu7x:2x2x1
jax: 0.10.0
libtpu: 0.0.40
codegen_flags: <defaults>
</compile_context>

<pallas_src>
import functools

import jax
import jax.numpy as jnp
from jax.experimental import pallas as pl
from jax.experimental.pallas import tpu as pltpu


CONV_PLANES = (16, 32, 64, 128, 256, 256, 256)
KSIZES = (7, 5, 3, 3, 3, 3, 3)


def _round_up(x, m):
    return (x + m - 1) // m * m


def _tile_policy():
    """(tm_max, min_grid_steps) per TPU generation.

    v7x has 2 TensorCores per chip -> want >=2 row tiles so ("parallel",)
    shards across both cores (and the prologue DMA overlaps); v5e/v6e are
    single-TC with large VMEM -> fewer, bigger tiles amortize per-step cost.
    """
    kind = ""
    try:
        kind = jax.devices()[0].device_kind.lower()
    except Exception:
        pass
    multi_tc = "7" in kind
    return (256, 2) if multi_tc else (512, 1)


def _pick_tile_m(M, tm_max, min_steps):
    """Largest 16-aligned tile <= tm_max that divides M with >= min_steps steps.

    Returns 0 when no such divisor exists (caller pads the tiny remainder).
    """
    cap = min(tm_max, max(16, M // max(1, min_steps)))
    cap -= cap % 16
    for tm in range(cap, 15, -16):
        if M % tm == 0:
            return tm
    return 0


# ---------------------------------------------------------------------------
# Pallas kernels
# ---------------------------------------------------------------------------
def _mm_bias_kernel(x_ref, w_ref, b_ref, o_ref, *, relu):
    # x: (tm, K) bf16   w: (K, N) bf16   b: (1, N) f32   ->  o: (tm, N) bf16
    acc = jnp.dot(x_ref[...], w_ref[...], preferred_element_type=jnp.float32)
    acc = acc + b_ref[...]                       # f32 epilogue (v5e-friendly)
    if relu:
        acc = jnp.maximum(acc, 0.0)
    o_ref[...] = acc.astype(o_ref.dtype)


def matmul_bias(x, w_t, b, *, relu, tm_max, min_steps):
    """y = (relu)(x @ w_t + b); x:(M,K) bf16, w_t:(K,N) bf16, b:(N,) f32 -> (M,N) bf16."""
    M, K = x.shape
    N = w_t.shape[1]
    tm = _pick_tile_m(M, tm_max, min_steps)
    if tm == 0:
        # Only hit by the tiny tail layers (M = 8 / 2 rows): pad M up to 16.
        tm = min(max(16, tm_max - tm_max % 16), _round_up(M, 16))
        Mp = _round_up(M, tm)
        x = jnp.pad(x, ((0, Mp - M), (0, 0)))
    else:
        Mp = M
    # NOTE: weight/bias blocks have a constant index_map, so Pallas only DMAs
    # them once; when tiles grow near the v7x 64 MiB VMEM limit, switch them
    # to pipeline_mode=pl.Buffered(1) to drop the unused second buffer.
    out = pl.pallas_call(
        functools.partial(_mm_bias_kernel, relu=relu),
        out_shape=jax.ShapeDtypeStruct((Mp, N), jnp.bfloat16),
        grid=(Mp // tm,),
        in_specs=[
            pl.BlockSpec((tm, K), lambda i: (i, 0)),   # streamed row tiles
            pl.BlockSpec((K, N), lambda i: (0, 0)),    # weights stay resident
            pl.BlockSpec((1, N), lambda i: (0, 0)),    # bias stays resident
        ],
        out_specs=pl.BlockSpec((tm, N), lambda i: (i, 0)),
        compiler_params=pltpu.CompilerParams(
            dimension_semantics=("parallel",),         # shard row tiles (v7x 2 TCs)
            vmem_limit_bytes=32 * 1024 * 1024,
        ),
    )(x, w_t, b.reshape(1, N))
    return out[:M] if Mp != M else out


def _pose_kernel(x_ref, w_ref, b_ref, o_ref):
    # x: (B, HW, C) bf16   w: (C, P) bf16   b: (1, P) f32  ->  o: (B, P) f32
    # mean(W x + b) == W mean(x) + b  (linearity): reduce spatially first.
    xm = jnp.mean(x_ref[...].astype(jnp.float32), axis=1)          # (B, C) f32
    y = jnp.dot(xm.astype(jnp.bfloat16), w_ref[...],               # bf16 MXU
                preferred_element_type=jnp.float32)                # f32 accum
    o_ref[...] = 0.01 * (y + b_ref[...])


def pose_head(x, w_t, b):
    B = x.shape[0]
    P = w_t.shape[1]
    vmem = pl.BlockSpec(memory_space=pltpu.MemorySpace.VMEM)
    return pl.pallas_call(
        _pose_kernel,
        out_shape=jax.ShapeDtypeStruct((B, P), jnp.float32),
        in_specs=[vmem, vmem, vmem],
        out_specs=vmem,
    )(x, w_t, b.reshape(1, P))


# ---------------------------------------------------------------------------
# Glue: NHWC im2col (plain JAX, no transposes) + conv wrapper
# ---------------------------------------------------------------------------
def extract_patches_nhwc(x, k, stride, pad, k_flat):
    # K padding (to a 128 multiple) is built into the concatenate as a zeros
    # column block, so no extra full-slab pad pass is paid (review #3).
    # TODO(synk): replace with implicit GEMM (in-kernel im2col from DMA'd row
    # strips) to avoid materializing the k*k-expanded slab in HBM (review #2).
    B, H, W, C = x.shape
    xp = jnp.pad(x, ((0, 0), (pad, pad), (pad, pad), (0, 0)))
    Hout = (H + 2 * pad - k) // stride + 1
    Wout = (W + 2 * pad - k) // stride + 1
    cols = []
    for kh in range(k):
        for kw in range(k):
            cols.append(xp[:, kh:kh + stride * Hout:stride,
                           kw:kw + stride * Wout:stride, :])
    extra = k_flat - k * k * C
    if extra:
        cols.append(jnp.zeros((B, Hout, Wout, extra), x.dtype))
    patches = jnp.concatenate(cols, axis=-1)          # (B, Hout, Wout, k_flat)
    return patches.reshape(B * Hout * Wout, k_flat), Hout, Wout


def conv_stride2_relu(x, w_t, b, k, tm_max, min_steps):
    """NHWC equivalent of Conv2d(k, stride=2, padding=(k-1)//2) + ReLU."""
    B = x.shape[0]
    pad = (k - 1) // 2
    patches, Hout, Wout = extract_patches_nhwc(x, k, 2, pad, w_t.shape[0])
    y = matmul_bias(patches, w_t, b, relu=True, tm_max=tm_max, min_steps=min_steps)
    return y.reshape(B, Hout, Wout, w_t.shape[1])


# ---------------------------------------------------------------------------
# PoseExpNet parameters (PyTorch layout) + Pallas-ready prep + forward
# ---------------------------------------------------------------------------
def xavier_uniform(key, shape):
    fan_in = shape[1] * shape[2] * shape[3]
    fan_out = shape[0] * shape[2] * shape[3]
    limit = (6.0 / (fan_in + fan_out)) ** 0.5
    return jax.random.uniform(key, shape, jnp.float32, -limit, limit)


def init_params(key, nb_ref_imgs=2):
    in_ch = 3 * (1 + nb_ref_imgs)
    convs = []
    for i, (cout, k) in enumerate(zip(CONV_PLANES, KSIZES)):
        key, sub = jax.random.split(key)
        cin = in_ch if i == 0 else CONV_PLANES[i - 1]
        convs.append((xavier_uniform(sub, (cout, cin, k, k)),
                      jnp.zeros((cout,), jnp.float32)))
    key, sub = jax.random.split(key)
    wp = xavier_uniform(sub, (6 * nb_ref_imgs, CONV_PLANES[-1], 1, 1))
    bp = jnp.zeros((6 * nb_ref_imgs,), jnp.float32)
    return {"convs": convs, "pose_pred": (wp, bp)}


def prepare_params(params, nb_ref_imgs=2):
    """Flatten weights (kh,kw,cin)->cout, pad only flat K to 128, cast bf16.

    Channel counts are kept at their real widths (review #1/#9): padding is
    applied once to the flattened k*k*cin rows (consumed by the zeros column
    block appended during im2col), never to cout / the stored activations.
    """
    convs = []
    for (w, b) in params["convs"]:
        cout, cin, kh, kw = w.shape
        w_t = w.transpose(2, 3, 1, 0).reshape(kh * kw * cin, cout)
        k_flat = _round_up(kh * kw * cin, 128)
        w_t = jnp.pad(w_t, ((0, k_flat - w_t.shape[0]), (0, 0))).astype(jnp.bfloat16)
        convs.append((w_t, b.astype(jnp.float32)))
    wp, bp = params["pose_pred"]
    wp_t = wp.reshape(wp.shape[0], wp.shape[1]).T.astype(jnp.bfloat16)   # (C, P)
    return {"convs": convs, "pose_pred": (wp_t, bp.astype(jnp.float32))}


@functools.partial(jax.jit, static_argnames=("nb_ref_imgs",))
def pose_exp_net_forward(prepped, target_image, ref_imgs, *, nb_ref_imgs=2):
    assert len(ref_imgs) == nb_ref_imgs
    x = jnp.concatenate([target_image] + list(ref_imgs), axis=1)    # NCHW (B,3*(1+n),H,W)
    x = x.transpose(0, 2, 3, 1).astype(jnp.bfloat16)                # NHWC bf16, once
    tm_max, min_steps = _tile_policy()
    for k, (w_t, b) in zip(KSIZES, prepped["convs"]):
        x = conv_stride2_relu(x, w_t, b, k, tm_max, min_steps)
    B, Hf, Wf, C = x.shape
    wp_t, bp = prepped["pose_pred"]
    pose = pose_head(x.reshape(B, Hf * Wf, C), wp_t, bp)            # (B, 6*n)
    pose = pose.reshape(B, nb_ref_imgs, 6)
    exp_mask1 = None                                                # output_exp=False
    return exp_mask1, pose


# ---------------------------------------------------------------------------
# Pure-JAX f32 reference (correctness sanity check)
# ---------------------------------------------------------------------------
def forward_ref(params, target_image, ref_imgs, nb_ref_imgs=2):
    x = jnp.concatenate([target_image] + list(ref_imgs), axis=1)
    for (w, b) in params["convs"]:
        k = w.shape[2]
        p = (k - 1) // 2
        x = jax.lax.conv_general_dilated(
            x, w, (2, 2), ((p, p), (p, p)),
            dimension_numbers=("NCHW", "OIHW", "NCHW"))
        x = jax.nn.relu(x + b[None, :, None, None])
    wp, bp = params["pose_pred"]
    pose = jax.lax.conv_general_dilated(
        x, wp, (1, 1), ((0, 0), (0, 0)),
        dimension_numbers=("NCHW", "OIHW", "NCHW")) + bp[None, :, None, None]
    pose = pose.mean(axis=(2, 3))
    return 0.01 * pose.reshape(pose.shape[0], nb_ref_imgs, 6)


# ---------------------------------------------------------------------------
if __name__ == "__main__":
    B, H, W = 2, 32, 32
    nb_ref_imgs = 2

    key = jax.random.PRNGKey(0)
    key, k_par, k_t, k_r0, k_r1 = jax.random.split(key, 5)
    params = init_params(k_par, nb_ref_imgs=nb_ref_imgs)
    prepped = prepare_params(params, nb_ref_imgs=nb_ref_imgs)

    target = jax.random.normal(k_t, (B, 3, H, W), jnp.float32)
    ref_imgs = (jax.random.normal(k_r0, (B, 3, H, W), jnp.float32),
                jax.random.normal(k_r1, (B, 3, H, W), jnp.float32))

    exp_mask1, pose = pose_exp_net_forward(prepped, target, ref_imgs,
                                           nb_ref_imgs=nb_ref_imgs)
    pose = jax.block_until_ready(pose)
    assert exp_mask1 is None
    assert pose.shape == (B, nb_ref_imgs, 6)

    pose_ref = jax.block_until_ready(
        forward_ref(params, target, ref_imgs, nb_ref_imgs))
    rel_err = jnp.linalg.norm(pose - pose_ref) / (jnp.linalg.norm(pose_ref) + 1e-12)
    if not bool(rel_err < 3e-2):   # bf16 MXU operands, f32 accumulation
        raise AssertionError(
            f"Pallas pose output does not match JAX reference (rel L2 err={rel_err})")

    print("KERNEL_OK")
</pallas_src>

<mosaic_0001>
module attributes {stable_mosaic.version = 11 : i64} {
  func.func @_mm_bias_kernel(%arg0: i32, %arg1: memref<512x512xbf16, #tpu.memory_space<vmem>>, %arg2: memref<512x16xbf16, #tpu.memory_space<vmem>>, %arg3: memref<1x16xf32, #tpu.memory_space<vmem>>, %arg4: memref<512x16xbf16, #tpu.memory_space<vmem>>) attributes {dimension_semantics = [#tpu.dimension_semantics<parallel>], iteration_bounds = array<i64: 1>, scalar_prefetch = 0 : i64, scratch_operands = 0 : i64, tpu.core_type = #tpu.core_type<tc>, window_params = [{transform_indices = @transform_0, window_bounds = array<i64: 512, 512>}, {pipeline_mode = #tpu.pipeline_mode<synchronous>, transform_indices = @transform_1, window_bounds = array<i64: 512, 16>}, {pipeline_mode = #tpu.pipeline_mode<synchronous>, transform_indices = @transform_2, window_bounds = array<i64: 1, 16>}, {transform_indices = @transform_3, window_bounds = array<i64: 512, 16>}]} {
    %c0 = arith.constant 0 : index
    %c0_0 = arith.constant 0 : index
    %0 = vector.load %arg1[%c0, %c0_0] : memref<512x512xbf16, #tpu.memory_space<vmem>>, vector<512x512xbf16>
    %c0_1 = arith.constant 0 : index
    %c0_2 = arith.constant 0 : index
    %1 = vector.load %arg2[%c0_1, %c0_2] : memref<512x16xbf16, #tpu.memory_space<vmem>>, vector<512x16xbf16>
    %cst = arith.constant dense<0.000000e+00> : vector<512x16xf32>
    %2 = tpu.matmul %0, %1, %cst {dimension_numbers = #tpu.dot_dimension_numbers<[1], [0], [0], [1], [0, 0, 1, 1], [], []>} : vector<512x512xbf16>, vector<512x16xbf16>, vector<512x16xf32> -> vector<512x16xf32>
    %c0_3 = arith.constant 0 : index
    %c0_4 = arith.constant 0 : index
    %3 = vector.load %arg3[%c0_3, %c0_4] : memref<1x16xf32, #tpu.memory_space<vmem>>, vector<1x16xf32>
    %4 = vector.broadcast %3 : vector<1x16xf32> to vector<512x16xf32>
    %5 = arith.addf %2, %4 : vector<512x16xf32>
    %cst_5 = arith.constant 0.000000e+00 : f32
    %6 = vector.broadcast %cst_5 : f32 to vector<512x16xf32>
    %7 = arith.maximumf %5, %6 : vector<512x16xf32>
    %8 = arith.truncf %7 : vector<512x16xf32> to vector<512x16xbf16>
    %c0_6 = arith.constant 0 : index
    %c0_7 = arith.constant 0 : index
    %9 = vector.load %arg4[%c0_6, %c0_7] : memref<512x16xbf16, #tpu.memory_space<vmem>>, vector<512x16xbf16>
    tpu.vector_store %arg4[%c0_6, %c0_7], %8 {strides = array<i32>} : memref<512x16xbf16, #tpu.memory_space<vmem>>, vector<512x16xbf16>,
    return
  }
  func.func @transform_0(%arg0: i32) -> (i32, i32) {
    %c0_i32 = arith.constant 0 : i32
    %c0_i32_0 = arith.constant 0 : i32
    return %arg0, %c0_i32 : i32, i32
  }
  func.func @transform_1(%arg0: i32) -> (i32, i32) {
    %c0_i32 = arith.constant 0 : i32
    %c0_i32_0 = arith.constant 0 : i32
    %c0_i32_1 = arith.constant 0 : i32
    return %c0_i32, %c0_i32_0 : i32, i32
  }
  func.func @transform_2(%arg0: i32) -> (i32, i32) {
    %c0_i32 = arith.constant 0 : i32
    %c0_i32_0 = arith.constant 0 : i32
    %c0_i32_1 = arith.constant 0 : i32
    return %c0_i32, %c0_i32_0 : i32, i32
  }
  func.func @transform_3(%arg0: i32) -> (i32, i32) {
    %c0_i32 = arith.constant 0 : i32
    %c0_i32_0 = arith.constant 0 : i32
    return %arg0, %c0_i32 : i32, i32
  }
}

module attributes {stable_mosaic.version = 11 : i64} {
  func.func @_mm_bias_kernel(%arg0: i32, %arg1: memref<128x512xbf16, #tpu.memory_space<vmem>>, %arg2: memref<512x32xbf16, #tpu.memory_space<vmem>>, %arg3: memref<1x32xf32, #tpu.memory_space<vmem>>, %arg4: memref<128x32xbf16, #tpu.memory_space<vmem>>) attributes {dimension_semantics = [#tpu.dimension_semantics<parallel>], iteration_bounds = array<i64: 1>, scalar_prefetch = 0 : i64, scratch_operands = 0 : i64, tpu.core_type = #tpu.core_type<tc>, window_params = [{transform_indices = @transform_0, window_bounds = array<i64: 128, 512>}, {pipeline_mode = #tpu.pipeline_mode<synchronous>, transform_indices = @transform_1, window_bounds = array<i64: 512, 32>}, {pipeline_mode = #tpu.pipeline_mode<synchronous>, transform_indices = @transform_2, window_bounds = array<i64: 1, 32>}, {transform_indices = @transform_3, window_bounds = array<i64: 128, 32>}]} {
    %c0 = arith.constant 0 : index
    %c0_0 = arith.constant 0 : index
    %0 = vector.load %arg1[%c0, %c0_0] : memref<128x512xbf16, #tpu.memory_space<vmem>>, vector<128x512xbf16>
    %c0_1 = arith.constant 0 : index
    %c0_2 = arith.constant 0 : index
    %1 = vector.load %arg2[%c0_1, %c0_2] : memref<512x32xbf16, #tpu.memory_space<vmem>>, vector<512x32xbf16>
    %cst = arith.constant dense<0.000000e+00> : vector<128x32xf32>
    %2 = tpu.matmul %0, %1, %cst {dimension_numbers = #tpu.dot_dimension_numbers<[1], [0], [0], [1], [0, 0, 1, 1], [], []>} : vector<128x512xbf16>, vector<512x32xbf16>, vector<128x32xf32> -> vector<128x32xf32>
    %c0_3 = arith.constant 0 : index
    %c0_4 = arith.constant 0 : index
    %3 = vector.load %arg3[%c0_3, %c0_4] : memref<1x32xf32, #tpu.memory_space<vmem>>, vector<1x32xf32>
    %4 = vector.broadcast %3 : vector<1x32xf32> to vector<128x32xf32>
    %5 = arith.addf %2, %4 : vector<128x32xf32>
    %cst_5 = arith.constant 0.000000e+00 : f32
    %6 = vector.broadcast %cst_5 : f32 to vector<128x32xf32>
    %7 = arith.maximumf %5, %6 : vector<128x32xf32>
    %8 = arith.truncf %7 : vector<128x32xf32> to vector<128x32xbf16>
    %c0_6 = arith.constant 0 : index
    %c0_7 = arith.constant 0 : index
    %9 = vector.load %arg4[%c0_6, %c0_7] : memref<128x32xbf16, #tpu.memory_space<vmem>>, vector<128x32xbf16>
    tpu.vector_store %arg4[%c0_6, %c0_7], %8 {strides = array<i32>} : memref<128x32xbf16, #tpu.memory_space<vmem>>, vector<128x32xbf16>,
    return
  }
  func.func @transform_0(%arg0: i32) -> (i32, i32) {
    %c0_i32 = arith.constant 0 : i32
    %c0_i32_0 = arith.constant 0 : i32
    return %arg0, %c0_i32 : i32, i32
  }
  func.func @transform_1(%arg0: i32) -> (i32, i32) {
    %c0_i32 = arith.constant 0 : i32
    %c0_i32_0 = arith.constant 0 : i32
    %c0_i32_1 = arith.constant 0 : i32
    return %c0_i32, %c0_i32_0 : i32, i32
  }
  func.func @transform_2(%arg0: i32) -> (i32, i32) {
    %c0_i32 = arith.constant 0 : i32
    %c0_i32_0 = arith.constant 0 : i32
    %c0_i32_1 = arith.constant 0 : i32
    return %c0_i32, %c0_i32_0 : i32, i32
  }
  func.func @transform_3(%arg0: i32) -> (i32, i32) {
    %c0_i32 = arith.constant 0 : i32
    %c0_i32_0 = arith.constant 0 : i32
    return %arg0, %c0_i32 : i32, i32
  }
}

module attributes {stable_mosaic.version = 11 : i64} {
  func.func @_mm_bias_kernel(%arg0: i32, %arg1: memref<32x384xbf16, #tpu.memory_space<vmem>>, %arg2: memref<384x64xbf16, #tpu.memory_space<vmem>>, %arg3: memref<1x64xf32, #tpu.memory_space<vmem>>, %arg4: memref<32x64xbf16, #tpu.memory_space<vmem>>) attributes {dimension_semantics = [#tpu.dimension_semantics<parallel>], iteration_bounds = array<i64: 1>, scalar_prefetch = 0 : i64, scratch_operands = 0 : i64, tpu.core_type = #tpu.core_type<tc>, window_params = [{transform_indices = @transform_0, window_bounds = array<i64: 32, 384>}, {pipeline_mode = #tpu.pipeline_mode<synchronous>, transform_indices = @transform_1, window_bounds = array<i64: 384, 64>}, {pipeline_mode = #tpu.pipeline_mode<synchronous>, transform_indices = @transform_2, window_bounds = array<i64: 1, 64>}, {transform_indices = @transform_3, window_bounds = array<i64: 32, 64>}]} {
    %c0 = arith.constant 0 : index
    %c0_0 = arith.constant 0 : index
    %0 = vector.load %arg1[%c0, %c0_0] : memref<32x384xbf16, #tpu.memory_space<vmem>>, vector<32x384xbf16>
    %c0_1 = arith.constant 0 : index
    %c0_2 = arith.constant 0 : index
    %1 = vector.load %arg2[%c0_1, %c0_2] : memref<384x64xbf16, #tpu.memory_space<vmem>>, vector<384x64xbf16>
    %cst = arith.constant dense<0.000000e+00> : vector<32x64xf32>
    %2 = tpu.matmul %0, %1, %cst {dimension_numbers = #tpu.dot_dimension_numbers<[1], [0], [0], [1], [0, 0, 1, 1], [], []>} : vector<32x384xbf16>, vector<384x64xbf16>, vector<32x64xf32> -> vector<32x64xf32>
    %c0_3 = arith.constant 0 : index
    %c0_4 = arith.constant 0 : index
    %3 = vector.load %arg3[%c0_3, %c0_4] : memref<1x64xf32, #tpu.memory_space<vmem>>, vector<1x64xf32>
    %4 = vector.broadcast %3 : vector<1x64xf32> to vector<32x64xf32>
    %5 = arith.addf %2, %4 : vector<32x64xf32>
    %cst_5 = arith.constant 0.000000e+00 : f32
    %6 = vector.broadcast %cst_5 : f32 to vector<32x64xf32>
    %7 = arith.maximumf %5, %6 : vector<32x64xf32>
    %8 = arith.truncf %7 : vector<32x64xf32> to vector<32x64xbf16>
    %c0_6 = arith.constant 0 : index
    %c0_7 = arith.constant 0 : index
    %9 = vector.load %arg4[%c0_6, %c0_7] : memref<32x64xbf16, #tpu.memory_space<vmem>>, vector<32x64xbf16>
    tpu.vector_store %arg4[%c0_6, %c0_7], %8 {strides = array<i32>} : memref<32x64xbf16, #tpu.memory_space<vmem>>, vector<32x64xbf16>,
    return
  }
  func.func @transform_0(%arg0: i32) -> (i32, i32) {
    %c0_i32 = arith.constant 0 : i32
    %c0_i32_0 = arith.constant 0 : i32
    return %arg0, %c0_i32 : i32, i32
  }
  func.func @transform_1(%arg0: i32) -> (i32, i32) {
    %c0_i32 = arith.constant 0 : i32
    %c0_i32_0 = arith.constant 0 : i32
    %c0_i32_1 = arith.constant 0 : i32
    return %c0_i32, %c0_i32_0 : i32, i32
  }
  func.func @transform_2(%arg0: i32) -> (i32, i32) {
    %c0_i32 = arith.constant 0 : i32
    %c0_i32_0 = arith.constant 0 : i32
    %c0_i32_1 = arith.constant 0 : i32
    return %c0_i32, %c0_i32_0 : i32, i32
  }
  func.func @transform_3(%arg0: i32) -> (i32, i32) {
    %c0_i32 = arith.constant 0 : i32
    %c0_i32_0 = arith.constant 0 : i32
    return %arg0, %c0_i32 : i32, i32
  }
}

module attributes {stable_mosaic.version = 11 : i64} {
  func.func @_mm_bias_kernel(%arg0: i32, %arg1: memref<16x640xbf16, #tpu.memory_space<vmem>>, %arg2: memref<640x128xbf16, #tpu.memory_space<vmem>>, %arg3: memref<1x128xf32, #tpu.memory_space<vmem>>, %arg4: memref<16x128xbf16, #tpu.memory_space<vmem>>) attributes {dimension_semantics = [#tpu.dimension_semantics<parallel>], iteration_bounds = array<i64: 1>, scalar_prefetch = 0 : i64, scratch_operands = 0 : i64, tpu.core_type = #tpu.core_type<tc>, window_params = [{transform_indices = @transform_0, window_bounds = array<i64: 16, 640>}, {pipeline_mode = #tpu.pipeline_mode<synchronous>, transform_indices = @transform_1, window_bounds = array<i64: 640, 128>}, {pipeline_mode = #tpu.pipeline_mode<synchronous>, transform_indices = @transform_2, window_bounds = array<i64: 1, 128>}, {transform_indices = @transform_3, window_bounds = array<i64: 16, 128>}]} {
    %c0 = arith.constant 0 : index
    %c0_0 = arith.constant 0 : index
    %0 = vector.load %arg1[%c0, %c0_0] : memref<16x640xbf16, #tpu.memory_space<vmem>>, vector<16x640xbf16>
    %c0_1 = arith.constant 0 : index
    %c0_2 = arith.constant 0 : index
    %1 = vector.load %arg2[%c0_1, %c0_2] : memref<640x128xbf16, #tpu.memory_space<vmem>>, vector<640x128xbf16>
    %cst = arith.constant dense<0.000000e+00> : vector<16x128xf32>
    %2 = tpu.matmul %0, %1, %cst {dimension_numbers = #tpu.dot_dimension_numbers<[1], [0], [0], [1], [0, 0, 1, 1], [], []>} : vector<16x640xbf16>, vector<640x128xbf16>, vector<16x128xf32> -> vector<16x128xf32>
    %c0_3 = arith.constant 0 : index
    %c0_4 = arith.constant 0 : index
    %3 = vector.load %arg3[%c0_3, %c0_4] : memref<1x128xf32, #tpu.memory_space<vmem>>, vector<1x128xf32>
    %4 = vector.broadcast %3 : vector<1x128xf32> to vector<16x128xf32>
    %5 = arith.addf %2, %4 : vector<16x128xf32>
    %cst_5 = arith.constant 0.000000e+00 : f32
    %6 = vector.broadcast %cst_5 : f32 to vector<16x128xf32>
    %7 = arith.maximumf %5, %6 : vector<16x128xf32>
    %8 = arith.truncf %7 : vector<16x128xf32> to vector<16x128xbf16>
    %c0_6 = arith.constant 0 : index
    %c0_7 = arith.constant 0 : index
    %9 = vector.load %arg4[%c0_6, %c0_7] : memref<16x128xbf16, #tpu.memory_space<vmem>>, vector<16x128xbf16>
    tpu.vector_store %arg4[%c0_6, %c0_7], %8 {strides = array<i32>} : memref<16x128xbf16, #tpu.memory_space<vmem>>, vector<16x128xbf16>,
    return
  }
  func.func @transform_0(%arg0: i32) -> (i32, i32) {
    %c0_i32 = arith.constant 0 : i32
    %c0_i32_0 = arith.constant 0 : i32
    return %arg0, %c0_i32 : i32, i32
  }
  func.func @transform_1(%arg0: i32) -> (i32, i32) {
    %c0_i32 = arith.constant 0 : i32
    %c0_i32_0 = arith.constant 0 : i32
    %c0_i32_1 = arith.constant 0 : i32
    return %c0_i32, %c0_i32_0 : i32, i32
  }
  func.func @transform_2(%arg0: i32) -> (i32, i32) {
    %c0_i32 = arith.constant 0 : i32
    %c0_i32_0 = arith.constant 0 : i32
    %c0_i32_1 = arith.constant 0 : i32
    return %c0_i32, %c0_i32_0 : i32, i32
  }
  func.func @transform_3(%arg0: i32) -> (i32, i32) {
    %c0_i32 = arith.constant 0 : i32
    %c0_i32_0 = arith.constant 0 : i32
    return %arg0, %c0_i32 : i32, i32
  }
}

module attributes {stable_mosaic.version = 11 : i64} {
  func.func @_mm_bias_kernel(%arg0: i32, %arg1: memref<16x1152xbf16, #tpu.memory_space<vmem>>, %arg2: memref<1152x256xbf16, #tpu.memory_space<vmem>>, %arg3: memref<1x256xf32, #tpu.memory_space<vmem>>, %arg4: memref<16x256xbf16, #tpu.memory_space<vmem>>) attributes {dimension_semantics = [#tpu.dimension_semantics<parallel>], iteration_bounds = array<i64: 1>, scalar_prefetch = 0 : i64, scratch_operands = 0 : i64, tpu.core_type = #tpu.core_type<tc>, window_params = [{transform_indices = @transform_0, window_bounds = array<i64: 16, 1152>}, {pipeline_mode = #tpu.pipeline_mode<synchronous>, transform_indices = @transform_1, window_bounds = array<i64: 1152, 256>}, {pipeline_mode = #tpu.pipeline_mode<synchronous>, transform_indices = @transform_2, window_bounds = array<i64: 1, 256>}, {transform_indices = @transform_3, window_bounds = array<i64: 16, 256>}]} {
    %c0 = arith.constant 0 : index
    %c0_0 = arith.constant 0 : index
    %0 = vector.load %arg1[%c0, %c0_0] : memref<16x1152xbf16, #tpu.memory_space<vmem>>, vector<16x1152xbf16>
    %c0_1 = arith.constant 0 : index
    %c0_2 = arith.constant 0 : index
    %1 = vector.load %arg2[%c0_1, %c0_2] : memref<1152x256xbf16, #tpu.memory_space<vmem>>, vector<1152x256xbf16>
    %cst = arith.constant dense<0.000000e+00> : vector<16x256xf32>
    %2 = tpu.matmul %0, %1, %cst {dimension_numbers = #tpu.dot_dimension_numbers<[1], [0], [0], [1], [0, 0, 1, 1], [], []>} : vector<16x1152xbf16>, vector<1152x256xbf16>, vector<16x256xf32> -> vector<16x256xf32>
    %c0_3 = arith.constant 0 : index
    %c0_4 = arith.constant 0 : index
    %3 = vector.load %arg3[%c0_3, %c0_4] : memref<1x256xf32, #tpu.memory_space<vmem>>, vector<1x256xf32>
    %4 = vector.broadcast %3 : vector<1x256xf32> to vector<16x256xf32>
    %5 = arith.addf %2, %4 : vector<16x256xf32>
    %cst_5 = arith.constant 0.000000e+00 : f32
    %6 = vector.broadcast %cst_5 : f32 to vector<16x256xf32>
    %7 = arith.maximumf %5, %6 : vector<16x256xf32>
    %8 = arith.truncf %7 : vector<16x256xf32> to vector<16x256xbf16>
    %c0_6 = arith.constant 0 : index
    %c0_7 = arith.constant 0 : index
    %9 = vector.load %arg4[%c0_6, %c0_7] : memref<16x256xbf16, #tpu.memory_space<vmem>>, vector<16x256xbf16>
    tpu.vector_store %arg4[%c0_6, %c0_7], %8 {strides = array<i32>} : memref<16x256xbf16, #tpu.memory_space<vmem>>, vector<16x256xbf16>,
    return
  }
  func.func @transform_0(%arg0: i32) -> (i32, i32) {
    %c0_i32 = arith.constant 0 : i32
    %c0_i32_0 = arith.constant 0 : i32
    return %arg0, %c0_i32 : i32, i32
  }
  func.func @transform_1(%arg0: i32) -> (i32, i32) {
    %c0_i32 = arith.constant 0 : i32
    %c0_i32_0 = arith.constant 0 : i32
    %c0_i32_1 = arith.constant 0 : i32
    return %c0_i32, %c0_i32_0 : i32, i32
  }
  func.func @transform_2(%arg0: i32) -> (i32, i32) {
    %c0_i32 = arith.constant 0 : i32
    %c0_i32_0 = arith.constant 0 : i32
    %c0_i32_1 = arith.constant 0 : i32
    return %c0_i32, %c0_i32_0 : i32, i32
  }
  func.func @transform_3(%arg0: i32) -> (i32, i32) {
    %c0_i32 = arith.constant 0 : i32
    %c0_i32_0 = arith.constant 0 : i32
    return %arg0, %c0_i32 : i32, i32
  }
}

module attributes {stable_mosaic.version = 11 : i64} {
  func.func @_mm_bias_kernel(%arg0: i32, %arg1: memref<16x2304xbf16, #tpu.memory_space<vmem>>, %arg2: memref<2304x256xbf16, #tpu.memory_space<vmem>>, %arg3: memref<1x256xf32, #tpu.memory_space<vmem>>, %arg4: memref<16x256xbf16, #tpu.memory_space<vmem>>) attributes {dimension_semantics = [#tpu.dimension_semantics<parallel>], iteration_bounds = array<i64: 1>, scalar_prefetch = 0 : i64, scratch_operands = 0 : i64, tpu.core_type = #tpu.core_type<tc>, window_params = [{transform_indices = @transform_0, window_bounds = array<i64: 16, 2304>}, {pipeline_mode = #tpu.pipeline_mode<synchronous>, transform_indices = @transform_1, window_bounds = array<i64: 2304, 256>}, {pipeline_mode = #tpu.pipeline_mode<synchronous>, transform_indices = @transform_2, window_bounds = array<i64: 1, 256>}, {transform_indices = @transform_3, window_bounds = array<i64: 16, 256>}]} {
    %c0 = arith.constant 0 : index
    %c0_0 = arith.constant 0 : index
    %0 = vector.load %arg1[%c0, %c0_0] : memref<16x2304xbf16, #tpu.memory_space<vmem>>, vector<16x2304xbf16>
    %c0_1 = arith.constant 0 : index
    %c0_2 = arith.constant 0 : index
    %1 = vector.load %arg2[%c0_1, %c0_2] : memref<2304x256xbf16, #tpu.memory_space<vmem>>, vector<2304x256xbf16>
    %cst = arith.constant dense<0.000000e+00> : vector<16x256xf32>
    %2 = tpu.matmul %0, %1, %cst {dimension_numbers = #tpu.dot_dimension_numbers<[1], [0], [0], [1], [0, 0, 1, 1], [], []>} : vector<16x2304xbf16>, vector<2304x256xbf16>, vector<16x256xf32> -> vector<16x256xf32>
    %c0_3 = arith.constant 0 : index
    %c0_4 = arith.constant 0 : index
    %3 = vector.load %arg3[%c0_3, %c0_4] : memref<1x256xf32, #tpu.memory_space<vmem>>, vector<1x256xf32>
    %4 = vector.broadcast %3 : vector<1x256xf32> to vector<16x256xf32>
    %5 = arith.addf %2, %4 : vector<16x256xf32>
    %cst_5 = arith.constant 0.000000e+00 : f32
    %6 = vector.broadcast %cst_5 : f32 to vector<16x256xf32>
    %7 = arith.maximumf %5, %6 : vector<16x256xf32>
    %8 = arith.truncf %7 : vector<16x256xf32> to vector<16x256xbf16>
    %c0_6 = arith.constant 0 : index
    %c0_7 = arith.constant 0 : index
    %9 = vector.load %arg4[%c0_6, %c0_7] : memref<16x256xbf16, #tpu.memory_space<vmem>>, vector<16x256xbf16>
    tpu.vector_store %arg4[%c0_6, %c0_7], %8 {strides = array<i32>} : memref<16x256xbf16, #tpu.memory_space<vmem>>, vector<16x256xbf16>,
    return
  }
  func.func @transform_0(%arg0: i32) -> (i32, i32) {
    %c0_i32 = arith.constant 0 : i32
    %c0_i32_0 = arith.constant 0 : i32
    return %arg0, %c0_i32 : i32, i32
  }
  func.func @transform_1(%arg0: i32) -> (i32, i32) {
    %c0_i32 = arith.constant 0 : i32
    %c0_i32_0 = arith.constant 0 : i32
    %c0_i32_1 = arith.constant 0 : i32
    return %c0_i32, %c0_i32_0 : i32, i32
  }
  func.func @transform_2(%arg0: i32) -> (i32, i32) {
    %c0_i32 = arith.constant 0 : i32
    %c0_i32_0 = arith.constant 0 : i32
    %c0_i32_1 = arith.constant 0 : i32
    return %c0_i32, %c0_i32_0 : i32, i32
  }
  func.func @transform_3(%arg0: i32) -> (i32, i32) {
    %c0_i32 = arith.constant 0 : i32
    %c0_i32_0 = arith.constant 0 : i32
    return %arg0, %c0_i32 : i32, i32
  }
}

module attributes {stable_mosaic.version = 11 : i64} {
  func.func @_pose_kernel(%arg0: memref<2x1x256xbf16, #tpu.memory_space<vmem>>, %arg1: memref<256x12xbf16, #tpu.memory_space<vmem>>, %arg2: memref<1x12xf32, #tpu.memory_space<vmem>>, %arg3: memref<2x12xf32, #tpu.memory_space<vmem>>) attributes {dimension_semantics = [], scalar_prefetch = 0 : i64, scratch_operands = 0 : i64, tpu.core_type = #tpu.core_type<tc>} {
    %c0 = arith.constant 0 : index
    %c0_0 = arith.constant 0 : index
    %c0_1 = arith.constant 0 : index
    %0 = vector.load %arg0[%c0, %c0_0, %c0_1] : memref<2x1x256xbf16, #tpu.memory_space<vmem>>, vector<2x1x256xbf16>
    %1 = arith.extf %0 : vector<2x1x256xbf16> to vector<2x1x256xf32>
    %cst = arith.constant dense<0.000000e+00> : vector<2x256xf32>
    %2 = vector.multi_reduction <add>, %1, %cst [1] : vector<2x1x256xf32> to vector<2x256xf32>
    %cst_2 = arith.constant 1.000000e+00 : f32
    %3 = vector.broadcast %cst_2 : f32 to vector<2x256xf32>
    %4 = arith.divf %2, %3 : vector<2x256xf32>
    %5 = arith.truncf %4 : vector<2x256xf32> to vector<2x256xbf16>
    %c0_3 = arith.constant 0 : index
    %c0_4 = arith.constant 0 : index
    %6 = vector.load %arg1[%c0_3, %c0_4] : memref<256x12xbf16, #tpu.memory_space<vmem>>, vector<256x12xbf16>
    %cst_5 = arith.constant dense<0.000000e+00> : vector<2x12xf32>
    %7 = tpu.matmul %5, %6, %cst_5 {dimension_numbers = #tpu.dot_dimension_numbers<[1], [0], [0], [1], [0, 0, 1, 1], [], []>} : vector<2x256xbf16>, vector<256x12xbf16>, vector<2x12xf32> -> vector<2x12xf32>
    %c0_6 = arith.constant 0 : index
    %c0_7 = arith.constant 0 : index
    %8 = vector.load %arg2[%c0_6, %c0_7] : memref<1x12xf32, #tpu.memory_space<vmem>>, vector<1x12xf32>
    %9 = vector.broadcast %8 : vector<1x12xf32> to vector<2x12xf32>
    %10 = arith.addf %7, %9 : vector<2x12xf32>
    %cst_8 = arith.constant 0.00999999977 : f32
    %11 = vector.broadcast %cst_8 : f32 to vector<2x12xf32>
    %12 = arith.mulf %11, %10 : vector<2x12xf32>
    %c0_9 = arith.constant 0 : index
    %c0_10 = arith.constant 0 : index
    %13 = vector.load %arg3[%c0_9, %c0_10] : memref<2x12xf32, #tpu.memory_space<vmem>>, vector<2x12xf32>
    tpu.vector_store %arg3[%c0_9, %c0_10], %12 {strides = array<i32>} : memref<2x12xf32, #tpu.memory_space<vmem>>, vector<2x12xf32>,
    return
  }
}

</mosaic_0001>

<bundles_post_ra>
// kernel: pose_exp_net_forward.8
= control target key start
LH: loop header
LB: loop body
LE: loop exit
PB: predicated region body
PF: predicated region fallthrough
CT: control target
= control target key end

     0   :  { %v2656_v0 = vmov 0   ;;  %vm1944_vm0 = vcmask 125952   ;;  %s3519_s1 = inlined_call_operand.vmem [shape: bf16[512,16], index: 1, kind: input, shape index: {}]   ;;  %s3520_s0 = inlined_call_operand.vmem [shape: bf16[512,512], index: 0, kind: input, shape index: {}]   ;;  %s3521_s2 = inlined_call_operand.vmem [shape: f32[1,16], index: 2, kind: input, shape index: {}]   ;;  %s3522_s3 = inlined_call_operand.vmem [shape: bf16[512,16], index: 3, kind: output, shape index: {}]  }
   0x1   :  { %1046 = vmatprep.subr.bf16.mxu1 %v2656_v0  ;;  %1335 = vmatprep.subr.bf16.mxu0 %v2656_v0  ;;  %v2431_v1 = vld [vmem:[%s3519_s1] sm:$0xff]   ;;  %v2433_v3 = vld [vmem:[%s3519_s1 + $0x8] sm:$0xff]   ;;  %v2435_v5 = vld [vmem:[%s3519_s1 + $0x10] sm:$0xff]  }
   0x2   :  { %v2432_v2 = vld [vmem:[%s3519_s1 + $0x80] sm:$0xff]   ;;  %1047 = vmatpush1.bf16.msra.mxu1 %v2431_v1  ;;  %v2434_v4 = vld [vmem:[%s3519_s1 + $0x88] sm:$0xff]   ;;  %v2436_v6 = vld [vmem:[%s3519_s1 + $0x90] sm:$0xff]  }
   0x3   :  { %1336 = vmatpush1.bf16.msra.mxu0 %v2432_v2  ;;  %1048 = vmatprep.subr.bf16.mxu1 %v2656_v0  ;;  %v2437_v7 = vld [vmem:[%s3519_s1 + $0x18] sm:$0xff]   ;;  %v2439_v9 = vld [vmem:[%s3519_s1 + $0x20] sm:$0xff]   ;;  %v2441_v11 = vld [vmem:[%s3519_s1 + $0x28] sm:$0xff]  }
   0x4   :  { %1337 = vmatprep.subr.bf16.mxu0 %v2656_v0  ;;  %v2438_v8 = vld [vmem:[%s3519_s1 + $0x98] sm:$0xff]   ;;  %v2440_v10 = vld [vmem:[%s3519_s1 + $0xa0] sm:$0xff]   ;;  %v2442_v12 = vld [vmem:[%s3519_s1 + $0xa8] sm:$0xff]  }
   0x5   :  { %v2443_v13 = vld [vmem:[%s3519_s1 + $0x30] sm:$0xff]   ;;  %v2445_v15 = vld [vmem:[%s3519_s1 + $0x38] sm:$0xff]   ;;  %v2447_v17 = vld [vmem:[%s3519_s1 + $0x40] sm:$0xff]  }
   0x6   :  { %1049 = vmatpush1.bf16.msra.mxu1 %v2433_v3  ;;  %v2444_v14 = vld [vmem:[%s3519_s1 + $0xb0] sm:$0xff]   ;;  %v2446_v16 = vld [vmem:[%s3519_s1 + $0xb8] sm:$0xff]   ;;  %v2448_v18 = vld [vmem:[%s3519_s1 + $0xc0] sm:$0xff]  }
   0x7   :  { %1338 = vmatpush1.bf16.msra.mxu0 %v2434_v4  ;;  %1050 = vmatprep.subr.bf16.mxu1 %v2656_v0  ;;  %v2465_v19 = vld [vmem:[%s3520_s0 + $0x4] ss:$16 sps:$4 sm:$0xff]   ;;  %v2449_v20 = vld [vmem:[%s3519_s1 + $0x48] sm:$0xff]   ;;  %v2453_v25 = vld [vmem:[%s3519_s1 + $0x58] sm:$0xff]  }
   0x8   :  { %1339 = vmatprep.subr.bf16.mxu0 %v2656_v0  ;;  %v2468_v21 = vld [vmem:[%s3520_s0 + $0xc] ss:$16 sps:$4 sm:$0xff]   ;;  %1078 = vmatprep.mubr.bf16.mxu1 %v2465_v19  ;;  %v2451_v23 = vld [vmem:[%s3519_s1 + $0x50] sm:$0xff]   ;;  %v2455_v27 = vld [vmem:[%s3519_s1 + $0x60] sm:$0xff]  }
   0x9   :  { %v2450_v22 = vld [vmem:[%s3519_s1 + $0xc8] sm:$0xff]   ;;  %1367 = vmatprep.mubr.bf16.mxu0 %v2468_v21  ;;  %v2452_v24 = vld [vmem:[%s3519_s1 + $0xd0] sm:$0xff]   ;;  %v2454_v26 = vld [vmem:[%s3519_s1 + $0xd8] sm:$0xff]  }
   0xa   :  { %1051 = vmatpush1.bf16.msra.mxu1 %v2435_v5  ;;  %v2456_v28 = vld [vmem:[%s3519_s1 + $0xe0] sm:$0xff]   ;;  %v2457_v29 = vld [vmem:[%s3519_s1 + $0x68] sm:$0xff]   ;;  %v2459_v31 = vld [vmem:[%s3519_s1 + $0x70] sm:$0xff]  }
   0xb   :  { %1340 = vmatpush1.bf16.msra.mxu0 %v2436_v6  ;;  %1052 = vmatprep.subr.bf16.mxu1 %v2656_v0  ;;  %v2458_v30 = vld [vmem:[%s3519_s1 + $0xe8] sm:$0xff]   ;;  %v2460_v32 = vld [vmem:[%s3519_s1 + $0xf0] sm:$0xff]   ;;  %v2461_v33 = vld [vmem:[%s3519_s1 + $0x78] sm:$0xff]  }
   0xc   :  { %1341 = vmatprep.subr.bf16.mxu0 %v2656_v0  ;;  %v2462_v34 = vld [vmem:[%s3519_s1 + $0xf8] sm:$0xff]   ;;  %v2463_v35 = vld [vmem:[%s3520_s0] ss:$16 sps:$4 sm:$0xff]   ;;  %v2469_v37 = vld [vmem:[%s3520_s0 + $0x24] ss:$16 sps:$4 sm:$0xff]  }
   0xd   :  { %v2466_v36 = vld [vmem:[%s3520_s0 + $0x8] ss:$16 sps:$4 sm:$0xff]   ;;  %v2471_v38 = vld [vmem:[%s3520_s0 + $0x2c] ss:$16 sps:$4 sm:$0xff]   ;;  %v2473_v39 = vld [vmem:[%s3520_s0 + $0x20] ss:$16 sps:$4 sm:$0xff]  }
   0xe   :  { %1053 = vmatpush1.bf16.msra.mxu1 %v2437_v7  ;;  %v2474_v40 = vld [vmem:[%s3520_s0 + $0x28] ss:$16 sps:$4 sm:$0xff]   ;;  %v2475_v41 = vld [vmem:[%s3520_s0 + $0x44] ss:$16 sps:$4 sm:$0xff]   ;;  %v2477_v42 = vld [vmem:[%s3520_s0 + $0x4c] ss:$16 sps:$4 sm:$0xff]  }
   0xf   :  { %1342 = vmatpush1.bf16.msra.mxu0 %v2438_v8  ;;  %1054 = vmatprep.subr.bf16.mxu1 %v2656_v0  ;;  %v2479_v43 = vld [vmem:[%s3520_s0 + $0x40] ss:$16 sps:$4 sm:$0xff]   ;;  %v2480_v44 = vld [vmem:[%s3520_s0 + $0x48] ss:$16 sps:$4 sm:$0xff]   ;;  %v2481_v45 = vld [vmem:[%s3520_s0 + $0x64] ss:$16 sps:$4 sm:$0xff]  }
  0x10   :  { %1343 = vmatprep.subr.bf16.mxu0 %v2656_v0  ;;  %v2483_v46 = vld [vmem:[%s3520_s0 + $0x6c] ss:$16 sps:$4 sm:$0xff]   ;;  %v2485_v47 = vld [vmem:[%s3520_s0 + $0x60] ss:$16 sps:$4 sm:$0xff]   ;;  %v2486_v48 = vld [vmem:[%s3520_s0 + $0x68] ss:$16 sps:$4 sm:$0xff]  }
  0x11   :  { %v2487_v49 = vld [vmem:[%s3520_s0 + $0x84] ss:$16 sps:$4 sm:$0xff]   ;;  %v2489_v50 = vld [vmem:[%s3520_s0 + $0x8c] ss:$16 sps:$4 sm:$0xff]   ;;  %v2491_v51 = vld [vmem:[%s3520_s0 + $0x80] ss:$16 sps:$4 sm:$0xff]  }
  0x12   :  { %1055 = vmatpush1.bf16.msra.mxu1 %v2439_v9  ;;  %v2492_v52 = vld [vmem:[%s3520_s0 + $0x88] ss:$16 sps:$4 sm:$0xff]   ;;  %v2493_v53 = vld [vmem:[%s3520_s0 + $0xa4] ss:$16 sps:$4 sm:$0xff]   ;;  %v2495_v54 = vld [vmem:[%s3520_s0 + $0xac] ss:$16 sps:$4 sm:$0xff]  }
  0x13   :  { %1344 = vmatpush1.bf16.msra.mxu0 %v2440_v10  ;;  %1056 = vmatprep.subr.bf16.mxu1 %v2656_v0  ;;  %v2497_v55 = vld [vmem:[%s3520_s0 + $0xa0] ss:$16 sps:$4 sm:$0xff]   ;;  %v2498_v56 = vld [vmem:[%s3520_s0 + $0xa8] ss:$16 sps:$4 sm:$0xff]   ;;  %v2499_v57 = vld [vmem:[%s3520_s0 + $0xc4] ss:$16 sps:$4 sm:$0xff]  }
  0x14   :  { %1345 = vmatprep.subr.bf16.mxu0 %v2656_v0  ;;  %v2501_v58 = vld [vmem:[%s3520_s0 + $0xcc] ss:$16 sps:$4 sm:$0xff]   ;;  %v2503_v59 = vld [vmem:[%s3520_s0 + $0xc0] ss:$16 sps:$4 sm:$0xff]   ;;  %v2504_v60 = vld [vmem:[%s3520_s0 + $0xc8] ss:$16 sps:$4 sm:$0xff]  }
  0x15   :  { %v2505_v61 = vld [vmem:[%s3520_s0 + $0xe4] ss:$16 sps:$4 sm:$0xff]   ;;  %v2507_v62 = vld [vmem:[%s3520_s0 + $0xec] ss:$16 sps:$4 sm:$0xff]   ;;  %v2509_v63 = vld [vmem:[%s3520_s0 + $0xe0] ss:$16 sps:$4 sm:$0xff]  }
  0x16   :  { %1057 = vmatpush1.bf16.msra.mxu1 %v2441_v11  ;;  %v2511_v1 = vld [vmem:[%s3520_s0 + $0x104] ss:$16 sps:$4 sm:$0xff]   ;;  %v2513_v2 = vld [vmem:[%s3520_s0 + $0x10c] ss:$16 sps:$4 sm:$0xff]   ;;  %v2515_v3 = vld [vmem:[%s3520_s0 + $0x100] ss:$16 sps:$4 sm:$0xff]  }
  0x17   :  { %1346 = vmatpush1.bf16.msra.mxu0 %v2442_v12  ;;  %1058 = vmatprep.subr.bf16.mxu1 %v2656_v0  ;;  %v2516_v4 = vld [vmem:[%s3520_s0 + $0x108] ss:$16 sps:$4 sm:$0xff]   ;;  %v2517_v5 = vld [vmem:[%s3520_s0 + $0x124] ss:$16 sps:$4 sm:$0xff]   ;;  %v2519_v6 = vld [vmem:[%s3520_s0 + $0x12c] ss:$16 sps:$4 sm:$0xff]  }
  0x18   :  { %1347 = vmatprep.subr.bf16.mxu0 %v2656_v0  ;;  %v2521_v7 = vld [vmem:[%s3520_s0 + $0x120] ss:$16 sps:$4 sm:$0xff]   ;;  %v2522_v8 = vld [vmem:[%s3520_s0 + $0x128] ss:$16 sps:$4 sm:$0xff]   ;;  %v2523_v9 = vld [vmem:[%s3520_s0 + $0x144] ss:$16 sps:$4 sm:$0xff]  }
  0x19   :  { %v2525_v10 = vld [vmem:[%s3520_s0 + $0x14c] ss:$16 sps:$4 sm:$0xff]   ;;  %v2527_v11 = vld [vmem:[%s3520_s0 + $0x140] ss:$16 sps:$4 sm:$0xff]   ;;  %v2528_v12 = vld [vmem:[%s3520_s0 + $0x148] ss:$16 sps:$4 sm:$0xff]  }
  0x1a   :  { %1059 = vmatpush1.bf16.msra.mxu1 %v2443_v13  ;;  %v2529_v13 = vld [vmem:[%s3520_s0 + $0x164] ss:$16 sps:$4 sm:$0xff]   ;;  %v2539_v19 = vld [vmem:[%s3520_s0 + $0x180] ss:$16 sps:$4 sm:$0xff]  }
  0x1b   :  { %1348 = vmatpush1.bf16.msra.mxu0 %v2444_v14  ;;  %1060 = vmatprep.subr.bf16.mxu1 %v2656_v0  ;;  %v2531_v14 = vld [vmem:[%s3520_s0 + $0x16c] ss:$16 sps:$4 sm:$0xff]   ;;  %v2541_v21 = vld [vmem:[%s3520_s0 + $0x1a4] ss:$16 sps:$4 sm:$0xff]  }
  0x1c   :  { %1349 = vmatprep.subr.bf16.mxu0 %v2656_v0 }
  0x1e   :  { %1061 = vmatpush1.bf16.msra.mxu1 %v2445_v15  ;;  %v2533_v15 = vld [vmem:[%s3520_s0 + $0x160] ss:$16 sps:$4 sm:$0xff]  }
  0x1f   :  { %1350 = vmatpush1.bf16.msra.mxu0 %v2446_v16  ;;  %1062 = vmatprep.subr.bf16.mxu1 %v2656_v0  ;;  %v2534_v16 = vld [vmem:[%s3520_s0 + $0x168] ss:$16 sps:$4 sm:$0xff]  }
  0x20   :  { %1351 = vmatprep.subr.bf16.mxu0 %v2656_v0 }
  0x22   :  { %1063 = vmatpush1.bf16.msra.mxu1 %v2447_v17  ;;  %v2535_v17 = vld [vmem:[%s3520_s0 + $0x184] ss:$16 sps:$4 sm:$0xff]  }
  0x23   :  { %1352 = vmatpush1.bf16.msra.mxu0 %v2448_v18  ;;  %1064 = vmatprep.subr.bf16.mxu1 %v2656_v0  ;;  %v2537_v18 = vld [vmem:[%s3520_s0 + $0x18c] ss:$16 sps:$4 sm:$0xff]  }
  0x24   :  { %1353 = vmatprep.subr.bf16.mxu0 %v2656_v0 }
  0x26   :  { %1065 = vmatpush1.bf16.msra.mxu1 %v2449_v20  ;;  %v2540_v20 = vld [vmem:[%s3520_s0 + $0x188] ss:$16 sps:$4 sm:$0xff]  }
  0x27   :  { %1354 = vmatpush1.bf16.msra.mxu0 %v2450_v22  ;;  %1066 = vmatprep.subr.bf16.mxu1 %v2656_v0  ;;  %v2543_v22 = vld [vmem:[%s3520_s0 + $0x1ac] ss:$16 sps:$4 sm:$0xff]  }
  0x28   :  { %1355 = vmatprep.subr.bf16.mxu0 %v2656_v0 }
  0x2a   :  { %1067 = vmatpush1.bf16.msra.mxu1 %v2451_v23  ;;  %v2545_v23 = vld [vmem:[%s3520_s0 + $0x1a0] ss:$16 sps:$4 sm:$0xff]  }
  0x2b   :  { %1356 = vmatpush1.bf16.msra.mxu0 %v2452_v24  ;;  %1068 = vmatprep.subr.bf16.mxu1 %v2656_v0  ;;  %v2546_v24 = vld [vmem:[%s3520_s0 + $0x1a8] ss:$16 sps:$4 sm:$0xff]  }
  0x2c   :  { %1357 = vmatprep.subr.bf16.mxu0 %v2656_v0 }
  0x2e   :  { %1069 = vmatpush1.bf16.msra.mxu1 %v2453_v25  ;;  %v2547_v25 = vld [vmem:[%s3520_s0 + $0x1c4] ss:$16 sps:$4 sm:$0xff]  }
  0x2f   :  { %1358 = vmatpush1.bf16.msra.mxu0 %v2454_v26  ;;  %1070 = vmatprep.subr.bf16.mxu1 %v2656_v0  ;;  %v2549_v26 = vld [vmem:[%s3520_s0 + $0x1cc] ss:$16 sps:$4 sm:$0xff]  }
  0x30   :  { %1359 = vmatprep.subr.bf16.mxu0 %v2656_v0 }
  0x32   :  { %1071 = vmatpush1.bf16.msra.mxu1 %v2455_v27  ;;  %v2551_v27 = vld [vmem:[%s3520_s0 + $0x1c0] ss:$16 sps:$4 sm:$0xff]  }
  0x33   :  { %1360 = vmatpush1.bf16.msra.mxu0 %v2456_v28  ;;  %1072 = vmatprep.subr.bf16.mxu1 %v2656_v0  ;;  %v2552_v28 = vld [vmem:[%s3520_s0 + $0x1c8] ss:$16 sps:$4 sm:$0xff]  }
  0x34   :  { %1361 = vmatprep.subr.bf16.mxu0 %v2656_v0 }
  0x36   :  { %1073 = vmatpush1.bf16.msra.mxu1 %v2457_v29  ;;  %v2553_v29 = vld [vmem:[%s3520_s0 + $0x1e4] ss:$16 sps:$4 sm:$0xff]  }
  0x37   :  { %1362 = vmatpush1.bf16.msra.mxu0 %v2458_v30  ;;  %1074 = vmatprep.subr.bf16.mxu1 %v2656_v0  ;;  %v2555_v30 = vld [vmem:[%s3520_s0 + $0x1ec] ss:$16 sps:$4 sm:$0xff]  }
  0x38   :  { %1363 = vmatprep.subr.bf16.mxu0 %v2656_v0 }
  0x3a   :  { %1075 = vmatpush1.bf16.msra.mxu1 %v2459_v31  ;;  %v2557_v31 = vld [vmem:[%s3520_s0 + $0x1e0] ss:$16 sps:$4 sm:$0xff]  }
  0x3b   :  { %1364 = vmatpush1.bf16.msra.mxu0 %v2460_v32  ;;  %1076 = vmatprep.subr.bf16.mxu1 %v2656_v0  ;;  %v2558_v32 = vld [vmem:[%s3520_s0 + $0x1e8] ss:$16 sps:$4 sm:$0xff]  }
  0x3c   :  { %1365 = vmatprep.subr.bf16.mxu0 %v2656_v0  ;;  %v2510_v0 = vld [vmem:[%s3520_s0 + $0xe8] ss:$16 sps:$4 sm:$0xff]  }
  0x3e   :  { %1077 = vmatpush1.bf16.msra.mxu1 %v2461_v33  ;;  %v2559_v33 = vld [vmem:[%s3520_s0 + $0x204] ss:$16 sps:$4 sm:$0xff]  }
  0x3f   :  { %1366 = vmatpush1.bf16.msra.mxu0 %v2462_v34  ;;  %v2561_v34 = vld [vmem:[%s3520_s0 + $0x20c] ss:$16 sps:$4 sm:$0xff]  }
  0x41   :  { %1079 = vmatmul.mubr.bf16.vlgmr.msra.gmra.mrb[0].mxu1 %v2463_v35  ;;  %v2563_v35 = vld [vmem:[%s3520_s0 + $0x200] ss:$16 sps:$4 sm:$0xff]  }
  0x42   :  { %1368 = vmatmul.mubr.bf16.vlgmr.msra.gmra.mrb[0].mxu0 %v2466_v36  ;;  %1086 = vmatprep.mubr.bf16.mxu1 %v2469_v37  ;;  %v2564_v36 = vld [vmem:[%s3520_s0 + $0x208] ss:$16 sps:$4 sm:$0xff]   ;;  %v2565_v37 = vld [vmem:[%s3520_s0 + $0x224] ss:$16 sps:$4 sm:$0xff]  }
  0x43   :  { %1375 = vmatprep.mubr.bf16.mxu0 %v2471_v38  ;;  %v2567_v38 = vld [vmem:[%s3520_s0 + $0x22c] ss:$16 sps:$4 sm:$0xff]  }
  0x49   :  { %1087 = vmatmul.mubr.bf16.gmra.mrb[4].mxu1 %v2473_v39  ;;  %v2569_v39 = vld [vmem:[%s3520_s0 + $0x220] ss:$16 sps:$4 sm:$0xff]  }
  0x4a   :  { %1376 = vmatmul.mubr.bf16.gmra.mrb[4].mxu0 %v2474_v40  ;;  %1094 = vmatprep.mubr.bf16.mxu1 %v2475_v41  ;;  %v2570_v40 = vld [vmem:[%s3520_s0 + $0x228] ss:$16 sps:$4 sm:$0xff]   ;;  %v2571_v41 = vld [vmem:[%s3520_s0 + $0x244] ss:$16 sps:$4 sm:$0xff]  }
  0x4b   :  { %1383 = vmatprep.mubr.bf16.mxu0 %v2477_v42  ;;  %v2573_v42 = vld [vmem:[%s3520_s0 + $0x24c] ss:$16 sps:$4 sm:$0xff]  }
  0x51   :  { %1095 = vmatmul.mubr.bf16.gmra.mrb[8].mxu1 %v2479_v43  ;;  %v2575_v43 = vld [vmem:[%s3520_s0 + $0x240] ss:$16 sps:$4 sm:$0xff]  }
  0x52   :  { %1384 = vmatmul.mubr.bf16.gmra.mrb[8].mxu0 %v2480_v44  ;;  %1102 = vmatprep.mubr.bf16.mxu1 %v2481_v45  ;;  %v2576_v44 = vld [vmem:[%s3520_s0 + $0x248] ss:$16 sps:$4 sm:$0xff]   ;;  %v2577_v45 = vld [vmem:[%s3520_s0 + $0x264] ss:$16 sps:$4 sm:$0xff]  }
  0x53   :  { %1391 = vmatprep.mubr.bf16.mxu0 %v2483_v46  ;;  %v2579_v46 = vld [vmem:[%s3520_s0 + $0x26c] ss:$16 sps:$4 sm:$0xff]  }
  0x59   :  { %1103 = vmatmul.mubr.bf16.gmra.mrb[12].mxu1 %v2485_v47  ;;  %v2581_v47 = vld [vmem:[%s3520_s0 + $0x260] ss:$16 sps:$4 sm:$0xff]  }
  0x5a   :  { %1392 = vmatmul.mubr.bf16.gmra.mrb[12].mxu0 %v2486_v48  ;;  %1110 = vmatprep.mubr.bf16.mxu1 %v2487_v49  ;;  %v2582_v48 = vld [vmem:[%s3520_s0 + $0x268] ss:$16 sps:$4 sm:$0xff]   ;;  %v2583_v49 = vld [vmem:[%s3520_s0 + $0x284] ss:$16 sps:$4 sm:$0xff]  }
  0x5b   :  { %1399 = vmatprep.mubr.bf16.mxu0 %v2489_v50  ;;  %v2585_v50 = vld [vmem:[%s3520_s0 + $0x28c] ss:$16 sps:$4 sm:$0xff]  }
  0x61   :  { %1111 = vmatmul.mubr.bf16.gmra.mrb[16].mxu1 %v2491_v51  ;;  %v2587_v51 = vld [vmem:[%s3520_s0 + $0x280] ss:$16 sps:$4 sm:$0xff]  }
  0x62   :  { %1400 = vmatmul.mubr.bf16.gmra.mrb[16].mxu0 %v2492_v52  ;;  %1118 = vmatprep.mubr.bf16.mxu1 %v2493_v53  ;;  %v2588_v52 = vld [vmem:[%s3520_s0 + $0x288] ss:$16 sps:$4 sm:$0xff]   ;;  %v2589_v53 = vld [vmem:[%s3520_s0 + $0x2a4] ss:$16 sps:$4 sm:$0xff]  }
  0x63   :  { %1407 = vmatprep.mubr.bf16.mxu0 %v2495_v54  ;;  %v2591_v54 = vld [vmem:[%s3520_s0 + $0x2ac] ss:$16 sps:$4 sm:$0xff]  }
  0x69   :  { %1119 = vmatmul.mubr.bf16.gmra.mrb[20].mxu1 %v2497_v55  ;;  %v2593_v55 = vld [vmem:[%s3520_s0 + $0x2a0] ss:$16 sps:$4 sm:$0xff]  }
  0x6a   :  { %1408 = vmatmul.mubr.bf16.gmra.mrb[20].mxu0 %v2498_v56  ;;  %1126 = vmatprep.mubr.bf16.mxu1 %v2499_v57  ;;  %v2594_v56 = vld [vmem:[%s3520_s0 + $0x2a8] ss:$16 sps:$4 sm:$0xff]   ;;  %v2595_v57 = vld [vmem:[%s3520_s0 + $0x2c4] ss:$16 sps:$4 sm:$0xff]  }
  0x6b   :  { %1415 = vmatprep.mubr.bf16.mxu0 %v2501_v58  ;;  %v2597_v58 = vld [vmem:[%s3520_s0 + $0x2cc] ss:$16 sps:$4 sm:$0xff]  }
  0x71   :  { %1127 = vmatmul.mubr.bf16.gmra.mrb[24].mxu1 %v2503_v59  ;;  %v2599_v59 = vld [vmem:[%s3520_s0 + $0x2c0] ss:$16 sps:$4 sm:$0xff]  }
  0x72   :  { %1416 = vmatmul.mubr.bf16.gmra.mrb[24].mxu0 %v2504_v60  ;;  %1134 = vmatprep.mubr.bf16.mxu1 %v2505_v61  ;;  %v2600_v60 = vld [vmem:[%s3520_s0 + $0x2c8] ss:$16 sps:$4 sm:$0xff]   ;;  %v2601_v61 = vld [vmem:[%s3520_s0 + $0x2e4] ss:$16 sps:$4 sm:$0xff]  }
  0x73   :  { %1423 = vmatprep.mubr.bf16.mxu0 %v2507_v62  ;;  %v2603_v62 = vld [vmem:[%s3520_s0 + $0x2ec] ss:$16 sps:$4 sm:$0xff]  }
  0x79   :  { %1135 = vmatmul.mubr.bf16.gmra.mrb[28].mxu1 %v2509_v63  ;;  %v2605_v63 = vld [vmem:[%s3520_s0 + $0x2e0] ss:$16 sps:$4 sm:$0xff]  }
  0x7a   :  { %1424 = vmatmul.mubr.bf16.gmra.mrb[28].mxu0 %v2510_v0  ;;  %1142 = vmatprep.mubr.bf16.mxu1 %v2511_v1  ;;  %v2606_v0 = vld [vmem:[%s3520_s0 + $0x2e8] ss:$16 sps:$4 sm:$0xff]   ;;  %v2607_v1 = vld [vmem:[%s3520_s0 + $0x304] ss:$16 sps:$4 sm:$0xff]  }
  0x7b   :  { %1431 = vmatprep.mubr.bf16.mxu0 %v2513_v2  ;;  %v2609_v2 = vld [vmem:[%s3520_s0 + $0x30c] ss:$16 sps:$4 sm:$0xff]  }
  0x81   :  { %1143 = vmatmul.mubr.bf16.gmra.mrb[32].mxu1 %v2515_v3  ;;  %v2611_v3 = vld [vmem:[%s3520_s0 + $0x300] ss:$16 sps:$4 sm:$0xff]  }
  0x82   :  { %1432 = vmatmul.mubr.bf16.gmra.mrb[32].mxu0 %v2516_v4  ;;  %1150 = vmatprep.mubr.bf16.mxu1 %v2517_v5  ;;  %v2612_v4 = vld [vmem:[%s3520_s0 + $0x308] ss:$16 sps:$4 sm:$0xff]   ;;  %v2613_v5 = vld [vmem:[%s3520_s0 + $0x324] ss:$16 sps:$4 sm:$0xff]  }
  0x83   :  { %1439 = vmatprep.mubr.bf16.mxu0 %v2519_v6  ;;  %v2615_v6 = vld [vmem:[%s3520_s0 + $0x32c] ss:$16 sps:$4 sm:$0xff]  }
  0x89   :  { %1151 = vmatmul.mubr.bf16.gmra.mrb[36].mxu1 %v2521_v7  ;;  %v2617_v7 = vld [vmem:[%s3520_s0 + $0x320] ss:$16 sps:$4 sm:$0xff]  }
  0x8a   :  { %1440 = vmatmul.mubr.bf16.gmra.mrb[36].mxu0 %v2522_v8  ;;  %1158 = vmatprep.mubr.bf16.mxu1 %v2523_v9  ;;  %v2618_v8 = vld [vmem:[%s3520_s0 + $0x328] ss:$16 sps:$4 sm:$0xff]   ;;  %v2619_v9 = vld [vmem:[%s3520_s0 + $0x344] ss:$16 sps:$4 sm:$0xff]  }
  0x8b   :  { %1447 = vmatprep.mubr.bf16.mxu0 %v2525_v10  ;;  %v2621_v10 = vld [vmem:[%s3520_s0 + $0x34c] ss:$16 sps:$4 sm:$0xff]  }
  0x91   :  { %1159 = vmatmul.mubr.bf16.gmra.mrb[40].mxu1 %v2527_v11  ;;  %v2623_v11 = vld [vmem:[%s3520_s0 + $0x340] ss:$16 sps:$4 sm:$0xff]  }
  0x92   :  { %1448 = vmatmul.mubr.bf16.gmra.mrb[40].mxu0 %v2528_v12  ;;  %1166 = vmatprep.mubr.bf16.mxu1 %v2529_v13  ;;  %v2624_v12 = vld [vmem:[%s3520_s0 + $0x348] ss:$16 sps:$4 sm:$0xff]   ;;  %v2625_v13 = vld [vmem:[%s3520_s0 + $0x364] ss:$16 sps:$4 sm:$0xff]  }
  0x93   :  { %1455 = vmatprep.mubr.bf16.mxu0 %v2531_v14  ;;  %v2627_v14 = vld [vmem:[%s3520_s0 + $0x36c] ss:$16 sps:$4 sm:$0xff]  }
  0x99   :  { %1167 = vmatmul.mubr.bf16.gmra.mrb[44].mxu1 %v2533_v15  ;;  %v3138_v15 = vld [vmem:[%s3521_s2] ss:$0 sm:$0xff] }
  0x9a   :  { %1456 = vmatmul.mubr.bf16.gmra.mrb[44].mxu0 %v2534_v16  ;;  %1174 = vmatprep.mubr.bf16.mxu1 %v2535_v17 }
  0x9b   :  { %1463 = vmatprep.mubr.bf16.mxu0 %v2537_v18 }
  0xa1   :  { %1175 = vmatmul.mubr.bf16.gmra.mrb[48].mxu1 %v2539_v19 }
  0xa2   :  { %1464 = vmatmul.mubr.bf16.gmra.mrb[48].mxu0 %v2540_v20  ;;  %1182 = vmatprep.mubr.bf16.mxu1 %v2541_v21  ;;  %v2629_v20 = vld [vmem:[%s3520_s0 + $0x360] ss:$16 sps:$4 sm:$0xff]  }
  0xa3   :  { %1471 = vmatprep.mubr.bf16.mxu0 %v2543_v22 }
  0xa9   :  { %1183 = vmatmul.mubr.bf16.gmra.mrb[52].mxu1 %v2545_v23  ;;  %v2630_v23 = vld [vmem:[%s3520_s0 + $0x368] ss:$16 sps:$4 sm:$0xff]  }
  0xaa   :  { %1472 = vmatmul.mubr.bf16.gmra.mrb[52].mxu0 %v2546_v24  ;;  %1190 = vmatprep.mubr.bf16.mxu1 %v2547_v25  ;;  %v2631_v24 = vld [vmem:[%s3520_s0 + $0x384] ss:$16 sps:$4 sm:$0xff]  }
  0xab   :  { %1479 = vmatprep.mubr.bf16.mxu0 %v2549_v26 }
  0xb1   :  { %1191 = vmatmul.mubr.bf16.gmra.mrb[56].mxu1 %v2551_v27 }
  0xb2   :  { %1480 = vmatmul.mubr.bf16.gmra.mrb[56].mxu0 %v2552_v28  ;;  %1198 = vmatprep.mubr.bf16.mxu1 %v2553_v29  ;;  %v2633_v29 = vld [vmem:[%s3520_s0 + $0x38c] ss:$16 sps:$4 sm:$0xff]  }
  0xb3   :  { %1487 = vmatprep.mubr.bf16.mxu0 %v2555_v30 }
  0xb9   :  { %1199 = vmatmul.mubr.bf16.gmra.mrb[60].mxu1 %v2557_v31 }
  0xba   :  { %1488 = vmatmul.mubr.bf16.gmra.mrb[60].mxu0 %v2558_v32  ;;  %1206 = vmatprep.mubr.bf16.mxu1 %v2559_v33 }
  0xbb   :  { %1495 = vmatprep.mubr.bf16.mxu0 %v2561_v34 }
  0xc1   :  { %1207 = vmatmul.mubr.bf16.gmra.mrb[64].mxu1 %v2563_v35 }
  0xc2   :  { %1496 = vmatmul.mubr.bf16.gmra.mrb[64].mxu0 %v2564_v36  ;;  %1214 = vmatprep.mubr.bf16.mxu1 %v2565_v37 }
  0xc3   :  { %1503 = vmatprep.mubr.bf16.mxu0 %v2567_v38 }
  0xc9   :  { %1215 = vmatmul.mubr.bf16.gmra.mrb[68].mxu1 %v2569_v39 }
  0xca   :  { %1504 = vmatmul.mubr.bf16.gmra.mrb[68].mxu0 %v2570_v40  ;;  %1222 = vmatprep.mubr.bf16.mxu1 %v2571_v41  ;;  %v2635_v40 = vld [vmem:[%s3520_s0 + $0x380] ss:$16 sps:$4 sm:$0xff]  }
  0xcb   :  { %1511 = vmatprep.mubr.bf16.mxu0 %v2573_v42 }
  0xd1   :  { %1223 = vmatmul.mubr.bf16.gmra.mrb[72].mxu1 %v2575_v43  ;;  %v2636_v43 = vld [vmem:[%s3520_s0 + $0x388] ss:$16 sps:$4 sm:$0xff]  }
  0xd2   :  { %1512 = vmatmul.mubr.bf16.gmra.mrb[72].mxu0 %v2576_v44  ;;  %1230 = vmatprep.mubr.bf16.mxu1 %v2577_v45  ;;  %v2637_v44 = vld [vmem:[%s3520_s0 + $0x3a4] ss:$16 sps:$4 sm:$0xff]  }
  0xd3   :  { %1519 = vmatprep.mubr.bf16.mxu0 %v2579_v46 }
  0xd9   :  { %1231 = vmatmul.mubr.bf16.gmra.mrb[76].mxu1 %v2581_v47 }
  0xda   :  { %1520 = vmatmul.mubr.bf16.gmra.mrb[76].mxu0 %v2582_v48  ;;  %1238 = vmatprep.mubr.bf16.mxu1 %v2583_v49  ;;  %v2639_v49 = vld [vmem:[%s3520_s0 + $0x3ac] ss:$16 sps:$4 sm:$0xff]  }
  0xdb   :  { %1527 = vmatprep.mubr.bf16.mxu0 %v2585_v50 }
  0xe1   :  { %1239 = vmatmul.mubr.bf16.gmra.mrb[80].mxu1 %v2587_v51 }
  0xe2   :  { %1528 = vmatmul.mubr.bf16.gmra.mrb[80].mxu0 %v2588_v52  ;;  %1246 = vmatprep.mubr.bf16.mxu1 %v2589_v53 }
  0xe3   :  { %1535 = vmatprep.mubr.bf16.mxu0 %v2591_v54 }
  0xe9   :  { %1247 = vmatmul.mubr.bf16.gmra.mrb[84].mxu1 %v2593_v55 }
  0xea   :  { %1536 = vmatmul.mubr.bf16.gmra.mrb[84].mxu0 %v2594_v56  ;;  %1254 = vmatprep.mubr.bf16.mxu1 %v2595_v57 }
  0xeb   :  { %1543 = vmatprep.mubr.bf16.mxu0 %v2597_v58 }
  0xf1   :  { %1255 = vmatmul.mubr.bf16.gmra.mrb[88].mxu1 %v2599_v59 }
  0xf2   :  { %1544 = vmatmul.mubr.bf16.gmra.mrb[88].mxu0 %v2600_v60  ;;  %1262 = vmatprep.mubr.bf16.mxu1 %v2601_v61  ;;  %v2641_v60 = vld [vmem:[%s3520_s0 + $0x3a0] ss:$16 sps:$4 sm:$0xff]  }
  0xf3   :  { %1551 = vmatprep.mubr.bf16.mxu0 %v2603_v62 }
  0xf9   :  { %1263 = vmatmul.mubr.bf16.gmra.mrb[92].mxu1 %v2605_v63  ;;  %v2642_v63 = vld [vmem:[%s3520_s0 + $0x3a8] ss:$16 sps:$4 sm:$0xff]  }
  0xfa   :  { %1552 = vmatmul.mubr.bf16.gmra.mrb[92].mxu0 %v2606_v0  ;;  %1270 = vmatprep.mubr.bf16.mxu1 %v2607_v1  ;;  %v2643_v0 = vld [vmem:[%s3520_s0 + $0x3c4] ss:$16 sps:$4 sm:$0xff]  }
  0xfb   :  { %1559 = vmatprep.mubr.bf16.mxu0 %v2609_v2 }
 0x101   :  { %1271 = vmatmul.mubr.bf16.gmra.mrb[96].mxu1 %v2611_v3 }
 0x102   :  { %1560 = vmatmul.mubr.bf16.gmra.mrb[96].mxu0 %v2612_v4  ;;  %1278 = vmatprep.mubr.bf16.mxu1 %v2613_v5  ;;  %v2645_v5 = vld [vmem:[%s3520_s0 + $0x3cc] ss:$16 sps:$4 sm:$0xff]  }
 0x103   :  { %1567 = vmatprep.mubr.bf16.mxu0 %v2615_v6 }
 0x109   :  { %1279 = vmatmul.mubr.bf16.gmra.mrb[100].mxu1 %v2617_v7 }
 0x10a   :  { %1568 = vmatmul.mubr.bf16.gmra.mrb[100].mxu0 %v2618_v8  ;;  %1286 = vmatprep.mubr.bf16.mxu1 %v2619_v9 }
 0x10b   :  { %1575 = vmatprep.mubr.bf16.mxu0 %v2621_v10 }
 0x111   :  { %1287 = vmatmul.mubr.bf16.gmra.mrb[104].mxu1 %v2623_v11 }
 0x112   :  { %1576 = vmatmul.mubr.bf16.gmra.mrb[104].mxu0 %v2624_v12  ;;  %1294 = vmatprep.mubr.bf16.mxu1 %v2625_v13 }
 0x113   :  { %1583 = vmatprep.mubr.bf16.mxu0 %v2627_v14 }
 0x114   :  { %v1080_v16 = vpop.f32.mrb[0].mxu1 }
 0x115   :  { %v1081_v17 = vadd.f32 %v3138_v15, %v1080_v16  ;;  %v1369_v18 = vpop.f32.mrb[0].mxu0  ;;  %v1082_v19 = vpop.f32.mrb[1].mxu1 }
 0x116   :  { %v1371_v21 = vpop.f32.mrb[1].mxu0  ;;  %v1083_v22 = vpop.f32.mrb[2].mxu1 }
 0x117   :  { %v1370_v25 = vadd.f32 %v1369_v18, %v1081_v17  ;;  %v1084_v26 = vadd.f32 %v3138_v15, %v1083_v22  ;;  %v1372_v27 = vpop.f32.mrb[2].mxu0  ;;  %v1085_v28 = vpop.f32.mrb[3].mxu1  ;;  %v2647_v17 = vld [vmem:[%s3520_s0 + $0x3c0] ss:$16 sps:$4 sm:$0xff]   ;;  %v2649_v21 = vld [vmem:[%s3520_s0 + $0x3e4] ss:$16 sps:$4 sm:$0xff]  }
 0x118   :  { %v1374_v30 = vpop.f32.mrb[3].mxu0 }
 0x119   :  { %v1624_v31 = vmax.f32 %v1370_v25, 0.0  ;;  %v1373_v32 = vadd.f32 %v1372_v27, %v1084_v26  ;;  %1295 = vmatmul.mubr.bf16.gmra.mrb[108].mxu1 %v2629_v20  ;;  %v2648_v20 = vld [vmem:[%s3520_s0 + $0x3c8] ss:$16 sps:$4 sm:$0xff]   ;;  %v2651_v26 = vld [vmem:[%s3520_s0 + $0x3ec] ss:$16 sps:$4 sm:$0xff]  }
 0x11a   :  { %1584 = vmatmul.mubr.bf16.gmra.mrb[108].mxu0 %v2630_v23  ;;  %1302 = vmatprep.mubr.bf16.mxu1 %v2631_v24 }
 0x11b   :  { %v2238_v33 = vpack.c.bf16 %v1624_v31, %v1624_v31  ;;  %v1625_v34 = vmax.f32 %v1373_v32, 0.0  ;;  %1591 = vmatprep.mubr.bf16.mxu0 %v2633_v29 }
 0x11c   :  { %v1088_v35 = vpop.f32.mrb[4].mxu1 }
 0x11d   :  { %1945 = vst.msk [vmem:[%s3522_s3] sm:$0xf] %vm1944_vm0, %v2238_v33  ;;  %v2239_v36 = vpack.c.bf16 %v1625_v34, %v1625_v34  ;;  %v1089_v37 = vadd.f32 %v3138_v15, %v1088_v35  ;;  %v1377_v38 = vpop.f32.mrb[4].mxu0  ;;  %v1090_v39 = vpop.f32.mrb[5].mxu1 }
 0x11e   :  { %v1379_v41 = vpop.f32.mrb[5].mxu0  ;;  %v1091_v42 = vpop.f32.mrb[6].mxu1 }
 0x11f   :  { %1946 = vst.msk [vmem:[%s3522_s3 + $0x4] sm:$0xf] %vm1944_vm0, %v2239_v36  ;;  %v1378_v45 = vadd.f32 %v1377_v38, %v1089_v37  ;;  %v1092_v46 = vadd.f32 %v3138_v15, %v1091_v42  ;;  %v1380_v47 = vpop.f32.mrb[6].mxu0  ;;  %v1093_v48 = vpop.f32.mrb[7].mxu1  ;;  %v2653_v37 = vld [vmem:[%s3520_s0 + $0x3e0] ss:$16 sps:$4 sm:$0xff]  }
 0x120   :  { %v1382_v50 = vpop.f32.mrb[7].mxu0 }
 0x121   :  { %v1626_v51 = vmax.f32 %v1378_v45, 0.0  ;;  %v1381_v52 = vadd.f32 %v1380_v47, %v1092_v46  ;;  %1303 = vmatmul.mubr.bf16.gmra.mrb[112].mxu1 %v2635_v40  ;;  %v2654_v40 = vld [vmem:[%s3520_s0 + $0x3e8] ss:$16 sps:$4 sm:$0xff]  }
 0x122   :  { %1592 = vmatmul.mubr.bf16.gmra.mrb[112].mxu0 %v2636_v43  ;;  %1310 = vmatprep.mubr.bf16.mxu1 %v2637_v44 }
 0x123   :  { %v2240_v53 = vpack.c.bf16 %v1626_v51, %v1626_v51  ;;  %v1627_v54 = vmax.f32 %v1381_v52, 0.0  ;;  %1599 = vmatprep.mubr.bf16.mxu0 %v2639_v49 }
 0x124   :  { %v1096_v55 = vpop.f32.mrb[8].mxu1 }
 0x125   :  { %1947 = vst.msk [vmem:[%s3522_s3 + $0x8] sm:$0xf] %vm1944_vm0, %v2240_v53  ;;  %v2241_v56 = vpack.c.bf16 %v1627_v54, %v1627_v54  ;;  %v1097_v57 = vadd.f32 %v3138_v15, %v1096_v55  ;;  %v1385_v58 = vpop.f32.mrb[8].mxu0  ;;  %v1098_v59 = vpop.f32.mrb[9].mxu1 }
 0x126   :  { %v1387_v61 = vpop.f32.mrb[9].mxu0  ;;  %v1099_v62 = vpop.f32.mrb[10].mxu1 }
 0x127   :  { %1948 = vst.msk [vmem:[%s3522_s3 + $0xc] sm:$0xf] %vm1944_vm0, %v2241_v56  ;;  %v1386_v1 = vadd.f32 %v1385_v58, %v1097_v57  ;;  %v1100_v2 = vadd.f32 %v3138_v15, %v1099_v62  ;;  %v1388_v3 = vpop.f32.mrb[10].mxu0  ;;  %v1101_v4 = vpop.f32.mrb[11].mxu1 }
 0x128   :  { %v1390_v6 = vpop.f32.mrb[11].mxu0 }
 0x129   :  { %v1628_v7 = vmax.f32 %v1386_v1, 0.0  ;;  %v1389_v8 = vadd.f32 %v1388_v3, %v1100_v2  ;;  %1311 = vmatmul.mubr.bf16.gmra.mrb[116].mxu1 %v2641_v60 }
 0x12a   :  { %1600 = vmatmul.mubr.bf16.gmra.mrb[116].mxu0 %v2642_v63  ;;  %1318 = vmatprep.mubr.bf16.mxu1 %v2643_v0 }
 0x12b   :  { %v2242_v9 = vpack.c.bf16 %v1628_v7, %v1628_v7  ;;  %v1629_v10 = vmax.f32 %v1389_v8, 0.0  ;;  %1607 = vmatprep.mubr.bf16.mxu0 %v2645_v5 }
 0x12c   :  { %v1104_v11 = vpop.f32.mrb[12].mxu1 }
 0x12d   :  { %1949 = vst.msk [vmem:[%s3522_s3 + $0x10] sm:$0xf] %vm1944_vm0, %v2242_v9  ;;  %v2243_v12 = vpack.c.bf16 %v1629_v10, %v1629_v10  ;;  %v1105_v13 = vadd.f32 %v3138_v15, %v1104_v11  ;;  %v1393_v14 = vpop.f32.mrb[12].mxu0  ;;  %v1106_v16 = vpop.f32.mrb[13].mxu1 }
 0x12e   :  { %v1395_v18 = vpop.f32.mrb[13].mxu0  ;;  %v1107_v19 = vpop.f32.mrb[14].mxu1 }
 0x12f   :  { %1950 = vst.msk [vmem:[%s3522_s3 + $0x14] sm:$0xf] %vm1944_vm0, %v2243_v12  ;;  %v1394_v22 = vadd.f32 %v1393_v14, %v1105_v13  ;;  %v1108_v23 = vadd.f32 %v3138_v15, %v1107_v19  ;;  %v1396_v24 = vpop.f32.mrb[14].mxu0  ;;  %v1109_v25 = vpop.f32.mrb[15].mxu1 }
 0x130   :  { %v1398_v27 = vpop.f32.mrb[15].mxu0 }
 0x131   :  { %v1630_v28 = vmax.f32 %v1394_v22, 0.0  ;;  %v1397_v29 = vadd.f32 %v1396_v24, %v1108_v23  ;;  %1319 = vmatmul.mubr.bf16.gmra.mrb[120].mxu1 %v2647_v17 }
 0x132   :  { %1608 = vmatmul.mubr.bf16.gmra.mrb[120].mxu0 %v2648_v20  ;;  %1326 = vmatprep.mubr.bf16.mxu1 %v2649_v21 }
 0x133   :  { %v2244_v30 = vpack.c.bf16 %v1630_v28, %v1630_v28  ;;  %v1631_v31 = vmax.f32 %v1397_v29, 0.0  ;;  %1615 = vmatprep.mubr.bf16.mxu0 %v2651_v26 }
 0x134   :  { %v1112_v32 = vpop.f32.mrb[16].mxu1 }
 0x135   :  { %1951 = vst.msk [vmem:[%s3522_s3 + $0x18] sm:$0xf] %vm1944_vm0, %v2244_v30  ;;  %v2245_v33 = vpack.c.bf16 %v1631_v31, %v1631_v31  ;;  %v1113_v34 = vadd.f32 %v3138_v15, %v1112_v32  ;;  %v1401_v35 = vpop.f32.mrb[16].mxu0  ;;  %v1114_v36 = vpop.f32.mrb[17].mxu1 }
 0x136   :  { %v1403_v38 = vpop.f32.mrb[17].mxu0  ;;  %v1115_v39 = vpop.f32.mrb[18].mxu1 }
 0x137   :  { %1952 = vst.msk [vmem:[%s3522_s3 + $0x1c] sm:$0xf] %vm1944_vm0, %v2245_v33  ;;  %v1402_v41 = vadd.f32 %v1401_v35, %v1113_v34  ;;  %v1116_v42 = vadd.f32 %v3138_v15, %v1115_v39  ;;  %v1404_v43 = vpop.f32.mrb[18].mxu0  ;;  %v1117_v44 = vpop.f32.mrb[19].mxu1 }
 0x138   :  { %v1406_v45 = vpop.f32.mrb[19].mxu0 }
 0x139   :  { %v1632_v46 = vmax.f32 %v1402_v41, 0.0  ;;  %v1405_v47 = vadd.f32 %v1404_v43, %v1116_v42  ;;  %1327 = vmatmul.mubr.bf16.gmra.mrb[124].mxu1 %v2653_v37 }
 0x13a   :  { %1616 = vmatmul.mubr.bf16.gmra.mrb[124].mxu0 %v2654_v40 }
 0x13b   :  { %v2246_v48 = vpack.c.bf16 %v1632_v46, %v1632_v46  ;;  %v1633_v49 = vmax.f32 %v1405_v47, 0.0 }
 0x13c   :  { %v1120_v50 = vpop.f32.mrb[20].mxu1 }
 0x13d   :  { %1953 = vst.msk [vmem:[%s3522_s3 + $0x20] sm:$0xf] %vm1944_vm0, %v2246_v48  ;;  %v2247_v51 = vpack.c.bf16 %v1633_v49, %v1633_v49  ;;  %v1121_v52 = vadd.f32 %v3138_v15, %v1120_v50  ;;  %v1409_v53 = vpop.f32.mrb[20].mxu0  ;;  %v1122_v54 = vpop.f32.mrb[21].mxu1 }
 0x13e   :  { %v1411_v55 = vpop.f32.mrb[21].mxu0  ;;  %v1123_v56 = vpop.f32.mrb[22].mxu1 }
 0x13f   :  { %1954 = vst.msk [vmem:[%s3522_s3 + $0x24] sm:$0xf] %vm1944_vm0, %v2247_v51  ;;  %v1410_v57 = vadd.f32 %v1409_v53, %v1121_v52  ;;  %v1124_v58 = vadd.f32 %v3138_v15, %v1123_v56  ;;  %v1412_v59 = vpop.f32.mrb[22].mxu0  ;;  %v1125_v60 = vpop.f32.mrb[23].mxu1 }
 0x140   :  { %v1414_v61 = vpop.f32.mrb[23].mxu0 }
 0x141   :  { %v1634_v62 = vmax.f32 %v1410_v57, 0.0  ;;  %v1413_v63 = vadd.f32 %v1412_v59, %v1124_v58 }
 0x143   :  { %v2248_v0 = vpack.c.bf16 %v1634_v62, %v1634_v62  ;;  %v1635_v1 = vmax.f32 %v1413_v63, 0.0 }
 0x144   :  { %v1128_v2 = vpop.f32.mrb[24].mxu1 }
 0x145   :  { %1955 = vst.msk [vmem:[%s3522_s3 + $0x28] sm:$0xf] %vm1944_vm0, %v2248_v0  ;;  %v2249_v3 = vpack.c.bf16 %v1635_v1, %v1635_v1  ;;  %v1129_v4 = vadd.f32 %v3138_v15, %v1128_v2  ;;  %v1417_v5 = vpop.f32.mrb[24].mxu0  ;;  %v1130_v6 = vpop.f32.mrb[25].mxu1 }
 0x146   :  { %v1419_v7 = vpop.f32.mrb[25].mxu0  ;;  %v1131_v8 = vpop.f32.mrb[26].mxu1 }
 0x147   :  { %1956 = vst.msk [vmem:[%s3522_s3 + $0x2c] sm:$0xf] %vm1944_vm0, %v2249_v3  ;;  %v1418_v9 = vadd.f32 %v1417_v5, %v1129_v4  ;;  %v1132_v10 = vadd.f32 %v3138_v15, %v1131_v8  ;;  %v1420_v11 = vpop.f32.mrb[26].mxu0  ;;  %v1133_v12 = vpop.f32.mrb[27].mxu1 }
 0x148   :  { %v1422_v13 = vpop.f32.mrb[27].mxu0 }
 0x149   :  { %v1636_v14 = vmax.f32 %v1418_v9, 0.0  ;;  %v1421_v16 = vadd.f32 %v1420_v11, %v1132_v10 }
 0x14b   :  { %v2250_v17 = vpack.c.bf16 %v1636_v14, %v1636_v14  ;;  %v1637_v18 = vmax.f32 %v1421_v16, 0.0 }
 0x14c   :  { %v1136_v19 = vpop.f32.mrb[28].mxu1 }
 0x14d   :  { %1957 = vst.msk [vmem:[%s3522_s3 + $0x30] sm:$0xf] %vm1944_vm0, %v2250_v17  ;;  %v2251_v20 = vpack.c.bf16 %v1637_v18, %v1637_v18  ;;  %v1137_v21 = vadd.f32 %v3138_v15, %v1136_v19  ;;  %v1425_v22 = vpop.f32.mrb[28].mxu0  ;;  %v1138_v23 = vpop.f32.mrb[29].mxu1 }
 0x14e   :  { %v1427_v24 = vpop.f32.mrb[29].mxu0  ;;  %v1139_v25 = vpop.f32.mrb[30].mxu1 }
 0x14f   :  { %1958 = vst.msk [vmem:[%s3522_s3 + $0x34] sm:$0xf] %vm1944_vm0, %v2251_v20  ;;  %v1426_v26 = vadd.f32 %v1425_v22, %v1137_v21  ;;  %v1140_v27 = vadd.f32 %v3138_v15, %v1139_v25  ;;  %v1428_v28 = vpop.f32.mrb[30].mxu0  ;;  %v1141_v29 = vpop.f32.mrb[31].mxu1 }
 0x150   :  { %v1430_v30 = vpop.f32.mrb[31].mxu0 }
 0x151   :  { %v1638_v31 = vmax.f32 %v1426_v26, 0.0  ;;  %v1429_v32 = vadd.f32 %v1428_v28, %v1140_v27 }
 0x153   :  { %v2252_v33 = vpack.c.bf16 %v1638_v31, %v1638_v31  ;;  %v1639_v34 = vmax.f32 %v1429_v32, 0.0 }
 0x154   :  { %v1144_v35 = vpop.f32.mrb[32].mxu1 }
 0x155   :  { %1959 = vst.msk [vmem:[%s3522_s3 + $0x38] sm:$0xf] %vm1944_vm0, %v2252_v33  ;;  %v2253_v36 = vpack.c.bf16 %v1639_v34, %v1639_v34  ;;  %v1145_v37 = vadd.f32 %v3138_v15, %v1144_v35  ;;  %v1433_v38 = vpop.f32.mrb[32].mxu0  ;;  %v1146_v39 = vpop.f32.mrb[33].mxu1 }
 0x156   :  { %v1435_v40 = vpop.f32.mrb[33].mxu0  ;;  %v1147_v41 = vpop.f32.mrb[34].mxu1 }
 0x157   :  { %1960 = vst.msk [vmem:[%s3522_s3 + $0x3c] sm:$0xf] %vm1944_vm0, %v2253_v36  ;;  %v1434_v42 = vadd.f32 %v1433_v38, %v1145_v37  ;;  %v1148_v43 = vadd.f32 %v3138_v15, %v1147_v41  ;;  %v1436_v44 = vpop.f32.mrb[34].mxu0  ;;  %v1149_v45 = vpop.f32.mrb[35].mxu1 }
 0x158   :  { %v1438_v46 = vpop.f32.mrb[35].mxu0 }
 0x159   :  { %v1640_v47 = vmax.f32 %v1434_v42, 0.0  ;;  %v1437_v48 = vadd.f32 %v1436_v44, %v1148_v43 }
 0x15b   :  { %v2254_v49 = vpack.c.bf16 %v1640_v47, %v1640_v47  ;;  %v1641_v50 = vmax.f32 %v1437_v48, 0.0 }
 0x15c   :  { %v1152_v51 = vpop.f32.mrb[36].mxu1 }
 0x15d   :  { %1961 = vst.msk [vmem:[%s3522_s3 + $0x40] sm:$0xf] %vm1944_vm0, %v2254_v49  ;;  %v2255_v52 = vpack.c.bf16 %v1641_v50, %v1641_v50  ;;  %v1153_v53 = vadd.f32 %v3138_v15, %v1152_v51  ;;  %v1441_v54 = vpop.f32.mrb[36].mxu0  ;;  %v1154_v55 = vpop.f32.mrb[37].mxu1 }
 0x15e   :  { %v1443_v56 = vpop.f32.mrb[37].mxu0  ;;  %v1155_v57 = vpop.f32.mrb[38].mxu1 }
 0x15f   :  { %1962 = vst.msk [vmem:[%s3522_s3 + $0x44] sm:$0xf] %vm1944_vm0, %v2255_v52  ;;  %v1442_v58 = vadd.f32 %v1441_v54, %v1153_v53  ;;  %v1156_v59 = vadd.f32 %v3138_v15, %v1155_v57  ;;  %v1444_v60 = vpop.f32.mrb[38].mxu0  ;;  %v1157_v61 = vpop.f32.mrb[39].mxu1 }
 0x160   :  { %v1446_v62 = vpop.f32.mrb[39].mxu0 }
 0x161   :  { %v1642_v63 = vmax.f32 %v1442_v58, 0.0  ;;  %v1445_v0 = vadd.f32 %v1444_v60, %v1156_v59 }
 0x163   :  { %v2256_v1 = vpack.c.bf16 %v1642_v63, %v1642_v63  ;;  %v1643_v2 = vmax.f32 %v1445_v0, 0.0 }
 0x164   :  { %v1160_v3 = vpop.f32.mrb[40].mxu1 }
 0x165   :  { %1963 = vst.msk [vmem:[%s3522_s3 + $0x48] sm:$0xf] %vm1944_vm0, %v2256_v1  ;;  %v2257_v4 = vpack.c.bf16 %v1643_v2, %v1643_v2  ;;  %v1161_v5 = vadd.f32 %v3138_v15, %v1160_v3  ;;  %v1449_v6 = vpop.f32.mrb[40].mxu0  ;;  %v1162_v7 = vpop.f32.mrb[41].mxu1 }
 0x166   :  { %v1451_v8 = vpop.f32.mrb[41].mxu0  ;;  %v1163_v9 = vpop.f32.mrb[42].mxu1 }
 0x167   :  { %1964 = vst.msk [vmem:[%s3522_s3 + $0x4c] sm:$0xf] %vm1944_vm0, %v2257_v4  ;;  %v1450_v10 = vadd.f32 %v1449_v6, %v1161_v5  ;;  %v1164_v11 = vadd.f32 %v3138_v15, %v1163_v9  ;;  %v1452_v12 = vpop.f32.mrb[42].mxu0  ;;  %v1165_v13 = vpop.f32.mrb[43].mxu1 }
 0x168   :  { %v1454_v14 = vpop.f32.mrb[43].mxu0 }
 0x169   :  { %v1644_v16 = vmax.f32 %v1450_v10, 0.0  ;;  %v1453_v17 = vadd.f32 %v1452_v12, %v1164_v11 }
 0x16b   :  { %v2258_v18 = vpack.c.bf16 %v1644_v16, %v1644_v16  ;;  %v1645_v19 = vmax.f32 %v1453_v17, 0.0 }
 0x16c   :  { %v1168_v20 = vpop.f32.mrb[44].mxu1 }
 0x16d   :  { %1965 = vst.msk [vmem:[%s3522_s3 + $0x50] sm:$0xf] %vm1944_vm0, %v2258_v18  ;;  %v2259_v21 = vpack.c.bf16 %v1645_v19, %v1645_v19  ;;  %v1169_v22 = vadd.f32 %v3138_v15, %v1168_v20  ;;  %v1457_v23 = vpop.f32.mrb[44].mxu0  ;;  %v1170_v24 = vpop.f32.mrb[45].mxu1 }
 0x16e   :  { %v1459_v25 = vpop.f32.mrb[45].mxu0  ;;  %v1171_v26 = vpop.f32.mrb[46].mxu1 }
 0x16f   :  { %1966 = vst.msk [vmem:[%s3522_s3 + $0x54] sm:$0xf] %vm1944_vm0, %v2259_v21  ;;  %v1458_v27 = vadd.f32 %v1457_v23, %v1169_v22  ;;  %v1172_v28 = vadd.f32 %v3138_v15, %v1171_v26  ;;  %v1460_v29 = vpop.f32.mrb[46].mxu0  ;;  %v1173_v30 = vpop.f32.mrb[47].mxu1 }
 0x170   :  { %v1462_v31 = vpop.f32.mrb[47].mxu0 }
 0x171   :  { %v1646_v32 = vmax.f32 %v1458_v27, 0.0  ;;  %v1461_v33 = vadd.f32 %v1460_v29, %v1172_v28 }
 0x173   :  { %v2260_v34 = vpack.c.bf16 %v1646_v32, %v1646_v32  ;;  %v1647_v35 = vmax.f32 %v1461_v33, 0.0 }
 0x174   :  { %v1176_v36 = vpop.f32.mrb[48].mxu1 }
 0x175   :  { %1967 = vst.msk [vmem:[%s3522_s3 + $0x58] sm:$0xf] %vm1944_vm0, %v2260_v34  ;;  %v2261_v37 = vpack.c.bf16 %v1647_v35, %v1647_v35  ;;  %v1177_v38 = vadd.f32 %v3138_v15, %v1176_v36  ;;  %v1465_v39 = vpop.f32.mrb[48].mxu0  ;;  %v1178_v40 = vpop.f32.mrb[49].mxu1 }
 0x176   :  { %v1467_v41 = vpop.f32.mrb[49].mxu0  ;;  %v1179_v42 = vpop.f32.mrb[50].mxu1 }
 0x177   :  { %1968 = vst.msk [vmem:[%s3522_s3 + $0x5c] sm:$0xf] %vm1944_vm0, %v2261_v37  ;;  %v1466_v43 = vadd.f32 %v1465_v39, %v1177_v38  ;;  %v1180_v44 = vadd.f32 %v3138_v15, %v1179_v42  ;;  %v1468_v45 = vpop.f32.mrb[50].mxu0  ;;  %v1181_v46 = vpop.f32.mrb[51].mxu1 }
 0x178   :  { %v1470_v47 = vpop.f32.mrb[51].mxu0 }
 0x179   :  { %v1648_v48 = vmax.f32 %v1466_v43, 0.0  ;;  %v1469_v49 = vadd.f32 %v1468_v45, %v1180_v44 }
 0x17b   :  { %v2262_v50 = vpack.c.bf16 %v1648_v48, %v1648_v48  ;;  %v1649_v51 = vmax.f32 %v1469_v49, 0.0 }
 0x17c   :  { %v1184_v52 = vpop.f32.mrb[52].mxu1 }
 0x17d   :  { %1969 = vst.msk [vmem:[%s3522_s3 + $0x60] sm:$0xf] %vm1944_vm0, %v2262_v50  ;;  %v2263_v53 = vpack.c.bf16 %v1649_v51, %v1649_v51  ;;  %v1185_v54 = vadd.f32 %v3138_v15, %v1184_v52  ;;  %v1473_v55 = vpop.f32.mrb[52].mxu0  ;;  %v1186_v56 = vpop.f32.mrb[53].mxu1 }
 0x17e   :  { %v1475_v57 = vpop.f32.mrb[53].mxu0  ;;  %v1187_v58 = vpop.f32.mrb[54].mxu1 }
 0x17f   :  { %1970 = vst.msk [vmem:[%s3522_s3 + $0x64] sm:$0xf] %vm1944_vm0, %v2263_v53  ;;  %v1474_v59 = vadd.f32 %v1473_v55, %v1185_v54  ;;  %v1188_v60 = vadd.f32 %v3138_v15, %v1187_v58  ;;  %v1476_v61 = vpop.f32.mrb[54].mxu0  ;;  %v1189_v62 = vpop.f32.mrb[55].mxu1 }
 0x180   :  { %v1478_v63 = vpop.f32.mrb[55].mxu0 }
 0x181   :  { %v1650_v0 = vmax.f32 %v1474_v59, 0.0  ;;  %v1477_v1 = vadd.f32 %v1476_v61, %v1188_v60 }
 0x183   :  { %v2264_v2 = vpack.c.bf16 %v1650_v0, %v1650_v0  ;;  %v1651_v3 = vmax.f32 %v1477_v1, 0.0 }
 0x184   :  { %v1192_v4 = vpop.f32.mrb[56].mxu1 }
 0x185   :  { %1971 = vst.msk [vmem:[%s3522_s3 + $0x68] sm:$0xf] %vm1944_vm0, %v2264_v2  ;;  %v2265_v5 = vpack.c.bf16 %v1651_v3, %v1651_v3  ;;  %v1193_v6 = vadd.f32 %v3138_v15, %v1192_v4  ;;  %v1481_v7 = vpop.f32.mrb[56].mxu0  ;;  %v1194_v8 = vpop.f32.mrb[57].mxu1 }
 0x186   :  { %v1483_v9 = vpop.f32.mrb[57].mxu0  ;;  %v1195_v10 = vpop.f32.mrb[58].mxu1 }
 0x187   :  { %1972 = vst.msk [vmem:[%s3522_s3 + $0x6c] sm:$0xf] %vm1944_vm0, %v2265_v5  ;;  %v1482_v11 = vadd.f32 %v1481_v7, %v1193_v6  ;;  %v1196_v12 = vadd.f32 %v3138_v15, %v1195_v10  ;;  %v1484_v13 = vpop.f32.mrb[58].mxu0  ;;  %v1197_v14 = vpop.f32.mrb[59].mxu1 }
 0x188   :  { %v1486_v16 = vpop.f32.mrb[59].mxu0 }
 0x189   :  { %v1652_v17 = vmax.f32 %v1482_v11, 0.0  ;;  %v1485_v18 = vadd.f32 %v1484_v13, %v1196_v12 }
 0x18b   :  { %v2266_v19 = vpack.c.bf16 %v1652_v17, %v1652_v17  ;;  %v1653_v20 = vmax.f32 %v1485_v18, 0.0 }
 0x18c   :  { %v1200_v21 = vpop.f32.mrb[60].mxu1 }
 0x18d   :  { %1973 = vst.msk [vmem:[%s3522_s3 + $0x70] sm:$0xf] %vm1944_vm0, %v2266_v19  ;;  %v2267_v22 = vpack.c.bf16 %v1653_v20, %v1653_v20  ;;  %v1201_v23 = vadd.f32 %v3138_v15, %v1200_v21  ;;  %v1489_v24 = vpop.f32.mrb[60].mxu0  ;;  %v1202_v25 = vpop.f32.mrb[61].mxu1 }
 0x18e   :  { %v1491_v26 = vpop.f32.mrb[61].mxu0  ;;  %v1203_v27 = vpop.f32.mrb[62].mxu1 }
 0x18f   :  { %1974 = vst.msk [vmem:[%s3522_s3 + $0x74] sm:$0xf] %vm1944_vm0, %v2267_v22  ;;  %v1490_v28 = vadd.f32 %v1489_v24, %v1201_v23  ;;  %v1204_v29 = vadd.f32 %v3138_v15, %v1203_v27  ;;  %v1492_v30 = vpop.f32.mrb[62].mxu0  ;;  %v1205_v31 = vpop.f32.mrb[63].mxu1 }
 0x190   :  { %v1494_v32 = vpop.f32.mrb[63].mxu0 }
 0x191   :  { %v1654_v33 = vmax.f32 %v1490_v28, 0.0  ;;  %v1493_v34 = vadd.f32 %v1492_v30, %v1204_v29 }
 0x193   :  { %v2268_v35 = vpack.c.bf16 %v1654_v33, %v1654_v33  ;;  %v1655_v36 = vmax.f32 %v1493_v34, 0.0 }
 0x194   :  { %v1208_v37 = vpop.f32.mrb[64].mxu1 }
 0x195   :  { %1975 = vst.msk [vmem:[%s3522_s3 + $0x78] sm:$0xf] %vm1944_vm0, %v2268_v35  ;;  %v2269_v38 = vpack.c.bf16 %v1655_v36, %v1655_v36  ;;  %v1209_v39 = vadd.f32 %v3138_v15, %v1208_v37  ;;  %v1497_v40 = vpop.f32.mrb[64].mxu0  ;;  %v1210_v41 = vpop.f32.mrb[65].mxu1 }
 0x196   :  { %v1499_v42 = vpop.f32.mrb[65].mxu0  ;;  %v1211_v43 = vpop.f32.mrb[66].mxu1 }
 0x197   :  { %1976 = vst.msk [vmem:[%s3522_s3 + $0x7c] sm:$0xf] %vm1944_vm0, %v2269_v38  ;;  %v1498_v44 = vadd.f32 %v1497_v40, %v1209_v39  ;;  %v1212_v45 = vadd.f32 %v3138_v15, %v1211_v43  ;;  %v1500_v46 = vpop.f32.mrb[66].mxu0  ;;  %v1213_v47 = vpop.f32.mrb[67].mxu1 }
 0x198   :  { %v1502_v48 = vpop.f32.mrb[67].mxu0 }
 0x199   :  { %v1656_v49 = vmax.f32 %v1498_v44, 0.0  ;;  %v1501_v50 = vadd.f32 %v1500_v46, %v1212_v45 }
 0x19b   :  { %v2270_v51 = vpack.c.bf16 %v1656_v49, %v1656_v49  ;;  %v1657_v52 = vmax.f32 %v1501_v50, 0.0 }
 0x19c   :  { %v1216_v53 = vpop.f32.mrb[68].mxu1 }
 0x19d   :  { %1977 = vst.msk [vmem:[%s3522_s3 + $0x80] sm:$0xf] %vm1944_vm0, %v2270_v51  ;;  %v2271_v54 = vpack.c.bf16 %v1657_v52, %v1657_v52  ;;  %v1217_v55 = vadd.f32 %v3138_v15, %v1216_v53  ;;  %v1505_v56 = vpop.f32.mrb[68].mxu0  ;;  %v1218_v57 = vpop.f32.mrb[69].mxu1 }
 0x19e   :  { %v1507_v58 = vpop.f32.mrb[69].mxu0  ;;  %v1219_v59 = vpop.f32.mrb[70].mxu1 }
 0x19f   :  { %1978 = vst.msk [vmem:[%s3522_s3 + $0x84] sm:$0xf] %vm1944_vm0, %v2271_v54  ;;  %v1506_v60 = vadd.f32 %v1505_v56, %v1217_v55  ;;  %v1220_v61 = vadd.f32 %v3138_v15, %v1219_v59  ;;  %v1508_v62 = vpop.f32.mrb[70].mxu0  ;;  %v1221_v63 = vpop.f32.mrb[71].mxu1 }
 0x1a0   :  { %v1510_v0 = vpop.f32.mrb[71].mxu0 }
 0x1a1   :  { %v1658_v1 = vmax.f32 %v1506_v60, 0.0  ;;  %v1509_v2 = vadd.f32 %v1508_v62, %v1220_v61 }
 0x1a3   :  { %v2272_v3 = vpack.c.bf16 %v1658_v1, %v1658_v1  ;;  %v1659_v4 = vmax.f32 %v1509_v2, 0.0 }
 0x1a4   :  { %v1224_v5 = vpop.f32.mrb[72].mxu1 }
 0x1a5   :  { %1979 = vst.msk [vmem:[%s3522_s3 + $0x88] sm:$0xf] %vm1944_vm0, %v2272_v3  ;;  %v2273_v6 = vpack.c.bf16 %v1659_v4, %v1659_v4  ;;  %v1225_v7 = vadd.f32 %v3138_v15, %v1224_v5  ;;  %v1513_v8 = vpop.f32.mrb[72].mxu0  ;;  %v1226_v9 = vpop.f32.mrb[73].mxu1 }
 0x1a6   :  { %v1515_v10 = vpop.f32.mrb[73].mxu0  ;;  %v1227_v11 = vpop.f32.mrb[74].mxu1 }
 0x1a7   :  { %1980 = vst.msk [vmem:[%s3522_s3 + $0x8c] sm:$0xf] %vm1944_vm0, %v2273_v6  ;;  %v1514_v12 = vadd.f32 %v1513_v8, %v1225_v7  ;;  %v1228_v13 = vadd.f32 %v3138_v15, %v1227_v11  ;;  %v1516_v14 = vpop.f32.mrb[74].mxu0  ;;  %v1229_v16 = vpop.f32.mrb[75].mxu1 }
 0x1a8   :  { %v1518_v17 = vpop.f32.mrb[75].mxu0 }
 0x1a9   :  { %v1660_v18 = vmax.f32 %v1514_v12, 0.0  ;;  %v1517_v19 = vadd.f32 %v1516_v14, %v1228_v13 }
 0x1ab   :  { %v2274_v20 = vpack.c.bf16 %v1660_v18, %v1660_v18  ;;  %v1661_v21 = vmax.f32 %v1517_v19, 0.0 }
 0x1ac   :  { %v1232_v22 = vpop.f32.mrb[76].mxu1 }
 0x1ad   :  { %1981 = vst.msk [vmem:[%s3522_s3 + $0x90] sm:$0xf] %vm1944_vm0, %v2274_v20  ;;  %v2275_v23 = vpack.c.bf16 %v1661_v21, %v1661_v21  ;;  %v1233_v24 = vadd.f32 %v3138_v15, %v1232_v22  ;;  %v1521_v25 = vpop.f32.mrb[76].mxu0  ;;  %v1234_v26 = vpop.f32.mrb[77].mxu1 }
 0x1ae   :  { %v1523_v27 = vpop.f32.mrb[77].mxu0  ;;  %v1235_v28 = vpop.f32.mrb[78].mxu1 }
 0x1af   :  { %1982 = vst.msk [vmem:[%s3522_s3 + $0x94] sm:$0xf] %vm1944_vm0, %v2275_v23  ;;  %v1522_v29 = vadd.f32 %v1521_v25, %v1233_v24  ;;  %v1236_v30 = vadd.f32 %v3138_v15, %v1235_v28  ;;  %v1524_v31 = vpop.f32.mrb[78].mxu0  ;;  %v1237_v32 = vpop.f32.mrb[79].mxu1 }
 0x1b0   :  { %v1526_v33 = vpop.f32.mrb[79].mxu0 }
 0x1b1   :  { %v1662_v34 = vmax.f32 %v1522_v29, 0.0  ;;  %v1525_v35 = vadd.f32 %v1524_v31, %v1236_v30 }
 0x1b3   :  { %v2276_v36 = vpack.c.bf16 %v1662_v34, %v1662_v34  ;;  %v1663_v37 = vmax.f32 %v1525_v35, 0.0 }
 0x1b4   :  { %v1240_v38 = vpop.f32.mrb[80].mxu1 }
 0x1b5   :  { %1983 = vst.msk [vmem:[%s3522_s3 + $0x98] sm:$0xf] %vm1944_vm0, %v2276_v36  ;;  %v2277_v39 = vpack.c.bf16 %v1663_v37, %v1663_v37  ;;  %v1241_v40 = vadd.f32 %v3138_v15, %v1240_v38  ;;  %v1529_v41 = vpop.f32.mrb[80].mxu0  ;;  %v1242_v42 = vpop.f32.mrb[81].mxu1 }
 0x1b6   :  { %v1531_v43 = vpop.f32.mrb[81].mxu0  ;;  %v1243_v44 = vpop.f32.mrb[82].mxu1 }
 0x1b7   :  { %1984 = vst.msk [vmem:[%s3522_s3 + $0x9c] sm:$0xf] %vm1944_vm0, %v2277_v39  ;;  %v1530_v45 = vadd.f32 %v1529_v41, %v1241_v40  ;;  %v1244_v46 = vadd.f32 %v3138_v15, %v1243_v44  ;;  %v1532_v47 = vpop.f32.mrb[82].mxu0  ;;  %v1245_v48 = vpop.f32.mrb[83].mxu1 }
 0x1b8   :  { %v1534_v49 = vpop.f32.mrb[83].mxu0 }
 0x1b9   :  { %v1664_v50 = vmax.f32 %v1530_v45, 0.0  ;;  %v1533_v51 = vadd.f32 %v1532_v47, %v1244_v46 }
 0x1bb   :  { %v2278_v52 = vpack.c.bf16 %v1664_v50, %v1664_v50  ;;  %v1665_v53 = vmax.f32 %v1533_v51, 0.0 }
 0x1bc   :  { %v1248_v54 = vpop.f32.mrb[84].mxu1 }
 0x1bd   :  { %1985 = vst.msk [vmem:[%s3522_s3 + $0xa0] sm:$0xf] %vm1944_vm0, %v2278_v52  ;;  %v2279_v55 = vpack.c.bf16 %v1665_v53, %v1665_v53  ;;  %v1249_v56 = vadd.f32 %v3138_v15, %v1248_v54  ;;  %v1537_v57 = vpop.f32.mrb[84].mxu0  ;;  %v1250_v58 = vpop.f32.mrb[85].mxu1 }
 0x1be   :  { %v1539_v59 = vpop.f32.mrb[85].mxu0  ;;  %v1251_v60 = vpop.f32.mrb[86].mxu1 }
 0x1bf   :  { %1986 = vst.msk [vmem:[%s3522_s3 + $0xa4] sm:$0xf] %vm1944_vm0, %v2279_v55  ;;  %v1538_v61 = vadd.f32 %v1537_v57, %v1249_v56  ;;  %v1252_v62 = vadd.f32 %v3138_v15, %v1251_v60  ;;  %v1540_v63 = vpop.f32.mrb[86].mxu0  ;;  %v1253_v0 = vpop.f32.mrb[87].mxu1 }
 0x1c0   :  { %v1542_v1 = vpop.f32.mrb[87].mxu0 }
 0x1c1   :  { %v1666_v2 = vmax.f32 %v1538_v61, 0.0  ;;  %v1541_v3 = vadd.f32 %v1540_v63, %v1252_v62 }
 0x1c3   :  { %v2280_v4 = vpack.c.bf16 %v1666_v2, %v1666_v2  ;;  %v1667_v5 = vmax.f32 %v1541_v3, 0.0 }
 0x1c4   :  { %v1256_v6 = vpop.f32.mrb[88].mxu1 }
 0x1c5   :  { %1987 = vst.msk [vmem:[%s3522_s3 + $0xa8] sm:$0xf] %vm1944_vm0, %v2280_v4  ;;  %v2281_v7 = vpack.c.bf16 %v1667_v5, %v1667_v5  ;;  %v1257_v8 = vadd.f32 %v3138_v15, %v1256_v6  ;;  %v1545_v9 = vpop.f32.mrb[88].mxu0  ;;  %v1258_v10 = vpop.f32.mrb[89].mxu1 }
 0x1c6   :  { %v1547_v11 = vpop.f32.mrb[89].mxu0  ;;  %v1259_v12 = vpop.f32.mrb[90].mxu1 }
 0x1c7   :  { %1988 = vst.msk [vmem:[%s3522_s3 + $0xac] sm:$0xf] %vm1944_vm0, %v2281_v7  ;;  %v1546_v13 = vadd.f32 %v1545_v9, %v1257_v8  ;;  %v1260_v14 = vadd.f32 %v3138_v15, %v1259_v12  ;;  %v1548_v16 = vpop.f32.mrb[90].mxu0  ;;  %v1261_v17 = vpop.f32.mrb[91].mxu1 }
 0x1c8   :  { %v1550_v18 = vpop.f32.mrb[91].mxu0 }
 0x1c9   :  { %v1668_v19 = vmax.f32 %v1546_v13, 0.0  ;;  %v1549_v20 = vadd.f32 %v1548_v16, %v1260_v14  ;;  %v3458_v16 = vld [vmem:[%s3521_s2] ss:$0 sm:$0xff] }
 0x1cb   :  { %v2282_v21 = vpack.c.bf16 %v1668_v19, %v1668_v19  ;;  %v1669_v22 = vmax.f32 %v1549_v20, 0.0 }
 0x1cc   :  { %v1264_v23 = vpop.f32.mrb[92].mxu1 }
 0x1cd   :  { %1989 = vst.msk [vmem:[%s3522_s3 + $0xb0] sm:$0xf] %vm1944_vm0, %v2282_v21  ;;  %v2283_v24 = vpack.c.bf16 %v1669_v22, %v1669_v22  ;;  %v1265_v25 = vadd.f32 %v3138_v15, %v1264_v23  ;;  %v1553_v26 = vpop.f32.mrb[92].mxu0  ;;  %v1266_v27 = vpop.f32.mrb[93].mxu1 }
 0x1ce   :  { %v1555_v28 = vpop.f32.mrb[93].mxu0  ;;  %v1267_v29 = vpop.f32.mrb[94].mxu1 }
 0x1cf   :  { %1990 = vst.msk [vmem:[%s3522_s3 + $0xb4] sm:$0xf] %vm1944_vm0, %v2283_v24  ;;  %v1554_v30 = vadd.f32 %v1553_v26, %v1265_v25  ;;  %v1268_v31 = vadd.f32 %v3138_v15, %v1267_v29  ;;  %v1556_v32 = vpop.f32.mrb[94].mxu0  ;;  %v1269_v33 = vpop.f32.mrb[95].mxu1 }
 0x1d0   :  { %v1558_v34 = vpop.f32.mrb[95].mxu0 }
 0x1d1   :  { %v1670_v35 = vmax.f32 %v1554_v30, 0.0  ;;  %v1557_v36 = vadd.f32 %v1556_v32, %v1268_v31 }
 0x1d3   :  { %v2284_v37 = vpack.c.bf16 %v1670_v35, %v1670_v35  ;;  %v1671_v38 = vmax.f32 %v1557_v36, 0.0 }
 0x1d4   :  { %v1272_v39 = vpop.f32.mrb[96].mxu1 }
 0x1d5   :  { %1991 = vst.msk [vmem:[%s3522_s3 + $0xb8] sm:$0xf] %vm1944_vm0, %v2284_v37  ;;  %v2285_v40 = vpack.c.bf16 %v1671_v38, %v1671_v38  ;;  %v1273_v41 = vadd.f32 %v3138_v15, %v1272_v39  ;;  %v1561_v42 = vpop.f32.mrb[96].mxu0  ;;  %v1274_v43 = vpop.f32.mrb[97].mxu1 }
 0x1d6   :  { %v1563_v44 = vpop.f32.mrb[97].mxu0  ;;  %v1275_v45 = vpop.f32.mrb[98].mxu1 }
 0x1d7   :  { %1992 = vst.msk [vmem:[%s3522_s3 + $0xbc] sm:$0xf] %vm1944_vm0, %v2285_v40  ;;  %v1562_v46 = vadd.f32 %v1561_v42, %v1273_v41  ;;  %v1276_v47 = vadd.f32 %v3138_v15, %v1275_v45  ;;  %v1564_v48 = vpop.f32.mrb[98].mxu0  ;;  %v1277_v49 = vpop.f32.mrb[99].mxu1 }
 0x1d8   :  { %v1566_v50 = vpop.f32.mrb[99].mxu0 }
 0x1d9   :  { %v1672_v51 = vmax.f32 %v1562_v46, 0.0  ;;  %v1565_v52 = vadd.f32 %v1564_v48, %v1276_v47 }
 0x1db   :  { %v2286_v53 = vpack.c.bf16 %v1672_v51, %v1672_v51  ;;  %v1673_v54 = vmax.f32 %v1565_v52, 0.0 }
 0x1dc   :  { %v1280_v55 = vpop.f32.mrb[100].mxu1 }
 0x1dd   :  { %1993 = vst.msk [vmem:[%s3522_s3 + $0xc0] sm:$0xf] %vm1944_vm0, %v2286_v53  ;;  %v2287_v56 = vpack.c.bf16 %v1673_v54, %v1673_v54  ;;  %v1281_v57 = vadd.f32 %v3138_v15, %v1280_v55  ;;  %v1569_v58 = vpop.f32.mrb[100].mxu0  ;;  %v1282_v59 = vpop.f32.mrb[101].mxu1 }
 0x1de   :  { %v1571_v60 = vpop.f32.mrb[101].mxu0  ;;  %v1283_v61 = vpop.f32.mrb[102].mxu1 }
 0x1df   :  { %1994 = vst.msk [vmem:[%s3522_s3 + $0xc4] sm:$0xf] %vm1944_vm0, %v2287_v56  ;;  %v1570_v62 = vadd.f32 %v1569_v58, %v1281_v57  ;;  %v1284_v63 = vadd.f32 %v3138_v15, %v1283_v61  ;;  %v1572_v0 = vpop.f32.mrb[102].mxu0  ;;  %v1285_v1 = vpop.f32.mrb[103].mxu1 }
 0x1e0   :  { %v1574_v2 = vpop.f32.mrb[103].mxu0 }
 0x1e1   :  { %v1674_v3 = vmax.f32 %v1570_v62, 0.0  ;;  %v1573_v4 = vadd.f32 %v1572_v0, %v1284_v63 }
 0x1e3   :  { %v2288_v5 = vpack.c.bf16 %v1674_v3, %v1674_v3  ;;  %v1675_v6 = vmax.f32 %v1573_v4, 0.0 }
 0x1e4   :  { %v1288_v7 = vpop.f32.mrb[104].mxu1 }
 0x1e5   :  { %1995 = vst.msk [vmem:[%s3522_s3 + $0xc8] sm:$0xf] %vm1944_vm0, %v2288_v5  ;;  %v2289_v8 = vpack.c.bf16 %v1675_v6, %v1675_v6  ;;  %v1289_v9 = vadd.f32 %v3138_v15, %v1288_v7  ;;  %v1577_v10 = vpop.f32.mrb[104].mxu0  ;;  %v1290_v11 = vpop.f32.mrb[105].mxu1 }
 0x1e6   :  { %v1579_v12 = vpop.f32.mrb[105].mxu0  ;;  %v1291_v13 = vpop.f32.mrb[106].mxu1 }
 0x1e7   :  { %1996 = vst.msk [vmem:[%s3522_s3 + $0xcc] sm:$0xf] %vm1944_vm0, %v2289_v8  ;;  %v1578_v14 = vadd.f32 %v1577_v10, %v1289_v9  ;;  %v1292_v17 = vadd.f32 %v3458_v16, %v1291_v13  ;;  %v1580_v18 = vpop.f32.mrb[106].mxu0  ;;  %v1293_v19 = vpop.f32.mrb[107].mxu1 }
 0x1e8   :  { %v1582_v15 = vpop.f32.mrb[107].mxu0 }
 0x1e9   :  { %v1676_v20 = vmax.f32 %v1578_v14, 0.0  ;;  %v1581_v21 = vadd.f32 %v1580_v18, %v1292_v17 }
 0x1eb   :  { %v2290_v22 = vpack.c.bf16 %v1676_v20, %v1676_v20  ;;  %v1677_v23 = vmax.f32 %v1581_v21, 0.0 }
 0x1ec   :  { %v1296_v24 = vpop.f32.mrb[108].mxu1 }
 0x1ed   :  { %1997 = vst.msk [vmem:[%s3522_s3 + $0xd0] sm:$0xf] %vm1944_vm0, %v2290_v22  ;;  %v2291_v25 = vpack.c.bf16 %v1677_v23, %v1677_v23  ;;  %v1297_v26 = vadd.f32 %v3458_v16, %v1296_v24  ;;  %v1585_v27 = vpop.f32.mrb[108].mxu0  ;;  %v1298_v28 = vpop.f32.mrb[109].mxu1 }
 0x1ee   :  { %v1587_v29 = vpop.f32.mrb[109].mxu0  ;;  %v1299_v30 = vpop.f32.mrb[110].mxu1 }
 0x1ef   :  { %1998 = vst.msk [vmem:[%s3522_s3 + $0xd4] sm:$0xf] %vm1944_vm0, %v2291_v25  ;;  %v1586_v31 = vadd.f32 %v1585_v27, %v1297_v26  ;;  %v1300_v32 = vadd.f32 %v3458_v16, %v1299_v30  ;;  %v1588_v33 = vpop.f32.mrb[110].mxu0  ;;  %v1301_v34 = vpop.f32.mrb[111].mxu1 }
 0x1f0   :  { %v1590_v35 = vpop.f32.mrb[111].mxu0 }
 0x1f1   :  { %v1678_v36 = vmax.f32 %v1586_v31, 0.0  ;;  %v1589_v37 = vadd.f32 %v1588_v33, %v1300_v32 }
 0x1f3   :  { %v2292_v38 = vpack.c.bf16 %v1678_v36, %v1678_v36  ;;  %v1679_v39 = vmax.f32 %v1589_v37, 0.0 }
 0x1f4   :  { %v1304_v40 = vpop.f32.mrb[112].mxu1 }
 0x1f5   :  { %1999 = vst.msk [vmem:[%s3522_s3 + $0xd8] sm:$0xf] %vm1944_vm0, %v2292_v38  ;;  %v2293_v41 = vpack.c.bf16 %v1679_v39, %v1679_v39  ;;  %v1305_v42 = vadd.f32 %v3458_v16, %v1304_v40  ;;  %v1593_v43 = vpop.f32.mrb[112].mxu0  ;;  %v1306_v44 = vpop.f32.mrb[113].mxu1 }
 0x1f6   :  { %v1595_v45 = vpop.f32.mrb[113].mxu0  ;;  %v1307_v46 = vpop.f32.mrb[114].mxu1 }
 0x1f7   :  { %2000 = vst.msk [vmem:[%s3522_s3 + $0xdc] sm:$0xf] %vm1944_vm0, %v2293_v41  ;;  %v1594_v47 = vadd.f32 %v1593_v43, %v1305_v42  ;;  %v1308_v48 = vadd.f32 %v3458_v16, %v1307_v46  ;;  %v1596_v49 = vpop.f32.mrb[114].mxu0  ;;  %v1309_v50 = vpop.f32.mrb[115].mxu1 }
 0x1f8   :  { %v1598_v51 = vpop.f32.mrb[115].mxu0 }
 0x1f9   :  { %v1680_v52 = vmax.f32 %v1594_v47, 0.0  ;;  %v1597_v53 = vadd.f32 %v1596_v49, %v1308_v48 }
 0x1fb   :  { %v2294_v54 = vpack.c.bf16 %v1680_v52, %v1680_v52  ;;  %v1681_v55 = vmax.f32 %v1597_v53, 0.0 }
 0x1fc   :  { %v1312_v56 = vpop.f32.mrb[116].mxu1 }
 0x1fd   :  { %2001 = vst.msk [vmem:[%s3522_s3 + $0xe0] sm:$0xf] %vm1944_vm0, %v2294_v54  ;;  %v2295_v57 = vpack.c.bf16 %v1681_v55, %v1681_v55  ;;  %v1313_v58 = vadd.f32 %v3458_v16, %v1312_v56  ;;  %v1601_v59 = vpop.f32.mrb[116].mxu0  ;;  %v1314_v60 = vpop.f32.mrb[117].mxu1 }
 0x1fe   :  { %v1603_v61 = vpop.f32.mrb[117].mxu0  ;;  %v1315_v62 = vpop.f32.mrb[118].mxu1 }
 0x1ff   :  { %2002 = vst.msk [vmem:[%s3522_s3 + $0xe4] sm:$0xf] %vm1944_vm0, %v2295_v57  ;;  %v1602_v63 = vadd.f32 %v1601_v59, %v1313_v58  ;;  %v1316_v0 = vadd.f32 %v3458_v16, %v1315_v62  ;;  %v1604_v1 = vpop.f32.mrb[118].mxu0  ;;  %v1317_v2 = vpop.f32.mrb[119].mxu1 }
 0x200   :  { %v1606_v3 = vpop.f32.mrb[119].mxu0 }
 0x201   :  { %v1682_v4 = vmax.f32 %v1602_v63, 0.0  ;;  %v1605_v5 = vadd.f32 %v1604_v1, %v1316_v0 }
 0x203   :  { %v2296_v6 = vpack.c.bf16 %v1682_v4, %v1682_v4  ;;  %v1683_v7 = vmax.f32 %v1605_v5, 0.0 }
 0x204   :  { %v1320_v8 = vpop.f32.mrb[120].mxu1 }
 0x205   :  { %2003 = vst.msk [vmem:[%s3522_s3 + $0xe8] sm:$0xf] %vm1944_vm0, %v2296_v6  ;;  %v2297_v9 = vpack.c.bf16 %v1683_v7, %v1683_v7  ;;  %v1321_v10 = vadd.f32 %v3458_v16, %v1320_v8  ;;  %v1609_v11 = vpop.f32.mrb[120].mxu0  ;;  %v1322_v12 = vpop.f32.mrb[121].mxu1 }
 0x206   :  { %v1611_v13 = vpop.f32.mrb[121].mxu0  ;;  %v1323_v14 = vpop.f32.mrb[122].mxu1 }
 0x207   :  { %2004 = vst.msk [vmem:[%s3522_s3 + $0xec] sm:$0xf] %vm1944_vm0, %v2297_v9  ;;  %v1610_v17 = vadd.f32 %v1609_v11, %v1321_v10  ;;  %v1324_v18 = vadd.f32 %v3458_v16, %v1323_v14  ;;  %v1612_v19 = vpop.f32.mrb[122].mxu0  ;;  %v1325_v15 = vpop.f32.mrb[123].mxu1 }
 0x208   :  { %v1614_v20 = vpop.f32.mrb[123].mxu0 }
 0x209   :  { %v1684_v21 = vmax.f32 %v1610_v17, 0.0  ;;  %v1613_v22 = vadd.f32 %v1612_v19, %v1324_v18 }
 0x20b   :  { %v2298_v23 = vpack.c.bf16 %v1684_v21, %v1684_v21  ;;  %v1685_v24 = vmax.f32 %v1613_v22, 0.0 }
 0x20c   :  { %v1328_v25 = vpop.f32.mrb[124].mxu1 }
 0x20d   :  { %2005 = vst.msk [vmem:[%s3522_s3 + $0xf0] sm:$0xf] %vm1944_vm0, %v2298_v23  ;;  %v2299_v26 = vpack.c.bf16 %v1685_v24, %v1685_v24  ;;  %v1329_v27 = vadd.f32 %v3458_v16, %v1328_v25  ;;  %v1617_v28 = vpop.f32.mrb[124].mxu0  ;;  %v1330_v29 = vpop.f32.mrb[125].mxu1 }
 0x20e   :  { %v1619_v30 = vpop.f32.mrb[125].mxu0  ;;  %v1331_v31 = vpop.f32.mrb[126].mxu1 }
 0x20f   :  { %2006 = vst.msk [vmem:[%s3522_s3 + $0xf4] sm:$0xf] %vm1944_vm0, %v2299_v26  ;;  %v1618_v32 = vadd.f32 %v1617_v28, %v1329_v27  ;;  %v1332_v33 = vadd.f32 %v3458_v16, %v1331_v31  ;;  %v1620_v34 = vpop.f32.mrb[126].mxu0  ;;  %v1333_v35 = vpop.f32.mrb[127].mxu1 }
 0x210   :  { %v1622_v36 = vpop.f32.mrb[127].mxu0 }
 0x211   :  { %v1686_v37 = vmax.f32 %v1618_v32, 0.0  ;;  %v1621_v38 = vadd.f32 %v1620_v34, %v1332_v33 }
 0x213   :  { %v2300_v39 = vpack.c.bf16 %v1686_v37, %v1686_v37  ;;  %v1687_v40 = vmax.f32 %v1621_v38, 0.0 }
 0x215   :  { %2007 = vst.msk [vmem:[%s3522_s3 + $0xf8] sm:$0xf] %vm1944_vm0, %v2300_v39  ;;  %v2301_v41 = vpack.c.bf16 %v1687_v40, %v1687_v40 }
 0x217   :  { %2008 = vst.msk [vmem:[%s3522_s3 + $0xfc] sm:$0xf] %vm1944_vm0, %v2301_v41 }

// kernel: pose_exp_net_forward.9
= control target key start
LH: loop header
LB: loop body
LE: loop exit
PB: predicated region body
PF: predicated region fallthrough
CT: control target
= control target key end

     0   :  { %vm744_vm0 = vcmask 257024   ;;  %s1367_s1 = inlined_call_operand.vmem [shape: bf16[512,32], index: 1, kind: input, shape index: {}]   ;;  %s1368_s0 = inlined_call_operand.vmem [shape: bf16[128,512], index: 0, kind: input, shape index: {}]   ;;  %s1369_s2 = inlined_call_operand.vmem [shape: f32[1,32], index: 2, kind: input, shape index: {}]   ;;  %s1370_s3 = inlined_call_operand.vmem [shape: bf16[128,32], index: 3, kind: output, shape index: {}]  }
   0x1   :  { %v990_v0 = vld [vmem:[%s1367_s1 + $0x40] sm:$0xff]   ;;  %v994_v4 = vld [vmem:[%s1367_s1 + $0x48] sm:$0xff]   ;;  %v998_v8 = vld [vmem:[%s1367_s1 + $0x50] sm:$0xff]  }
   0x2   :  { %v991_v1 = vld [vmem:[%s1367_s1 + $0xc0] sm:$0xff]   ;;  %862 = vmatprep.subr.bf16.mxu0 %v990_v0  ;;  %v995_v5 = vld [vmem:[%s1367_s1 + $0xc8] sm:$0xff]   ;;  %v999_v9 = vld [vmem:[%s1367_s1 + $0xd0] sm:$0xff]  }
   0x3   :  { %v992_v2 = vld [vmem:[%s1367_s1] sm:$0xff]   ;;  %926 = vmatprep.subr.bf16.mxu1 %v991_v1  ;;  %v996_v6 = vld [vmem:[%s1367_s1 + $0x8] sm:$0xff]   ;;  %v1000_v10 = vld [vmem:[%s1367_s1 + $0x10] sm:$0xff]  }
   0x4   :  { %v993_v3 = vld [vmem:[%s1367_s1 + $0x80] sm:$0xff]   ;;  %863 = vmatpush3.bf16.msra.mxu0 %v992_v2  ;;  %v997_v7 = vld [vmem:[%s1367_s1 + $0x88] sm:$0xff]   ;;  %v1001_v11 = vld [vmem:[%s1367_s1 + $0x90] sm:$0xff]  }
   0x5   :  { %927 = vmatpush3.bf16.msra.mxu1 %v993_v3  ;;  %864 = vmatprep.subr.bf16.mxu0 %v994_v4  ;;  %v1002_v12 = vld [vmem:[%s1367_s1 + $0x58] sm:$0xff]   ;;  %v1006_v16 = vld [vmem:[%s1367_s1 + $0x60] sm:$0xff]   ;;  %v1010_v20 = vld [vmem:[%s1367_s1 + $0x68] sm:$0xff]  }
   0x6   :  { %928 = vmatprep.subr.bf16.mxu1 %v995_v5  ;;  %v1003_v13 = vld [vmem:[%s1367_s1 + $0xd8] sm:$0xff]   ;;  %v1007_v17 = vld [vmem:[%s1367_s1 + $0xe0] sm:$0xff]   ;;  %v1011_v21 = vld [vmem:[%s1367_s1 + $0xe8] sm:$0xff]  }
   0x7   :  { %v1004_v14 = vld [vmem:[%s1367_s1 + $0x18] sm:$0xff]   ;;  %v1008_v18 = vld [vmem:[%s1367_s1 + $0x20] sm:$0xff]   ;;  %v1012_v22 = vld [vmem:[%s1367_s1 + $0x28] sm:$0xff]  }
   0x8   :  { %865 = vmatpush3.bf16.msra.mxu0 %v996_v6  ;;  %v1005_v15 = vld [vmem:[%s1367_s1 + $0x98] sm:$0xff]   ;;  %v1009_v19 = vld [vmem:[%s1367_s1 + $0xa0] sm:$0xff]   ;;  %v1013_v23 = vld [vmem:[%s1367_s1 + $0xa8] sm:$0xff]  }
   0x9   :  { %929 = vmatpush3.bf16.msra.mxu1 %v997_v7  ;;  %866 = vmatprep.subr.bf16.mxu0 %v998_v8  ;;  %v1014_v24 = vld [vmem:[%s1367_s1 + $0x70] sm:$0xff]   ;;  %v1018_v28 = vld [vmem:[%s1367_s1 + $0x78] sm:$0xff]   ;;  %v1285_v2 = vld [vmem:[%s1369_s2] ss:$0 sm:$0xff] }
   0xa   :  { %930 = vmatprep.subr.bf16.mxu1 %v999_v9  ;;  %v1015_v25 = vld [vmem:[%s1367_s1 + $0xf0] sm:$0xff]   ;;  %v1019_v29 = vld [vmem:[%s1367_s1 + $0xf8] sm:$0xff]  }
   0xb   :  { %v1016_v26 = vld [vmem:[%s1367_s1 + $0x30] sm:$0xff]   ;;  %v1020_v30 = vld [vmem:[%s1367_s1 + $0x38] sm:$0xff]  }
   0xc   :  { %867 = vmatpush3.bf16.msra.mxu0 %v1000_v10  ;;  %v1017_v27 = vld [vmem:[%s1367_s1 + $0xb0] sm:$0xff]   ;;  %v1021_v31 = vld [vmem:[%s1367_s1 + $0xb8] sm:$0xff]  }
   0xd   :  { %931 = vmatpush3.bf16.msra.mxu1 %v1001_v11  ;;  %868 = vmatprep.subr.bf16.mxu0 %v1002_v12  ;;  %v1022_v32 = vld [vmem:[%s1368_s0] ss:$16 sps:$4 sm:$0xff]   ;;  %v1024_v33 = vld [vmem:[%s1368_s0 + $0x4] ss:$16 sps:$4 sm:$0xff]   ;;  %v1025_v34 = vld [vmem:[%s1368_s0 + $0x8] ss:$16 sps:$4 sm:$0xff]  }
   0xe   :  { %932 = vmatprep.subr.bf16.mxu1 %v1003_v13  ;;  %v1027_v35 = vld [vmem:[%s1368_s0 + $0xc] ss:$16 sps:$4 sm:$0xff]   ;;  %502 = vmatprep.mubr.bf16.mxu0 %v1024_v33  ;;  %v1028_v36 = vld [vmem:[%s1368_s0 + $0x24] ss:$16 sps:$4 sm:$0xff]   ;;  %v1032_v38 = vld [vmem:[%s1368_s0 + $0x20] ss:$16 sps:$4 sm:$0xff]  }
   0xf   :  { %599 = vmatprep.mubr.bf16.mxu1 %v1027_v35  ;;  %v1030_v37 = vld [vmem:[%s1368_s0 + $0x2c] ss:$16 sps:$4 sm:$0xff]   ;;  %v1033_v39 = vld [vmem:[%s1368_s0 + $0x28] ss:$16 sps:$4 sm:$0xff]   ;;  %v1034_v40 = vld [vmem:[%s1368_s0 + $0x44] ss:$16 sps:$4 sm:$0xff]  }
  0x10   :  { %869 = vmatpush3.bf16.msra.mxu0 %v1004_v14  ;;  %v1036_v41 = vld [vmem:[%s1368_s0 + $0x4c] ss:$16 sps:$4 sm:$0xff]   ;;  %v1038_v42 = vld [vmem:[%s1368_s0 + $0x40] ss:$16 sps:$4 sm:$0xff]   ;;  %v1039_v43 = vld [vmem:[%s1368_s0 + $0x48] ss:$16 sps:$4 sm:$0xff]  }
  0x11   :  { %933 = vmatpush3.bf16.msra.mxu1 %v1005_v15  ;;  %870 = vmatprep.subr.bf16.mxu0 %v1006_v16  ;;  %v1040_v44 = vld [vmem:[%s1368_s0 + $0x64] ss:$16 sps:$4 sm:$0xff]   ;;  %v1042_v45 = vld [vmem:[%s1368_s0 + $0x6c] ss:$16 sps:$4 sm:$0xff]   ;;  %v1044_v46 = vld [vmem:[%s1368_s0 + $0x60] ss:$16 sps:$4 sm:$0xff]  }
  0x12   :  { %934 = vmatprep.subr.bf16.mxu1 %v1007_v17  ;;  %v1045_v47 = vld [vmem:[%s1368_s0 + $0x68] ss:$16 sps:$4 sm:$0xff]   ;;  %v1046_v48 = vld [vmem:[%s1368_s0 + $0x84] ss:$16 sps:$4 sm:$0xff]   ;;  %v1048_v49 = vld [vmem:[%s1368_s0 + $0x8c] ss:$16 sps:$4 sm:$0xff]  }
  0x13   :  { %v1050_v50 = vld [vmem:[%s1368_s0 + $0x80] ss:$16 sps:$4 sm:$0xff]   ;;  %v1051_v51 = vld [vmem:[%s1368_s0 + $0x88] ss:$16 sps:$4 sm:$0xff]   ;;  %v1052_v52 = vld [vmem:[%s1368_s0 + $0xa4] ss:$16 sps:$4 sm:$0xff]  }
  0x14   :  { %871 = vmatpush3.bf16.msra.mxu0 %v1008_v18  ;;  %v1054_v53 = vld [vmem:[%s1368_s0 + $0xac] ss:$16 sps:$4 sm:$0xff]   ;;  %v1056_v54 = vld [vmem:[%s1368_s0 + $0xa0] ss:$16 sps:$4 sm:$0xff]   ;;  %v1057_v55 = vld [vmem:[%s1368_s0 + $0xa8] ss:$16 sps:$4 sm:$0xff]  }
  0x15   :  { %935 = vmatpush3.bf16.msra.mxu1 %v1009_v19  ;;  %872 = vmatprep.subr.bf16.mxu0 %v1010_v20  ;;  %v1058_v56 = vld [vmem:[%s1368_s0 + $0xc4] ss:$16 sps:$4 sm:$0xff]   ;;  %v1060_v57 = vld [vmem:[%s1368_s0 + $0xcc] ss:$16 sps:$4 sm:$0xff]   ;;  %v1062_v58 = vld [vmem:[%s1368_s0 + $0xc0] ss:$16 sps:$4 sm:$0xff]  }
  0x16   :  { %936 = vmatprep.subr.bf16.mxu1 %v1011_v21  ;;  %v1063_v59 = vld [vmem:[%s1368_s0 + $0xc8] ss:$16 sps:$4 sm:$0xff]   ;;  %v1064_v60 = vld [vmem:[%s1368_s0 + $0xe4] ss:$16 sps:$4 sm:$0xff]   ;;  %v1066_v61 = vld [vmem:[%s1368_s0 + $0xec] ss:$16 sps:$4 sm:$0xff]  }
  0x17   :  { %v1068_v62 = vld [vmem:[%s1368_s0 + $0xe0] ss:$16 sps:$4 sm:$0xff]   ;;  %v1069_v63 = vld [vmem:[%s1368_s0 + $0xe8] ss:$16 sps:$4 sm:$0xff]  }
  0x18   :  { %873 = vmatpush3.bf16.msra.mxu0 %v1012_v22 }
  0x19   :  { %937 = vmatpush3.bf16.msra.mxu1 %v1013_v23  ;;  %874 = vmatprep.subr.bf16.mxu0 %v1014_v24 }
  0x1a   :  { %938 = vmatprep.subr.bf16.mxu1 %v1015_v25 }
  0x1c   :  { %875 = vmatpush3.bf16.msra.mxu0 %v1016_v26 }
  0x1d   :  { %939 = vmatpush3.bf16.msra.mxu1 %v1017_v27  ;;  %876 = vmatprep.subr.bf16.mxu0 %v1018_v28 }
  0x1e   :  { %940 = vmatprep.subr.bf16.mxu1 %v1019_v29 }
  0x20   :  { %877 = vmatpush3.bf16.msra.mxu0 %v1020_v30 }
  0x21   :  { %941 = vmatpush3.bf16.msra.mxu1 %v1021_v31 }
  0x23   :  { %503 = vmatmul.mubr.bf16.vlgmr.msra.gmra.mrb[0].mxu0 %v1022_v32 }
  0x24   :  { %600 = vmatmul.mubr.bf16.vlgmr.msra.gmra.mrb[0].mxu1 %v1025_v34  ;;  %510 = vmatprep.mubr.bf16.mxu0 %v1028_v36 }
  0x25   :  { %607 = vmatprep.mubr.bf16.mxu1 %v1030_v37 }
  0x2b   :  { %511 = vmatmul.mubr.bf16.gmra.mrb[4].mxu0 %v1032_v38 }
  0x2c   :  { %608 = vmatmul.mubr.bf16.gmra.mrb[4].mxu1 %v1033_v39  ;;  %518 = vmatprep.mubr.bf16.mxu0 %v1034_v40 }
  0x2d   :  { %615 = vmatprep.mubr.bf16.mxu1 %v1036_v41 }
  0x33   :  { %519 = vmatmul.mubr.bf16.gmra.mrb[8].mxu0 %v1038_v42 }
  0x34   :  { %616 = vmatmul.mubr.bf16.gmra.mrb[8].mxu1 %v1039_v43  ;;  %526 = vmatprep.mubr.bf16.mxu0 %v1040_v44 }
  0x35   :  { %623 = vmatprep.mubr.bf16.mxu1 %v1042_v45 }
  0x3b   :  { %527 = vmatmul.mubr.bf16.gmra.mrb[12].mxu0 %v1044_v46 }
  0x3c   :  { %624 = vmatmul.mubr.bf16.gmra.mrb[12].mxu1 %v1045_v47  ;;  %534 = vmatprep.mubr.bf16.mxu0 %v1046_v48 }
  0x3d   :  { %631 = vmatprep.mubr.bf16.mxu1 %v1048_v49 }
  0x43   :  { %535 = vmatmul.mubr.bf16.gmra.mrb[16].mxu0 %v1050_v50 }
  0x44   :  { %632 = vmatmul.mubr.bf16.gmra.mrb[16].mxu1 %v1051_v51  ;;  %542 = vmatprep.mubr.bf16.mxu0 %v1052_v52 }
  0x45   :  { %639 = vmatprep.mubr.bf16.mxu1 %v1054_v53 }
  0x4b   :  { %543 = vmatmul.mubr.bf16.gmra.mrb[20].mxu0 %v1056_v54 }
  0x4c   :  { %640 = vmatmul.mubr.bf16.gmra.mrb[20].mxu1 %v1057_v55  ;;  %550 = vmatprep.mubr.bf16.mxu0 %v1058_v56 }
  0x4d   :  { %647 = vmatprep.mubr.bf16.mxu1 %v1060_v57 }
  0x53   :  { %551 = vmatmul.mubr.bf16.gmra.mrb[24].mxu0 %v1062_v58 }
  0x54   :  { %648 = vmatmul.mubr.bf16.gmra.mrb[24].mxu1 %v1063_v59  ;;  %558 = vmatprep.mubr.bf16.mxu0 %v1064_v60 }
  0x55   :  { %655 = vmatprep.mubr.bf16.mxu1 %v1066_v61 }
  0x5b   :  { %559 = vmatmul.mubr.bf16.gmra.mrb[28].mxu0 %v1068_v62 }
  0x5c   :  { %656 = vmatmul.mubr.bf16.gmra.mrb[28].mxu1 %v1069_v63 }
  0xf6   :  { %v878_v0 = vpop.f32.mrb[0].mxu0 }
  0xf7   :  { %v942_v1 = vpop.f32.mrb[0].mxu1  ;;  %v879_v3 = vpop.f32.mrb[1].mxu0 }
  0xf8   :  { %v880_v4 = vadd.f32 %v879_v3, %v878_v0  ;;  %v943_v5 = vpop.f32.mrb[1].mxu1  ;;  %v881_v6 = vpop.f32.mrb[2].mxu0 }
  0xf9   :  { %v944_v7 = vadd.f32 %v943_v5, %v942_v1  ;;  %v945_v8 = vpop.f32.mrb[2].mxu1  ;;  %v882_v9 = vpop.f32.mrb[3].mxu0 }
  0xfa   :  { %v505_v10 = vadd.f32 %v880_v4, %v1285_v2  ;;  %v883_v11 = vadd.f32 %v882_v9, %v881_v6  ;;  %v946_v12 = vpop.f32.mrb[3].mxu1 }
  0xfb   :  { %v947_v13 = vadd.f32 %v946_v12, %v945_v8 }
  0xfc   :  { %v602_v14 = vadd.f32 %v944_v7, %v505_v10  ;;  %v508_v15 = vadd.f32 %v883_v11, %v1285_v2 }
  0xfe   :  { %v664_v16 = vmax.f32 %v602_v14, 0.0  ;;  %v605_v17 = vadd.f32 %v947_v13, %v508_v15  ;;  %v884_v18 = vpop.f32.mrb[4].mxu0 }
  0xff   :  { %v948_v19 = vpop.f32.mrb[4].mxu1  ;;  %v885_v20 = vpop.f32.mrb[5].mxu0 }
 0x100   :  { %v846_v21 = vpack.c.bf16 %v664_v16, %v664_v16  ;;  %v665_v22 = vmax.f32 %v605_v17, 0.0  ;;  %v886_v23 = vadd.f32 %v885_v20, %v884_v18  ;;  %v949_v24 = vpop.f32.mrb[5].mxu1  ;;  %v887_v25 = vpop.f32.mrb[6].mxu0 }
 0x101   :  { %v950_v26 = vadd.f32 %v949_v24, %v948_v19  ;;  %v951_v27 = vpop.f32.mrb[6].mxu1  ;;  %v888_v28 = vpop.f32.mrb[7].mxu0 }
 0x102   :  { %745 = vst.msk [vmem:[%s1370_s3] sm:$0xf] %vm744_vm0, %v846_v21  ;;  %v847_v29 = vpack.c.bf16 %v665_v22, %v665_v22  ;;  %v513_v30 = vadd.f32 %v886_v23, %v1285_v2  ;;  %v889_v31 = vadd.f32 %v888_v28, %v887_v25  ;;  %v952_v32 = vpop.f32.mrb[7].mxu1 }
 0x103   :  { %v953_v33 = vadd.f32 %v952_v32, %v951_v27 }
 0x104   :  { %746 = vst.msk [vmem:[%s1370_s3 + $0x4] sm:$0xf] %vm744_vm0, %v847_v29  ;;  %v610_v34 = vadd.f32 %v950_v26, %v513_v30  ;;  %v516_v35 = vadd.f32 %v889_v31, %v1285_v2 }
 0x106   :  { %v666_v36 = vmax.f32 %v610_v34, 0.0  ;;  %v613_v37 = vadd.f32 %v953_v33, %v516_v35  ;;  %v890_v38 = vpop.f32.mrb[8].mxu0 }
 0x107   :  { %v954_v39 = vpop.f32.mrb[8].mxu1  ;;  %v891_v40 = vpop.f32.mrb[9].mxu0 }
 0x108   :  { %v848_v41 = vpack.c.bf16 %v666_v36, %v666_v36  ;;  %v667_v42 = vmax.f32 %v613_v37, 0.0  ;;  %v892_v43 = vadd.f32 %v891_v40, %v890_v38  ;;  %v955_v44 = vpop.f32.mrb[9].mxu1  ;;  %v893_v45 = vpop.f32.mrb[10].mxu0 }
 0x109   :  { %v956_v46 = vadd.f32 %v955_v44, %v954_v39  ;;  %v957_v47 = vpop.f32.mrb[10].mxu1  ;;  %v894_v48 = vpop.f32.mrb[11].mxu0 }
 0x10a   :  { %747 = vst.msk [vmem:[%s1370_s3 + $0x8] sm:$0xf] %vm744_vm0, %v848_v41  ;;  %v849_v49 = vpack.c.bf16 %v667_v42, %v667_v42  ;;  %v521_v50 = vadd.f32 %v892_v43, %v1285_v2  ;;  %v895_v51 = vadd.f32 %v894_v48, %v893_v45  ;;  %v958_v52 = vpop.f32.mrb[11].mxu1 }
 0x10b   :  { %v959_v53 = vadd.f32 %v958_v52, %v957_v47 }
 0x10c   :  { %748 = vst.msk [vmem:[%s1370_s3 + $0xc] sm:$0xf] %vm744_vm0, %v849_v49  ;;  %v618_v54 = vadd.f32 %v956_v46, %v521_v50  ;;  %v524_v55 = vadd.f32 %v895_v51, %v1285_v2 }
 0x10e   :  { %v668_v56 = vmax.f32 %v618_v54, 0.0  ;;  %v621_v57 = vadd.f32 %v959_v53, %v524_v55  ;;  %v896_v58 = vpop.f32.mrb[12].mxu0 }
 0x10f   :  { %v960_v59 = vpop.f32.mrb[12].mxu1  ;;  %v897_v60 = vpop.f32.mrb[13].mxu0 }
 0x110   :  { %v850_v61 = vpack.c.bf16 %v668_v56, %v668_v56  ;;  %v669_v62 = vmax.f32 %v621_v57, 0.0  ;;  %v898_v63 = vadd.f32 %v897_v60, %v896_v58  ;;  %v961_v0 = vpop.f32.mrb[13].mxu1  ;;  %v899_v1 = vpop.f32.mrb[14].mxu0 }
 0x111   :  { %v962_v3 = vadd.f32 %v961_v0, %v960_v59  ;;  %v963_v4 = vpop.f32.mrb[14].mxu1  ;;  %v900_v5 = vpop.f32.mrb[15].mxu0 }
 0x112   :  { %749 = vst.msk [vmem:[%s1370_s3 + $0x10] sm:$0xf] %vm744_vm0, %v850_v61  ;;  %v851_v6 = vpack.c.bf16 %v669_v62, %v669_v62  ;;  %v529_v7 = vadd.f32 %v898_v63, %v1285_v2  ;;  %v901_v8 = vadd.f32 %v900_v5, %v899_v1  ;;  %v964_v9 = vpop.f32.mrb[15].mxu1 }
 0x113   :  { %v965_v10 = vadd.f32 %v964_v9, %v963_v4 }
 0x114   :  { %750 = vst.msk [vmem:[%s1370_s3 + $0x14] sm:$0xf] %vm744_vm0, %v851_v6  ;;  %v626_v11 = vadd.f32 %v962_v3, %v529_v7  ;;  %v532_v12 = vadd.f32 %v901_v8, %v1285_v2 }
 0x116   :  { %v670_v13 = vmax.f32 %v626_v11, 0.0  ;;  %v629_v14 = vadd.f32 %v965_v10, %v532_v12  ;;  %v902_v15 = vpop.f32.mrb[16].mxu0 }
 0x117   :  { %v966_v16 = vpop.f32.mrb[16].mxu1  ;;  %v903_v17 = vpop.f32.mrb[17].mxu0 }
 0x118   :  { %v852_v18 = vpack.c.bf16 %v670_v13, %v670_v13  ;;  %v671_v19 = vmax.f32 %v629_v14, 0.0  ;;  %v904_v20 = vadd.f32 %v903_v17, %v902_v15  ;;  %v967_v21 = vpop.f32.mrb[17].mxu1  ;;  %v905_v22 = vpop.f32.mrb[18].mxu0 }
 0x119   :  { %v968_v23 = vadd.f32 %v967_v21, %v966_v16  ;;  %v969_v24 = vpop.f32.mrb[18].mxu1  ;;  %v906_v25 = vpop.f32.mrb[19].mxu0 }
 0x11a   :  { %751 = vst.msk [vmem:[%s1370_s3 + $0x18] sm:$0xf] %vm744_vm0, %v852_v18  ;;  %v853_v26 = vpack.c.bf16 %v671_v19, %v671_v19  ;;  %v537_v27 = vadd.f32 %v904_v20, %v1285_v2  ;;  %v907_v28 = vadd.f32 %v906_v25, %v905_v22  ;;  %v970_v29 = vpop.f32.mrb[19].mxu1 }
 0x11b   :  { %v971_v30 = vadd.f32 %v970_v29, %v969_v24 }
 0x11c   :  { %752 = vst.msk [vmem:[%s1370_s3 + $0x1c] sm:$0xf] %vm744_vm0, %v853_v26  ;;  %v634_v31 = vadd.f32 %v968_v23, %v537_v27  ;;  %v540_v32 = vadd.f32 %v907_v28, %v1285_v2 }
 0x11e   :  { %v672_v33 = vmax.f32 %v634_v31, 0.0  ;;  %v637_v34 = vadd.f32 %v971_v30, %v540_v32  ;;  %v908_v35 = vpop.f32.mrb[20].mxu0 }
 0x11f   :  { %v972_v36 = vpop.f32.mrb[20].mxu1  ;;  %v909_v37 = vpop.f32.mrb[21].mxu0 }
 0x120   :  { %v854_v38 = vpack.c.bf16 %v672_v33, %v672_v33  ;;  %v673_v39 = vmax.f32 %v637_v34, 0.0  ;;  %v910_v40 = vadd.f32 %v909_v37, %v908_v35  ;;  %v973_v41 = vpop.f32.mrb[21].mxu1  ;;  %v911_v42 = vpop.f32.mrb[22].mxu0 }
 0x121   :  { %v974_v43 = vadd.f32 %v973_v41, %v972_v36  ;;  %v975_v44 = vpop.f32.mrb[22].mxu1  ;;  %v912_v45 = vpop.f32.mrb[23].mxu0 }
 0x122   :  { %753 = vst.msk [vmem:[%s1370_s3 + $0x20] sm:$0xf] %vm744_vm0, %v854_v38  ;;  %v855_v46 = vpack.c.bf16 %v673_v39, %v673_v39  ;;  %v545_v47 = vadd.f32 %v910_v40, %v1285_v2  ;;  %v913_v48 = vadd.f32 %v912_v45, %v911_v42  ;;  %v976_v49 = vpop.f32.mrb[23].mxu1 }
 0x123   :  { %v977_v50 = vadd.f32 %v976_v49, %v975_v44 }
 0x124   :  { %754 = vst.msk [vmem:[%s1370_s3 + $0x24] sm:$0xf] %vm744_vm0, %v855_v46  ;;  %v642_v51 = vadd.f32 %v974_v43, %v545_v47  ;;  %v548_v52 = vadd.f32 %v913_v48, %v1285_v2 }
 0x126   :  { %v674_v53 = vmax.f32 %v642_v51, 0.0  ;;  %v645_v54 = vadd.f32 %v977_v50, %v548_v52  ;;  %v914_v55 = vpop.f32.mrb[24].mxu0 }
 0x127   :  { %v978_v56 = vpop.f32.mrb[24].mxu1  ;;  %v915_v57 = vpop.f32.mrb[25].mxu0 }
 0x128   :  { %v856_v58 = vpack.c.bf16 %v674_v53, %v674_v53  ;;  %v675_v59 = vmax.f32 %v645_v54, 0.0  ;;  %v916_v60 = vadd.f32 %v915_v57, %v914_v55  ;;  %v979_v61 = vpop.f32.mrb[25].mxu1  ;;  %v917_v62 = vpop.f32.mrb[26].mxu0 }
 0x129   :  { %v980_v63 = vadd.f32 %v979_v61, %v978_v56  ;;  %v981_v0 = vpop.f32.mrb[26].mxu1  ;;  %v918_v1 = vpop.f32.mrb[27].mxu0 }
 0x12a   :  { %755 = vst.msk [vmem:[%s1370_s3 + $0x28] sm:$0xf] %vm744_vm0, %v856_v58  ;;  %v857_v3 = vpack.c.bf16 %v675_v59, %v675_v59  ;;  %v553_v4 = vadd.f32 %v916_v60, %v1285_v2  ;;  %v919_v5 = vadd.f32 %v918_v1, %v917_v62  ;;  %v982_v6 = vpop.f32.mrb[27].mxu1 }
 0x12b   :  { %v983_v7 = vadd.f32 %v982_v6, %v981_v0 }
 0x12c   :  { %756 = vst.msk [vmem:[%s1370_s3 + $0x2c] sm:$0xf] %vm744_vm0, %v857_v3  ;;  %v650_v8 = vadd.f32 %v980_v63, %v553_v4  ;;  %v556_v9 = vadd.f32 %v919_v5, %v1285_v2 }
 0x12e   :  { %v676_v10 = vmax.f32 %v650_v8, 0.0  ;;  %v653_v11 = vadd.f32 %v983_v7, %v556_v9  ;;  %v920_v12 = vpop.f32.mrb[28].mxu0 }
 0x12f   :  { %v984_v13 = vpop.f32.mrb[28].mxu1  ;;  %v921_v14 = vpop.f32.mrb[29].mxu0 }
 0x130   :  { %v858_v15 = vpack.c.bf16 %v676_v10, %v676_v10  ;;  %v677_v16 = vmax.f32 %v653_v11, 0.0  ;;  %v922_v17 = vadd.f32 %v921_v14, %v920_v12  ;;  %v985_v18 = vpop.f32.mrb[29].mxu1  ;;  %v923_v19 = vpop.f32.mrb[30].mxu0 }
 0x131   :  { %v986_v20 = vadd.f32 %v985_v18, %v984_v13  ;;  %v987_v21 = vpop.f32.mrb[30].mxu1  ;;  %v924_v22 = vpop.f32.mrb[31].mxu0 }
 0x132   :  { %757 = vst.msk [vmem:[%s1370_s3 + $0x30] sm:$0xf] %vm744_vm0, %v858_v15  ;;  %v859_v23 = vpack.c.bf16 %v677_v16, %v677_v16  ;;  %v561_v24 = vadd.f32 %v922_v17, %v1285_v2  ;;  %v925_v25 = vadd.f32 %v924_v22, %v923_v19  ;;  %v988_v26 = vpop.f32.mrb[31].mxu1 }
 0x133   :  { %v989_v27 = vadd.f32 %v988_v26, %v987_v21 }
 0x134   :  { %758 = vst.msk [vmem:[%s1370_s3 + $0x34] sm:$0xf] %vm744_vm0, %v859_v23  ;;  %v658_v28 = vadd.f32 %v986_v20, %v561_v24  ;;  %v564_v29 = vadd.f32 %v925_v25, %v1285_v2 }
 0x136   :  { %v678_v30 = vmax.f32 %v658_v28, 0.0  ;;  %v661_v31 = vadd.f32 %v989_v27, %v564_v29 }
 0x138   :  { %v860_v32 = vpack.c.bf16 %v678_v30, %v678_v30  ;;  %v679_v33 = vmax.f32 %v661_v31, 0.0 }
 0x13a   :  { %759 = vst.msk [vmem:[%s1370_s3 + $0x38] sm:$0xf] %vm744_vm0, %v860_v32  ;;  %v861_v34 = vpack.c.bf16 %v679_v33, %v679_v33 }
 0x13c   :  { %760 = vst.msk [vmem:[%s1370_s3 + $0x3c] sm:$0xf] %vm744_vm0, %v861_v34 }

// kernel: pose_exp_net_forward.10
= control target key start
LH: loop header
LB: loop body
LE: loop exit
PB: predicated region body
PF: predicated region fallthrough
CT: control target
= control target key end

     0   :  { %vm372_vm0 = vcmask 519168   ;;  %s639_s1 = inlined_call_operand.vmem [shape: bf16[384,64], index: 1, kind: input, shape index: {}]   ;;  %s640_s0 = inlined_call_operand.vmem [shape: bf16[32,384], index: 0, kind: input, shape index: {}]   ;;  %s641_s2 = inlined_call_operand.vmem [shape: f32[1,64], index: 2, kind: input, shape index: {}]   ;;  %s642_s3 = inlined_call_operand.vmem [shape: bf16[32,64], index: 3, kind: output, shape index: {}]  }
   0x1   :  { %v478_v0 = vld [vmem:[%s639_s1 + $0x40] sm:$0xff]   ;;  %v480_v2 = vld [vmem:[%s639_s1 + $0x48] sm:$0xff]   ;;  %v483_v5 = vld [vmem:[%s639_s1 + $0x50] sm:$0xff]  }
   0x2   :  { %v479_v1 = vld [vmem:[%s639_s1] sm:$0xff]   ;;  %420 = vmatprep.subr.bf16.mxu0 %v478_v0  ;;  %v482_v4 = vld [vmem:[%s639_s1 + $0x8] sm:$0xff]   ;;  %v485_v7 = vld [vmem:[%s639_s1 + $0x10] sm:$0xff]  }
   0x3   :  { %421 = vmatpush3.bf16.msra.mxu0 %v479_v1  ;;  %v481_v3 = vld [vmem:[%s639_s1 + $0x80] sm:$0xff]   ;;  %v484_v6 = vld [vmem:[%s639_s1 + $0x88] sm:$0xff]   ;;  %v486_v8 = vld [vmem:[%s639_s1 + $0x58] sm:$0xff]  }
   0x4   :  { %422 = vmatprep.subr.bf16.mxu0 %v480_v2  ;;  %458 = vmatprep.subr.bf16.mxu1 %v481_v3  ;;  %v487_v9 = vld [vmem:[%s639_s1 + $0x90] sm:$0xff]   ;;  %v488_v10 = vld [vmem:[%s639_s1 + $0x18] sm:$0xff]   ;;  %v489_v11 = vld [vmem:[%s639_s1 + $0x60] sm:$0xff]  }
   0x5   :  { %459 = vmatpush3.bf16.msra.mxu1 %v481_v3  ;;  %v490_v12 = vld [vmem:[%s639_s1 + $0x98] sm:$0xff]   ;;  %v491_v13 = vld [vmem:[%s639_s1 + $0x20] sm:$0xff]   ;;  %v492_v15 = vld [vmem:[%s639_s1 + $0x68] sm:$0xff]  }
   0x6   :  { %460 = vmatprep.subr.bf16.mxu1 %v484_v6  ;;  %v493_v14 = vld [vmem:[%s639_s1 + $0xa0] sm:$0xff]   ;;  %v494_v16 = vld [vmem:[%s639_s1 + $0x28] sm:$0xff]   ;;  %v495_v18 = vld [vmem:[%s639_s1 + $0x70] sm:$0xff]  }
   0x7   :  { %423 = vmatpush3.bf16.msra.mxu0 %v482_v4  ;;  %v496_v17 = vld [vmem:[%s639_s1 + $0xa8] sm:$0xff]   ;;  %v497_v19 = vld [vmem:[%s639_s1 + $0x30] sm:$0xff]   ;;  %v498_v20 = vld [vmem:[%s639_s1 + $0x78] sm:$0xff]  }
   0x8   :  { %424 = vmatprep.subr.bf16.mxu0 %v483_v5  ;;  %v499_v21 = vld [vmem:[%s639_s1 + $0xb0] sm:$0xff]   ;;  %v500_v23 = vld [vmem:[%s639_s1 + $0x38] sm:$0xff]   ;;  %v501_v26 = vld [vmem:[%s640_s0] ss:$12 sps:$4 sm:$0xff]  }
   0x9   :  { %461 = vmatpush3.bf16.msra.mxu1 %v484_v6  ;;  %v503_v22 = vld [vmem:[%s640_s0 + $0x4] ss:$12 sps:$4 sm:$0xff]   ;;  %v505_v24 = vld [vmem:[%s640_s0 + $0x8] ss:$12 sps:$4 sm:$0xff]   ;;  %v504_v25 = vld [vmem:[%s639_s1 + $0xb8] sm:$0xff]  }
   0xa   :  { %462 = vmatprep.subr.bf16.mxu1 %v487_v9  ;;  %286 = vmatprep.mubr.bf16.mxu0 %v503_v22  ;;  %v507_v27 = vld [vmem:[%s640_s0 + $0x1c] ss:$12 sps:$4 sm:$0xff]   ;;  %v506_v28 = vld [vmem:[%s640_s0 + $0x20] ss:$12 sps:$4 sm:$0xff]   ;;  %v509_v29 = vld [vmem:[%s640_s0 + $0x18] ss:$12 sps:$4 sm:$0xff]  }
   0xb   :  { %425 = vmatpush3.bf16.msra.mxu0 %v485_v7  ;;  %474 = vmatprep.mubr.bf16.mxu1 %v505_v24  ;;  %v381_v32 = vld [vmem:[%s641_s2] ss:$0 sm:$0xff] }
   0xc   :  { %426 = vmatprep.subr.bf16.mxu0 %v486_v8 }
   0xd   :  { %463 = vmatpush3.bf16.msra.mxu1 %v487_v9 }
   0xe   :  { %464 = vmatprep.subr.bf16.mxu1 %v490_v12 }
   0xf   :  { %427 = vmatpush3.bf16.msra.mxu0 %v488_v10 }
  0x10   :  { %428 = vmatprep.subr.bf16.mxu0 %v489_v11 }
  0x11   :  { %465 = vmatpush3.bf16.msra.mxu1 %v490_v12 }
  0x12   :  { %466 = vmatprep.subr.bf16.mxu1 %v493_v14 }
  0x13   :  { %429 = vmatpush3.bf16.msra.mxu0 %v491_v13 }
  0x14   :  { %430 = vmatprep.subr.bf16.mxu0 %v492_v15 }
  0x15   :  { %467 = vmatpush3.bf16.msra.mxu1 %v493_v14 }
  0x16   :  { %468 = vmatprep.subr.bf16.mxu1 %v496_v17 }
  0x17   :  { %431 = vmatpush3.bf16.msra.mxu0 %v494_v16 }
  0x18   :  { %432 = vmatprep.subr.bf16.mxu0 %v495_v18 }
  0x19   :  { %469 = vmatpush3.bf16.msra.mxu1 %v496_v17 }
  0x1a   :  { %470 = vmatprep.subr.bf16.mxu1 %v499_v21 }
  0x1b   :  { %433 = vmatpush3.bf16.msra.mxu0 %v497_v19 }
  0x1c   :  { %434 = vmatprep.subr.bf16.mxu0 %v498_v20 }
  0x1d   :  { %471 = vmatpush3.bf16.msra.mxu1 %v499_v21 }
  0x1e   :  { %472 = vmatprep.subr.bf16.mxu1 %v504_v25 }
  0x1f   :  { %435 = vmatpush3.bf16.msra.mxu0 %v500_v23 }
  0x21   :  { %473 = vmatpush3.bf16.msra.mxu1 %v504_v25 }
  0x22   :  { %287 = vmatmul.mubr.bf16.vlgmr.msra.gmra.mrb[0].mxu0 %v501_v26 }
  0x23   :  { %294 = vmatprep.mubr.bf16.mxu0 %v507_v27 }
  0x24   :  { %475 = vmatmul.mubr.bf16.vlgmr.msra.gmra.mrb[0].mxu1 %v506_v28 }
  0x2a   :  { %295 = vmatmul.mubr.bf16.gmra.mrb[4].mxu0 %v509_v29 }
  0xf5   :  { %v436_v30 = vpop.f32.mrb[0].mxu0 }
  0xf6   :  { %v437_v31 = vpop.f32.mrb[1].mxu0 }
  0xf7   :  { %v438_v33 = vadd.f32 %v437_v31, %v436_v30  ;;  %v439_v34 = vpop.f32.mrb[2].mxu0  ;;  %v476_v36 = vpop.f32.mrb[0].mxu1 }
  0xf8   :  { %v440_v35 = vpop.f32.mrb[3].mxu0  ;;  %v337_v39 = vpop.f32.mrb[1].mxu1 }
  0xf9   :  { %v441_v37 = vadd.f32 %v440_v35, %v439_v34  ;;  %v289_v38 = vadd.f32 %v438_v33, %v381_v32  ;;  %v477_v40 = vpop.f32.mrb[2].mxu1 }
  0xfa   :  { %v340_v43 = vpop.f32.mrb[3].mxu1 }
  0xfb   :  { %v338_v41 = vadd.f32 %v337_v39, %v289_v38  ;;  %v292_v42 = vadd.f32 %v441_v37, %v381_v32 }
  0xfd   :  { %v352_v44 = vmax.f32 %v338_v41, 0.0  ;;  %v341_v45 = vadd.f32 %v340_v43, %v292_v42  ;;  %v442_v46 = vpop.f32.mrb[4].mxu0 }
  0xfe   :  { %v443_v47 = vpop.f32.mrb[5].mxu0 }
  0xff   :  { %v416_v48 = vpack.c.bf16 %v352_v44, %v352_v44  ;;  %v353_v49 = vmax.f32 %v341_v45, 0.0  ;;  %v444_v50 = vadd.f32 %v443_v47, %v442_v46  ;;  %v445_v51 = vpop.f32.mrb[6].mxu0 }
 0x100   :  { %v446_v52 = vpop.f32.mrb[7].mxu0 }
 0x101   :  { %373 = vst.msk [vmem:[%s642_s3] sm:$0xf] %vm372_vm0, %v416_v48  ;;  %v417_v53 = vpack.c.bf16 %v353_v49, %v353_v49  ;;  %v297_v54 = vadd.f32 %v444_v50, %v381_v32  ;;  %v447_v55 = vadd.f32 %v446_v52, %v445_v51 }
 0x103   :  { %374 = vst.msk [vmem:[%s642_s3 + $0x4] sm:$0xf] %vm372_vm0, %v417_v53  ;;  %v346_v56 = vadd.f32 %v476_v36, %v297_v54  ;;  %v300_v57 = vadd.f32 %v447_v55, %v381_v32 }
 0x105   :  { %v354_v58 = vmax.f32 %v346_v56, 0.0  ;;  %v349_v59 = vadd.f32 %v477_v40, %v300_v57 }
 0x107   :  { %v418_v60 = vpack.c.bf16 %v354_v58, %v354_v58  ;;  %v355_v61 = vmax.f32 %v349_v59, 0.0 }
 0x109   :  { %375 = vst.msk [vmem:[%s642_s3 + $0x8] sm:$0xf] %vm372_vm0, %v418_v60  ;;  %v419_v62 = vpack.c.bf16 %v355_v61, %v355_v61 }
 0x10b   :  { %376 = vst.msk [vmem:[%s642_s3 + $0xc] sm:$0xf] %vm372_vm0, %v419_v62 }

// kernel: pose_exp_net_forward.11
= control target key start
LH: loop header
LB: loop body
LE: loop exit
PB: predicated region body
PF: predicated region fallthrough
CT: control target
= control target key end

     0   :  { %v690_v33 = vmov 0.0   ;;  %vm691_vm0 = vmmov 0   ;;  %s853_s1 = inlined_call_operand.vmem [shape: bf16[640,128], index: 1, kind: input, shape index: {}]   ;;  %s854_s0 = inlined_call_operand.vmem [shape: bf16[16,640], index: 0, kind: input, shape index: {}]   ;;  %s855_s2 = inlined_call_operand.vmem [shape: f32[1,128], index: 2, kind: input, shape index: {}]   ;;  %s856_s3 = inlined_call_operand.vmem [shape: bf16[16,128], index: 3, kind: output, shape index: {}]  }
   0x1   :  { %v643_v0 = vld [vmem:[%s853_s1 + $0x40] sm:$0xff]   ;;  %v647_v4 = vld [vmem:[%s853_s1 + $0x48] sm:$0xff]   ;;  %v651_v8 = vld [vmem:[%s853_s1 + $0x50] sm:$0xff]  }
   0x2   :  { %v644_v1 = vld [vmem:[%s853_s1] sm:$0xff]   ;;  %568 = vmatprep.subr.bf16.mxu0 %v643_v0  ;;  %v648_v5 = vld [vmem:[%s853_s1 + $0x8] sm:$0xff]   ;;  %v652_v9 = vld [vmem:[%s853_s1 + $0x10] sm:$0xff]  }
   0x3   :  { %v645_v2 = vld [vmem:[%s853_s1 + $0xc0] sm:$0xff]   ;;  %569 = vmatpush3.bf16.msra.mxu0 %v644_v1  ;;  %v649_v6 = vld [vmem:[%s853_s1 + $0xc8] sm:$0xff]   ;;  %v653_v10 = vld [vmem:[%s853_s1 + $0xd0] sm:$0xff]  }
   0x4   :  { %v646_v3 = vld [vmem:[%s853_s1 + $0x80] sm:$0xff]   ;;  %590 = vmatprep.subr.bf16.mxu1 %v645_v2  ;;  %570 = vmatprep.subr.bf16.mxu0 %v647_v4  ;;  %v650_v7 = vld [vmem:[%s853_s1 + $0x88] sm:$0xff]   ;;  %v654_v11 = vld [vmem:[%s853_s1 + $0x90] sm:$0xff]  }
   0x5   :  { %591 = vmatpush3.bf16.msra.mxu1 %v646_v3  ;;  %v655_v12 = vld [vmem:[%s853_s1 + $0x58] sm:$0xff]   ;;  %v659_v16 = vld [vmem:[%s853_s1 + $0x60] sm:$0xff]   ;;  %v663_v20 = vld [vmem:[%s853_s1 + $0x68] sm:$0xff]  }
   0x6   :  { %592 = vmatprep.subr.bf16.mxu1 %v649_v6  ;;  %v656_v13 = vld [vmem:[%s853_s1 + $0x18] sm:$0xff]   ;;  %v660_v17 = vld [vmem:[%s853_s1 + $0x20] sm:$0xff]   ;;  %v664_v21 = vld [vmem:[%s853_s1 + $0x28] sm:$0xff]  }
   0x7   :  { %571 = vmatpush3.bf16.msra.mxu0 %v648_v5  ;;  %v657_v14 = vld [vmem:[%s853_s1 + $0xd8] sm:$0xff]   ;;  %v661_v18 = vld [vmem:[%s853_s1 + $0xe0] sm:$0xff]   ;;  %v665_v22 = vld [vmem:[%s853_s1 + $0xe8] sm:$0xff]  }
   0x8   :  { %572 = vmatprep.subr.bf16.mxu0 %v651_v8  ;;  %v658_v15 = vld [vmem:[%s853_s1 + $0x98] sm:$0xff]   ;;  %v662_v19 = vld [vmem:[%s853_s1 + $0xa0] sm:$0xff]   ;;  %v666_v23 = vld [vmem:[%s853_s1 + $0xa8] sm:$0xff]  }
   0x9   :  { %593 = vmatpush3.bf16.msra.mxu1 %v650_v7  ;;  %v667_v24 = vld [vmem:[%s853_s1 + $0x70] sm:$0xff]   ;;  %v671_v28 = vld [vmem:[%s853_s1 + $0x78] sm:$0xff]   ;;  %v680_v36 = vld [vmem:[%s854_s0 + $0xc] ss:$20 sps:$4 sm:$0xff]  }
   0xa   :  { %594 = vmatprep.subr.bf16.mxu1 %v653_v10  ;;  %v668_v25 = vld [vmem:[%s853_s1 + $0x30] sm:$0xff]   ;;  %v672_v29 = vld [vmem:[%s853_s1 + $0x38] sm:$0xff]   ;;  %v681_v37 = vld [vmem:[%s853_s1 + $0x100] sm:$0xff]   ;;  %447 = vmatprep.mubr.bf16.mxu1 %v680_v36 }
   0xb   :  { %573 = vmatpush3.bf16.msra.mxu0 %v652_v9  ;;  %v669_v26 = vld [vmem:[%s853_s1 + $0xf0] sm:$0xff]   ;;  %v673_v30 = vld [vmem:[%s853_s1 + $0xf8] sm:$0xff]   ;;  %v682_v38 = vld [vmem:[%s853_s1 + $0x108] sm:$0xff]  }
   0xc   :  { %574 = vmatprep.subr.bf16.mxu0 %v655_v12  ;;  %v670_v27 = vld [vmem:[%s853_s1 + $0xb0] sm:$0xff]   ;;  %v676_v32 = vld [vmem:[%s854_s0 + $0x4] ss:$20 sps:$4 sm:$0xff]   ;;  %v678_v35 = vld [vmem:[%s854_s0 + $0x8] ss:$20 sps:$4 sm:$0xff]  }
   0xd   :  { %595 = vmatpush3.bf16.msra.mxu1 %v654_v11  ;;  %v674_v31 = vld [vmem:[%s854_s0] ss:$20 sps:$4 sm:$0xff]   ;;  %v677_v34 = vld [vmem:[%s853_s1 + $0xb8] sm:$0xff]   ;;  %406 = vmatprep.mubr.bf16.mxu0 %v676_v32  ;;  %v686_v42 = vld [vmem:[%s853_s1 + $0x128] sm:$0xff]  }
   0xe   :  { %596 = vmatprep.subr.bf16.mxu1 %v657_v14  ;;  %v683_v39 = vld [vmem:[%s853_s1 + $0x110] sm:$0xff]   ;;  %v684_v40 = vld [vmem:[%s853_s1 + $0x118] sm:$0xff]   ;;  %v685_v41 = vld [vmem:[%s853_s1 + $0x120] sm:$0xff]  }
   0xf   :  { %575 = vmatpush3.bf16.msra.mxu0 %v656_v13  ;;  %v687_v43 = vld [vmem:[%s853_s1 + $0x130] sm:$0xff]   ;;  %v688_v44 = vld [vmem:[%s853_s1 + $0x138] sm:$0xff]   ;;  %v513_v47 = vld [vmem:[%s855_s2] ss:$0 sm:$0xff] }
  0x10   :  { %576 = vmatprep.subr.bf16.mxu0 %v659_v16  ;;  %v689_v45 = vld [vmem:[%s854_s0 + $0x10] ss:$20 sps:$4 sm:$0xff]  }
  0x11   :  { %597 = vmatpush3.bf16.msra.mxu1 %v658_v15 }
  0x12   :  { %598 = vmatprep.subr.bf16.mxu1 %v661_v18 }
  0x13   :  { %577 = vmatpush3.bf16.msra.mxu0 %v660_v17 }
  0x14   :  { %578 = vmatprep.subr.bf16.mxu0 %v663_v20 }
  0x15   :  { %599 = vmatpush3.bf16.msra.mxu1 %v662_v19 }
  0x16   :  { %600 = vmatprep.subr.bf16.mxu1 %v665_v22 }
  0x17   :  { %579 = vmatpush3.bf16.msra.mxu0 %v664_v21 }
  0x18   :  { %580 = vmatprep.subr.bf16.mxu0 %v667_v24 }
  0x19   :  { %601 = vmatpush3.bf16.msra.mxu1 %v666_v23 }
  0x1a   :  { %602 = vmatprep.subr.bf16.mxu1 %v669_v26 }
  0x1b   :  { %581 = vmatpush3.bf16.msra.mxu0 %v668_v25 }
  0x1c   :  { %582 = vmatprep.subr.bf16.mxu0 %v671_v28 }
  0x1d   :  { %603 = vmatpush3.bf16.msra.mxu1 %v670_v27 }
  0x1e   :  { %604 = vmatprep.subr.bf16.mxu1 %v673_v30 }
  0x1f   :  { %583 = vmatpush3.bf16.msra.mxu0 %v672_v29 }
  0x20   :  { %621 = vmatprep.subr.bf16.mxu0 %v690_v33 }
  0x21   :  { %605 = vmatpush3.bf16.msra.mxu1 %v677_v34 }
  0x22   :  { %407 = vmatmul.mubr.bf16.vlgmr.msra.gmra.mrb[0].mxu0 %v674_v31 }
  0x23   :  { %637 = vmatprep.mubr.msk.bf16.mxu0 %vm691_vm0, %v690_v33  ;;  %622 = vmatpush3.bf16.msra.mxu0 %v681_v37 }
  0x24   :  { %448 = vmatmul.mubr.bf16.vlgmr.msra.gmra.mrb[0].mxu1 %v678_v35  ;;  %623 = vmatprep.subr.bf16.mxu0 %v690_v33 }
  0x27   :  { %624 = vmatpush3.bf16.msra.mxu0 %v682_v38 }
  0x28   :  { %625 = vmatprep.subr.bf16.mxu0 %v690_v33 }
  0x2b   :  { %626 = vmatpush3.bf16.msra.mxu0 %v683_v39 }
  0x2c   :  { %627 = vmatprep.subr.bf16.mxu0 %v690_v33 }
  0x2f   :  { %628 = vmatpush3.bf16.msra.mxu0 %v684_v40 }
  0x30   :  { %629 = vmatprep.subr.bf16.mxu0 %v690_v33 }
  0x33   :  { %630 = vmatpush3.bf16.msra.mxu0 %v685_v41 }
  0x34   :  { %631 = vmatprep.subr.bf16.mxu0 %v690_v33 }
  0x37   :  { %632 = vmatpush3.bf16.msra.mxu0 %v686_v42 }
  0x38   :  { %633 = vmatprep.subr.bf16.mxu0 %v690_v33 }
  0x3b   :  { %634 = vmatpush3.bf16.msra.mxu0 %v687_v43 }
  0x3c   :  { %635 = vmatprep.subr.bf16.mxu0 %v690_v33 }
  0x3f   :  { %636 = vmatpush3.bf16.msra.mxu0 %v688_v44 }
  0x42   :  { %638 = vmatmul.mubr.bf16.vlgmr.msra.gmra.mrb[4].mxu0 %v689_v45 }
  0xf5   :  { %v584_v46 = vpop.f32.mrb[0].mxu0 }
  0xf6   :  { %v585_v48 = vpop.f32.mrb[1].mxu0 }
  0xf7   :  { %v586_v49 = vadd.f32 %v585_v48, %v584_v46  ;;  %v587_v50 = vpop.f32.mrb[2].mxu0  ;;  %v606_v51 = vpop.f32.mrb[0].mxu1 }
  0xf8   :  { %v588_v52 = vpop.f32.mrb[3].mxu0  ;;  %v607_v55 = vpop.f32.mrb[1].mxu1 }
  0xf9   :  { %v409_v53 = vadd.f32 %v586_v49, %v513_v47  ;;  %v589_v54 = vadd.f32 %v588_v52, %v587_v50  ;;  %v608_v56 = vadd.f32 %v607_v55, %v606_v51  ;;  %v609_v57 = vpop.f32.mrb[2].mxu1 }
  0xfa   :  { %v610_v59 = vpop.f32.mrb[3].mxu1 }
  0xfb   :  { %v412_v58 = vadd.f32 %v589_v54, %v513_v47  ;;  %v611_v60 = vadd.f32 %v610_v59, %v609_v57  ;;  %v450_v61 = vadd.f32 %v608_v56, %v409_v53 }
  0xfd   :  { %v453_v62 = vadd.f32 %v611_v60, %v412_v58 }
 0x115   :  { %v490_v63 = vpop.f32.mrb[4].mxu0 }
 0x116   :  { %v491_v0 = vadd.f32 %v490_v63, %v450_v61  ;;  %v639_v1 = vpop.f32.mrb[5].mxu0 }
 0x117   :  { %v493_v2 = vpop.f32.mrb[6].mxu0 }
 0x118   :  { %v494_v3 = vadd.f32 %v493_v2, %v453_v62  ;;  %v640_v4 = vpop.f32.mrb[7].mxu0  ;;  %v497_v5 = vmax.f32 %v491_v0, 0.0 }
 0x11a   :  { %v498_v6 = vmax.f32 %v494_v3, 0.0 }
 0x11c   :  { %v566_v7 = vpack.c.bf16 %v498_v6, %v497_v5 }
 0x11e   :  { %567 = vst [vmem:[%s856_s3] sm:$0xff] %v566_v7  }

// kernel: pose_exp_net_forward.12
= control target key start
LH: loop header
LB: loop body
LE: loop exit
PB: predicated region body
PF: predicated region fallthrough
CT: control target
= control target key end

     0   :  { %s2080_s1 = inlined_call_operand.vmem [shape: bf16[1152,256], index: 1, kind: input, shape index: {}]   ;;  %s2081_s0 = inlined_call_operand.vmem [shape: bf16[16,1152], index: 0, kind: input, shape index: {}]   ;;  %s2082_s2 = inlined_call_operand.vmem [shape: f32[1,256], index: 2, kind: input, shape index: {}]   ;;  %s2083_s3 = inlined_call_operand.vmem [shape: bf16[16,256], index: 3, kind: output, shape index: {}]  }
   0x1   :  { %v1362_v0 = vld [vmem:[%s2080_s1 + $0x4] ss:$8 sps:$4 sm:$0xff]   ;;  %v1366_v2 = vld [vmem:[%s2080_s1] ss:$8 sps:$4 sm:$0xff]   ;;  %v1368_v4 = vld [vmem:[%s2080_s1 + $0x14] ss:$8 sps:$4 sm:$0xff]  }
   0x2   :  { %v1364_v1 = vld [vmem:[%s2080_s1 + $0x204] ss:$8 sps:$4 sm:$0xff]   ;;  %947 = vmatprep.subr.bf16.mxu1 %v1362_v0  ;;  %v1367_v3 = vld [vmem:[%s2080_s1 + $0x200] ss:$8 sps:$4 sm:$0xff]   ;;  %v1370_v5 = vld [vmem:[%s2080_s1 + $0x214] ss:$8 sps:$4 sm:$0xff]  }
   0x3   :  { %1033 = vmatprep.subr.bf16.mxu0 %v1364_v1  ;;  %948 = vmatpush1.bf16.msra.mxu1 %v1366_v2  ;;  %v1372_v6 = vld [vmem:[%s2080_s1 + $0x10] ss:$8 sps:$4 sm:$0xff]   ;;  %v1374_v8 = vld [vmem:[%s2080_s1 + $0x24] ss:$8 sps:$4 sm:$0xff]   ;;  %v1378_v10 = vld [vmem:[%s2080_s1 + $0x20] ss:$8 sps:$4 sm:$0xff]  }
   0x4   :  { %1034 = vmatpush1.bf16.msra.mxu0 %v1367_v3  ;;  %949 = vmatprep.subr.bf16.mxu1 %v1368_v4  ;;  %v1373_v7 = vld [vmem:[%s2080_s1 + $0x210] ss:$8 sps:$4 sm:$0xff]   ;;  %v1376_v9 = vld [vmem:[%s2080_s1 + $0x224] ss:$8 sps:$4 sm:$0xff]   ;;  %v1379_v11 = vld [vmem:[%s2080_s1 + $0x220] ss:$8 sps:$4 sm:$0xff]  }
   0x5   :  { %1035 = vmatprep.subr.bf16.mxu0 %v1370_v5  ;;  %v1380_v12 = vld [vmem:[%s2080_s1 + $0x34] ss:$8 sps:$4 sm:$0xff]   ;;  %v1384_v14 = vld [vmem:[%s2080_s1 + $0x30] ss:$8 sps:$4 sm:$0xff]   ;;  %v1386_v16 = vld [vmem:[%s2080_s1 + $0x44] ss:$8 sps:$4 sm:$0xff]  }
   0x6   :  { %v1382_v13 = vld [vmem:[%s2080_s1 + $0x234] ss:$8 sps:$4 sm:$0xff]   ;;  %v1385_v15 = vld [vmem:[%s2080_s1 + $0x230] ss:$8 sps:$4 sm:$0xff]   ;;  %v1388_v17 = vld [vmem:[%s2080_s1 + $0x244] ss:$8 sps:$4 sm:$0xff]  }
   0x7   :  { %950 = vmatpush1.bf16.msra.mxu1 %v1372_v6  ;;  %v1390_v18 = vld [vmem:[%s2080_s1 + $0x40] ss:$8 sps:$4 sm:$0xff]   ;;  %v1392_v20 = vld [vmem:[%s2080_s1 + $0x54] ss:$8 sps:$4 sm:$0xff]   ;;  %v1396_v22 = vld [vmem:[%s2080_s1 + $0x50] ss:$8 sps:$4 sm:$0xff]  }
   0x8   :  { %1036 = vmatpush1.bf16.msra.mxu0 %v1373_v7  ;;  %951 = vmatprep.subr.bf16.mxu1 %v1374_v8  ;;  %v1391_v19 = vld [vmem:[%s2080_s1 + $0x240] ss:$8 sps:$4 sm:$0xff]   ;;  %v1394_v21 = vld [vmem:[%s2080_s1 + $0x254] ss:$8 sps:$4 sm:$0xff]   ;;  %v1397_v23 = vld [vmem:[%s2080_s1 + $0x250] ss:$8 sps:$4 sm:$0xff]  }
   0x9   :  { %1037 = vmatprep.subr.bf16.mxu0 %v1376_v9  ;;  %v1398_v24 = vld [vmem:[%s2080_s1 + $0x64] ss:$8 sps:$4 sm:$0xff]   ;;  %v1402_v26 = vld [vmem:[%s2080_s1 + $0x60] ss:$8 sps:$4 sm:$0xff]   ;;  %v1404_v28 = vld [vmem:[%s2080_s1 + $0x74] ss:$8 sps:$4 sm:$0xff]  }
   0xa   :  { %v1400_v25 = vld [vmem:[%s2080_s1 + $0x264] ss:$8 sps:$4 sm:$0xff]   ;;  %v1403_v27 = vld [vmem:[%s2080_s1 + $0x260] ss:$8 sps:$4 sm:$0xff]   ;;  %v1406_v29 = vld [vmem:[%s2080_s1 + $0x274] ss:$8 sps:$4 sm:$0xff]  }
   0xb   :  { %952 = vmatpush1.bf16.msra.mxu1 %v1378_v10  ;;  %v1408_v30 = vld [vmem:[%s2080_s1 + $0x70] ss:$8 sps:$4 sm:$0xff]   ;;  %v1410_v32 = vld [vmem:[%s2080_s1 + $0x84] ss:$8 sps:$4 sm:$0xff]   ;;  %v1414_v34 = vld [vmem:[%s2080_s1 + $0x80] ss:$8 sps:$4 sm:$0xff]  }
   0xc   :  { %1038 = vmatpush1.bf16.msra.mxu0 %v1379_v11  ;;  %953 = vmatprep.subr.bf16.mxu1 %v1380_v12  ;;  %v1409_v31 = vld [vmem:[%s2080_s1 + $0x270] ss:$8 sps:$4 sm:$0xff]   ;;  %v1412_v33 = vld [vmem:[%s2080_s1 + $0x284] ss:$8 sps:$4 sm:$0xff]   ;;  %v1415_v35 = vld [vmem:[%s2080_s1 + $0x280] ss:$8 sps:$4 sm:$0xff]  }
   0xd   :  { %1039 = vmatprep.subr.bf16.mxu0 %v1382_v13  ;;  %v1416_v36 = vld [vmem:[%s2080_s1 + $0x94] ss:$8 sps:$4 sm:$0xff]   ;;  %v1420_v38 = vld [vmem:[%s2080_s1 + $0x90] ss:$8 sps:$4 sm:$0xff]   ;;  %v1422_v40 = vld [vmem:[%s2080_s1 + $0xa4] ss:$8 sps:$4 sm:$0xff]  }
   0xe   :  { %v1418_v37 = vld [vmem:[%s2080_s1 + $0x294] ss:$8 sps:$4 sm:$0xff]   ;;  %v1421_v39 = vld [vmem:[%s2080_s1 + $0x290] ss:$8 sps:$4 sm:$0xff]   ;;  %v1424_v41 = vld [vmem:[%s2080_s1 + $0x2a4] ss:$8 sps:$4 sm:$0xff]  }
   0xf   :  { %954 = vmatpush1.bf16.msra.mxu1 %v1384_v14  ;;  %v1426_v42 = vld [vmem:[%s2080_s1 + $0xa0] ss:$8 sps:$4 sm:$0xff]   ;;  %v1428_v44 = vld [vmem:[%s2080_s1 + $0xb4] ss:$8 sps:$4 sm:$0xff]   ;;  %v1432_v46 = vld [vmem:[%s2080_s1 + $0xb0] ss:$8 sps:$4 sm:$0xff]  }
  0x10   :  { %1040 = vmatpush1.bf16.msra.mxu0 %v1385_v15  ;;  %955 = vmatprep.subr.bf16.mxu1 %v1386_v16  ;;  %v1427_v43 = vld [vmem:[%s2080_s1 + $0x2a0] ss:$8 sps:$4 sm:$0xff]   ;;  %v1430_v45 = vld [vmem:[%s2080_s1 + $0x2b4] ss:$8 sps:$4 sm:$0xff]   ;;  %v1433_v47 = vld [vmem:[%s2080_s1 + $0x2b0] ss:$8 sps:$4 sm:$0xff]  }
  0x11   :  { %1041 = vmatprep.subr.bf16.mxu0 %v1388_v17  ;;  %v1460_v48 = vld [vmem:[%s2081_s0 + $0x4] ss:$36 sps:$4 sm:$0xff]   ;;  %v1466_v51 = vld [vmem:[%s2081_s0 + $0x14] ss:$36 sps:$4 sm:$0xff]  }
  0x12   :  { %v1434_v49 = vld [vmem:[%s2080_s1 + $0xc4] ss:$8 sps:$4 sm:$0xff]   ;;  %979 = vmatprep.mubr.bf16.mxu1 %v1460_v48  ;;  %v1438_v52 = vld [vmem:[%s2080_s1 + $0xc0] ss:$8 sps:$4 sm:$0xff]   ;;  %v1440_v54 = vld [vmem:[%s2080_s1 + $0xd4] ss:$8 sps:$4 sm:$0xff]   ;;  %1065 = vmatprep.mubr.bf16.mxu0 %v1466_v51 }
  0x13   :  { %956 = vmatpush1.bf16.msra.mxu1 %v1390_v18  ;;  %v1436_v50 = vld [vmem:[%s2080_s1 + $0x2c4] ss:$8 sps:$4 sm:$0xff]   ;;  %v1439_v53 = vld [vmem:[%s2080_s1 + $0x2c0] ss:$8 sps:$4 sm:$0xff]   ;;  %v1442_v55 = vld [vmem:[%s2080_s1 + $0x2d4] ss:$8 sps:$4 sm:$0xff]  }
  0x14   :  { %1042 = vmatpush1.bf16.msra.mxu0 %v1391_v19  ;;  %957 = vmatprep.subr.bf16.mxu1 %v1392_v20  ;;  %v1444_v56 = vld [vmem:[%s2080_s1 + $0xd0] ss:$8 sps:$4 sm:$0xff]   ;;  %v1446_v58 = vld [vmem:[%s2080_s1 + $0xe4] ss:$8 sps:$4 sm:$0xff]   ;;  %v1450_v60 = vld [vmem:[%s2080_s1 + $0xe0] ss:$8 sps:$4 sm:$0xff]  }
  0x15   :  { %1043 = vmatprep.subr.bf16.mxu0 %v1394_v21  ;;  %v1445_v57 = vld [vmem:[%s2080_s1 + $0x2d0] ss:$8 sps:$4 sm:$0xff]   ;;  %v1448_v59 = vld [vmem:[%s2080_s1 + $0x2e4] ss:$8 sps:$4 sm:$0xff]   ;;  %v1451_v61 = vld [vmem:[%s2080_s1 + $0x2e0] ss:$8 sps:$4 sm:$0xff]  }
  0x16   :  { %v1452_v62 = vld [vmem:[%s2080_s1 + $0xf4] ss:$8 sps:$4 sm:$0xff]   ;;  %v1456_v0 = vld [vmem:[%s2080_s1 + $0xf0] ss:$8 sps:$4 sm:$0xff]   ;;  %v1463_v2 = vld [vmem:[%s2080_s1 + $0x104] ss:$8 sps:$4 sm:$0xff]  }
  0x17   :  { %958 = vmatpush1.bf16.msra.mxu1 %v1396_v22  ;;  %v1454_v63 = vld [vmem:[%s2080_s1 + $0x2f4] ss:$8 sps:$4 sm:$0xff]   ;;  %v1457_v1 = vld [vmem:[%s2080_s1 + $0x2f0] ss:$8 sps:$4 sm:$0xff]   ;;  %v1469_v3 = vld [vmem:[%s2080_s1 + $0x304] ss:$8 sps:$4 sm:$0xff]  }
  0x18   :  { %1044 = vmatpush1.bf16.msra.mxu0 %v1397_v23  ;;  %959 = vmatprep.subr.bf16.mxu1 %v1398_v24  ;;  %v1458_v4 = vld [vmem:[%s2081_s0] ss:$36 sps:$4 sm:$0xff]   ;;  %v1464_v6 = vld [vmem:[%s2081_s0 + $0x10] ss:$36 sps:$4 sm:$0xff]  }
  0x19   :  { %1045 = vmatprep.subr.bf16.mxu0 %v1400_v25  ;;  %v1461_v5 = vld [vmem:[%s2080_s1 + $0x100] ss:$8 sps:$4 sm:$0xff]   ;;  %v1472_v8 = vld [vmem:[%s2080_s1 + $0x114] ss:$8 sps:$4 sm:$0xff]   ;;  %v1470_v10 = vld [vmem:[%s2080_s1 + $0x110] ss:$8 sps:$4 sm:$0xff]  }
  0x1a   :  { %v1467_v7 = vld [vmem:[%s2080_s1 + $0x300] ss:$8 sps:$4 sm:$0xff]   ;;  %v1475_v9 = vld [vmem:[%s2080_s1 + $0x314] ss:$8 sps:$4 sm:$0xff]   ;;  %v1473_v11 = vld [vmem:[%s2080_s1 + $0x310] ss:$8 sps:$4 sm:$0xff]  }
  0x1b   :  { %960 = vmatpush1.bf16.msra.mxu1 %v1402_v26  ;;  %v1478_v12 = vld [vmem:[%s2080_s1 + $0x124] ss:$8 sps:$4 sm:$0xff]   ;;  %v1476_v14 = vld [vmem:[%s2080_s1 + $0x120] ss:$8 sps:$4 sm:$0xff]   ;;  %v1484_v16 = vld [vmem:[%s2080_s1 + $0x134] ss:$8 sps:$4 sm:$0xff]  }
  0x1c   :  { %1046 = vmatpush1.bf16.msra.mxu0 %v1403_v27  ;;  %961 = vmatprep.subr.bf16.mxu1 %v1404_v28  ;;  %v1481_v13 = vld [vmem:[%s2080_s1 + $0x324] ss:$8 sps:$4 sm:$0xff]   ;;  %v1479_v15 = vld [vmem:[%s2080_s1 + $0x320] ss:$8 sps:$4 sm:$0xff]   ;;  %v1487_v17 = vld [vmem:[%s2080_s1 + $0x334] ss:$8 sps:$4 sm:$0xff]  }
  0x1d   :  { %1047 = vmatprep.subr.bf16.mxu0 %v1406_v29  ;;  %v1482_v18 = vld [vmem:[%s2080_s1 + $0x130] ss:$8 sps:$4 sm:$0xff]   ;;  %v1490_v20 = vld [vmem:[%s2080_s1 + $0x144] ss:$8 sps:$4 sm:$0xff]   ;;  %v1488_v22 = vld [vmem:[%s2080_s1 + $0x140] ss:$8 sps:$4 sm:$0xff]  }
  0x1e   :  { %v1485_v19 = vld [vmem:[%s2080_s1 + $0x330] ss:$8 sps:$4 sm:$0xff]   ;;  %v1493_v21 = vld [vmem:[%s2080_s1 + $0x344] ss:$8 sps:$4 sm:$0xff]   ;;  %v1491_v23 = vld [vmem:[%s2080_s1 + $0x340] ss:$8 sps:$4 sm:$0xff]  }
  0x1f   :  { %962 = vmatpush1.bf16.msra.mxu1 %v1408_v30  ;;  %v1496_v24 = vld [vmem:[%s2080_s1 + $0x154] ss:$8 sps:$4 sm:$0xff]   ;;  %v1494_v26 = vld [vmem:[%s2080_s1 + $0x150] ss:$8 sps:$4 sm:$0xff]   ;;  %v1502_v28 = vld [vmem:[%s2080_s1 + $0x164] ss:$8 sps:$4 sm:$0xff]  }
  0x20   :  { %1048 = vmatpush1.bf16.msra.mxu0 %v1409_v31  ;;  %963 = vmatprep.subr.bf16.mxu1 %v1410_v32  ;;  %v1499_v25 = vld [vmem:[%s2080_s1 + $0x354] ss:$8 sps:$4 sm:$0xff]   ;;  %v1497_v27 = vld [vmem:[%s2080_s1 + $0x350] ss:$8 sps:$4 sm:$0xff]   ;;  %v1505_v29 = vld [vmem:[%s2080_s1 + $0x364] ss:$8 sps:$4 sm:$0xff]  }
  0x21   :  { %1049 = vmatprep.subr.bf16.mxu0 %v1412_v33  ;;  %v1500_v30 = vld [vmem:[%s2080_s1 + $0x160] ss:$8 sps:$4 sm:$0xff]   ;;  %v1508_v32 = vld [vmem:[%s2080_s1 + $0x174] ss:$8 sps:$4 sm:$0xff]  }
  0x22   :  { %v1503_v31 = vld [vmem:[%s2080_s1 + $0x360] ss:$8 sps:$4 sm:$0xff]   ;;  %v1511_v33 = vld [vmem:[%s2080_s1 + $0x374] ss:$8 sps:$4 sm:$0xff]  }
  0x23   :  { %964 = vmatpush1.bf16.msra.mxu1 %v1414_v34  ;;  %v1562_v34 = vld [vmem:[%s2081_s0 + $0xc] ss:$36 sps:$4 sm:$0xff]   ;;  %v1524_v48 = vld [vmem:[%s2080_s1 + $0x1a0] ss:$8 sps:$4 sm:$0xff]   ;;  %v1535_v51 = vld [vmem:[%s2080_s1 + $0x3b4] ss:$8 sps:$4 sm:$0xff]  }
  0x24   :  { %1050 = vmatpush1.bf16.msra.mxu0 %v1415_v35  ;;  %965 = vmatprep.subr.bf16.mxu1 %v1416_v36  ;;  %v1565_v35 = vld [vmem:[%s2081_s0 + $0x1c] ss:$36 sps:$4 sm:$0xff]   ;;  %v1506_v36 = vld [vmem:[%s2080_s1 + $0x170] ss:$8 sps:$4 sm:$0xff]  }
  0x25   :  { %1051 = vmatprep.subr.bf16.mxu0 %v1418_v37  ;;  %v1509_v37 = vld [vmem:[%s2080_s1 + $0x370] ss:$8 sps:$4 sm:$0xff]  }
  0x27   :  { %966 = vmatpush1.bf16.msra.mxu1 %v1420_v38  ;;  %v1514_v38 = vld [vmem:[%s2080_s1 + $0x184] ss:$8 sps:$4 sm:$0xff]  }
  0x28   :  { %1052 = vmatpush1.bf16.msra.mxu0 %v1421_v39  ;;  %967 = vmatprep.subr.bf16.mxu1 %v1422_v40  ;;  %v1517_v39 = vld [vmem:[%s2080_s1 + $0x384] ss:$8 sps:$4 sm:$0xff]   ;;  %v1512_v40 = vld [vmem:[%s2080_s1 + $0x180] ss:$8 sps:$4 sm:$0xff]  }
  0x29   :  { %1053 = vmatprep.subr.bf16.mxu0 %v1424_v41  ;;  %v1515_v41 = vld [vmem:[%s2080_s1 + $0x380] ss:$8 sps:$4 sm:$0xff]  }
  0x2b   :  { %968 = vmatpush1.bf16.msra.mxu1 %v1426_v42  ;;  %v1520_v42 = vld [vmem:[%s2080_s1 + $0x194] ss:$8 sps:$4 sm:$0xff]  }
  0x2c   :  { %1054 = vmatpush1.bf16.msra.mxu0 %v1427_v43  ;;  %969 = vmatprep.subr.bf16.mxu1 %v1428_v44  ;;  %v1523_v43 = vld [vmem:[%s2080_s1 + $0x394] ss:$8 sps:$4 sm:$0xff]   ;;  %v1518_v44 = vld [vmem:[%s2080_s1 + $0x190] ss:$8 sps:$4 sm:$0xff]  }
  0x2d   :  { %1055 = vmatprep.subr.bf16.mxu0 %v1430_v45  ;;  %v1521_v45 = vld [vmem:[%s2080_s1 + $0x390] ss:$8 sps:$4 sm:$0xff]  }
  0x2f   :  { %970 = vmatpush1.bf16.msra.mxu1 %v1432_v46  ;;  %v1526_v46 = vld [vmem:[%s2080_s1 + $0x1a4] ss:$8 sps:$4 sm:$0xff]  }
  0x30   :  { %1056 = vmatpush1.bf16.msra.mxu0 %v1433_v47  ;;  %971 = vmatprep.subr.bf16.mxu1 %v1434_v49  ;;  %v1529_v47 = vld [vmem:[%s2080_s1 + $0x3a4] ss:$8 sps:$4 sm:$0xff]   ;;  %v1527_v49 = vld [vmem:[%s2080_s1 + $0x3a0] ss:$8 sps:$4 sm:$0xff]  }
  0x31   :  { %1057 = vmatprep.subr.bf16.mxu0 %v1436_v50  ;;  %v1532_v50 = vld [vmem:[%s2080_s1 + $0x1b4] ss:$8 sps:$4 sm:$0xff]  }
  0x33   :  { %972 = vmatpush1.bf16.msra.mxu1 %v1438_v52  ;;  %v1530_v52 = vld [vmem:[%s2080_s1 + $0x1b0] ss:$8 sps:$4 sm:$0xff]  }
  0x34   :  { %1058 = vmatpush1.bf16.msra.mxu0 %v1439_v53  ;;  %973 = vmatprep.subr.bf16.mxu1 %v1440_v54  ;;  %v1533_v53 = vld [vmem:[%s2080_s1 + $0x3b0] ss:$8 sps:$4 sm:$0xff]   ;;  %v1538_v54 = vld [vmem:[%s2080_s1 + $0x1c4] ss:$8 sps:$4 sm:$0xff]  }
  0x35   :  { %1059 = vmatprep.subr.bf16.mxu0 %v1442_v55  ;;  %v1541_v55 = vld [vmem:[%s2080_s1 + $0x3c4] ss:$8 sps:$4 sm:$0xff]  }
  0x37   :  { %974 = vmatpush1.bf16.msra.mxu1 %v1444_v56  ;;  %v1536_v56 = vld [vmem:[%s2080_s1 + $0x1c0] ss:$8 sps:$4 sm:$0xff]  }
  0x38   :  { %1060 = vmatpush1.bf16.msra.mxu0 %v1445_v57  ;;  %975 = vmatprep.subr.bf16.mxu1 %v1446_v58  ;;  %v1539_v57 = vld [vmem:[%s2080_s1 + $0x3c0] ss:$8 sps:$4 sm:$0xff]   ;;  %v1544_v58 = vld [vmem:[%s2080_s1 + $0x1d4] ss:$8 sps:$4 sm:$0xff]  }
  0x39   :  { %1061 = vmatprep.subr.bf16.mxu0 %v1448_v59  ;;  %v1547_v59 = vld [vmem:[%s2080_s1 + $0x3d4] ss:$8 sps:$4 sm:$0xff]  }
  0x3b   :  { %976 = vmatpush1.bf16.msra.mxu1 %v1450_v60  ;;  %v1542_v60 = vld [vmem:[%s2080_s1 + $0x1d0] ss:$8 sps:$4 sm:$0xff]  }
  0x3c   :  { %1062 = vmatpush1.bf16.msra.mxu0 %v1451_v61  ;;  %977 = vmatprep.subr.bf16.mxu1 %v1452_v62  ;;  %v1545_v61 = vld [vmem:[%s2080_s1 + $0x3d0] ss:$8 sps:$4 sm:$0xff]   ;;  %v1550_v62 = vld [vmem:[%s2080_s1 + $0x1e4] ss:$8 sps:$4 sm:$0xff]  }
  0x3d   :  { %1063 = vmatprep.subr.bf16.mxu0 %v1454_v63  ;;  %v1553_v63 = vld [vmem:[%s2080_s1 + $0x3e4] ss:$8 sps:$4 sm:$0xff]  }
  0x3f   :  { %978 = vmatpush1.bf16.msra.mxu1 %v1456_v0  ;;  %v1548_v0 = vld [vmem:[%s2080_s1 + $0x1e0] ss:$8 sps:$4 sm:$0xff]  }
  0x40   :  { %1064 = vmatpush1.bf16.msra.mxu0 %v1457_v1  ;;  %990 = vmatprep.subr.bf16.mxu1 %v1463_v2  ;;  %v1551_v1 = vld [vmem:[%s2080_s1 + $0x3e0] ss:$8 sps:$4 sm:$0xff]   ;;  %v1556_v2 = vld [vmem:[%s2080_s1 + $0x1f4] ss:$8 sps:$4 sm:$0xff]  }
  0x41   :  { %1076 = vmatprep.subr.bf16.mxu0 %v1469_v3  ;;  %v1559_v3 = vld [vmem:[%s2080_s1 + $0x3f4] ss:$8 sps:$4 sm:$0xff]  }
  0x42   :  { %980 = vmatmul.mubr.bf16.vlgmr.msra.gmra.mrb[0].mxu1 %v1458_v4  ;;  %v1554_v4 = vld [vmem:[%s2080_s1 + $0x1f0] ss:$8 sps:$4 sm:$0xff]  }
  0x43   :  { %1066 = vmatmul.mubr.bf16.vlgmr.msra.gmra.mrb[0].mxu0 %v1464_v6  ;;  %991 = vmatpush1.bf16.msra.mxu1 %v1461_v5  ;;  %v1557_v5 = vld [vmem:[%s2080_s1 + $0x3f0] ss:$8 sps:$4 sm:$0xff]   ;;  %v1568_v6 = vld [vmem:[%s2080_s1 + $0x404] ss:$8 sps:$4 sm:$0xff]  }
  0x44   :  { %1077 = vmatpush1.bf16.msra.mxu0 %v1467_v7  ;;  %992 = vmatprep.subr.bf16.mxu1 %v1472_v8  ;;  %v1560_v7 = vld [vmem:[%s2081_s0 + $0x8] ss:$36 sps:$4 sm:$0xff]   ;;  %v1563_v8 = vld [vmem:[%s2081_s0 + $0x18] ss:$36 sps:$4 sm:$0xff]  }
  0x45   :  { %1078 = vmatprep.subr.bf16.mxu0 %v1475_v9  ;;  %1022 = vmatprep.mubr.bf16.mxu1 %v1562_v34  ;;  %v1566_v9 = vld [vmem:[%s2080_s1 + $0x400] ss:$8 sps:$4 sm:$0xff]  }
  0x46   :  { %1108 = vmatprep.mubr.bf16.mxu0 %v1565_v35 }
  0x47   :  { %993 = vmatpush1.bf16.msra.mxu1 %v1470_v10  ;;  %v1571_v10 = vld [vmem:[%s2080_s1 + $0x414] ss:$8 sps:$4 sm:$0xff]  }
  0x48   :  { %1079 = vmatpush1.bf16.msra.mxu0 %v1473_v11  ;;  %994 = vmatprep.subr.bf16.mxu1 %v1478_v12  ;;  %v1569_v11 = vld [vmem:[%s2080_s1 + $0x410] ss:$8 sps:$4 sm:$0xff]   ;;  %v1591_v12 = vmov 0  }
  0x49   :  { %1080 = vmatprep.subr.bf16.mxu0 %v1481_v13  ;;  %v1574_v13 = vld [vmem:[%s2080_s1 + $0x424] ss:$8 sps:$4 sm:$0xff]  }
  0x4b   :  { %995 = vmatpush1.bf16.msra.mxu1 %v1476_v14  ;;  %v1572_v14 = vld [vmem:[%s2080_s1 + $0x420] ss:$8 sps:$4 sm:$0xff]  }
  0x4c   :  { %1081 = vmatpush1.bf16.msra.mxu0 %v1479_v15  ;;  %996 = vmatprep.subr.bf16.mxu1 %v1484_v16  ;;  %v1577_v15 = vld [vmem:[%s2080_s1 + $0x434] ss:$8 sps:$4 sm:$0xff]   ;;  %v1575_v16 = vld [vmem:[%s2080_s1 + $0x430] ss:$8 sps:$4 sm:$0xff]  }
  0x4d   :  { %1082 = vmatprep.subr.bf16.mxu0 %v1487_v17  ;;  %v1580_v17 = vld [vmem:[%s2080_s1 + $0x444] ss:$8 sps:$4 sm:$0xff]  }
  0x4f   :  { %997 = vmatpush1.bf16.msra.mxu1 %v1482_v18  ;;  %v1578_v18 = vld [vmem:[%s2080_s1 + $0x440] ss:$8 sps:$4 sm:$0xff]  }
  0x50   :  { %1083 = vmatpush1.bf16.msra.mxu0 %v1485_v19  ;;  %998 = vmatprep.subr.bf16.mxu1 %v1490_v20  ;;  %v1583_v19 = vld [vmem:[%s2080_s1 + $0x454] ss:$8 sps:$4 sm:$0xff]   ;;  %v1581_v20 = vld [vmem:[%s2080_s1 + $0x450] ss:$8 sps:$4 sm:$0xff]  }
  0x51   :  { %1084 = vmatprep.subr.bf16.mxu0 %v1493_v21  ;;  %v1586_v21 = vld [vmem:[%s2080_s1 + $0x464] ss:$8 sps:$4 sm:$0xff]  }
  0x53   :  { %999 = vmatpush1.bf16.msra.mxu1 %v1488_v22  ;;  %v1584_v22 = vld [vmem:[%s2080_s1 + $0x460] ss:$8 sps:$4 sm:$0xff]  }
  0x54   :  { %1085 = vmatpush1.bf16.msra.mxu0 %v1491_v23  ;;  %1000 = vmatprep.subr.bf16.mxu1 %v1496_v24  ;;  %v1589_v23 = vld [vmem:[%s2080_s1 + $0x474] ss:$8 sps:$4 sm:$0xff]   ;;  %v1587_v24 = vld [vmem:[%s2080_s1 + $0x470] ss:$8 sps:$4 sm:$0xff]  }
  0x55   :  { %1086 = vmatprep.subr.bf16.mxu0 %v1499_v25  ;;  %v1590_v25 = vld [vmem:[%s2081_s0 + $0x20] ss:$36 sps:$4 sm:$0xff]  }
  0x57   :  { %1001 = vmatpush1.bf16.msra.mxu1 %v1494_v26 }
  0x58   :  { %1087 = vmatpush1.bf16.msra.mxu0 %v1497_v27  ;;  %1002 = vmatprep.subr.bf16.mxu1 %v1502_v28 }
  0x59   :  { %1088 = vmatprep.subr.bf16.mxu0 %v1505_v29 }
  0x5b   :  { %1003 = vmatpush1.bf16.msra.mxu1 %v1500_v30  ;;  %v171_v30 = vlaneseq }
  0x5c   :  { %1089 = vmatpush1.bf16.msra.mxu0 %v1503_v31  ;;  %1004 = vmatprep.subr.bf16.mxu1 %v1508_v32 }
  0x5d   :  { %1090 = vmatprep.subr.bf16.mxu0 %v1511_v33  ;;  %v172_v31 = vshrl.u32 %v171_v30, 7  ;;  %v169_v33 = vld [vmem:[%s2082_s2] sm:$0x3] }
  0x5f   :  { %1005 = vmatpush1.bf16.msra.mxu1 %v1506_v36  ;;  %v173_v32 = vsub.s32 0, %v172_v31  ;;  %v177_v34 = vsub.s32 1, %v172_v31 }
  0x60   :  { %1091 = vmatpush1.bf16.msra.mxu0 %v1509_v37  ;;  %1006 = vmatprep.subr.bf16.mxu1 %v1514_v38 }
  0x61   :  { %1092 = vmatprep.subr.bf16.mxu0 %v1517_v39  ;;  %v174_v35 = vrot.slane %v169_v33, %v173_v32  ;;  %v178_v36 = vrot.slane %v169_v33, %v177_v34 }
  0x63   :  { %1007 = vmatpush1.bf16.msra.mxu1 %v1512_v40 }
  0x64   :  { %1093 = vmatpush1.bf16.msra.mxu0 %v1515_v41  ;;  %1008 = vmatprep.subr.bf16.mxu1 %v1520_v42 }
  0x65   :  { %1094 = vmatprep.subr.bf16.mxu0 %v1523_v43 }
  0x67   :  { %1009 = vmatpush1.bf16.msra.mxu1 %v1518_v44 }
  0x68   :  { %1095 = vmatpush1.bf16.msra.mxu0 %v1521_v45  ;;  %1010 = vmatprep.subr.bf16.mxu1 %v1526_v46 }
  0x69   :  { %1096 = vmatprep.subr.bf16.mxu0 %v1529_v47 }
  0x6b   :  { %1011 = vmatpush1.bf16.msra.mxu1 %v1524_v48 }
  0x6c   :  { %1097 = vmatpush1.bf16.msra.mxu0 %v1527_v49  ;;  %1012 = vmatprep.subr.bf16.mxu1 %v1532_v50 }
  0x6d   :  { %1098 = vmatprep.subr.bf16.mxu0 %v1535_v51 }
  0x6f   :  { %1013 = vmatpush1.bf16.msra.mxu1 %v1530_v52 }
  0x70   :  { %1099 = vmatpush1.bf16.msra.mxu0 %v1533_v53  ;;  %1014 = vmatprep.subr.bf16.mxu1 %v1538_v54 }
  0x71   :  { %1100 = vmatprep.subr.bf16.mxu0 %v1541_v55 }
  0x73   :  { %1015 = vmatpush1.bf16.msra.mxu1 %v1536_v56 }
  0x74   :  { %1101 = vmatpush1.bf16.msra.mxu0 %v1539_v57  ;;  %1016 = vmatprep.subr.bf16.mxu1 %v1544_v58 }
  0x75   :  { %1102 = vmatprep.subr.bf16.mxu0 %v1547_v59 }
  0x77   :  { %1017 = vmatpush1.bf16.msra.mxu1 %v1542_v60 }
  0x78   :  { %1103 = vmatpush1.bf16.msra.mxu0 %v1545_v61  ;;  %1018 = vmatprep.subr.bf16.mxu1 %v1550_v62 }
  0x79   :  { %1104 = vmatprep.subr.bf16.mxu0 %v1553_v63 }
  0x7b   :  { %1019 = vmatpush1.bf16.msra.mxu1 %v1548_v0 }
  0x7c   :  { %1105 = vmatpush1.bf16.msra.mxu0 %v1551_v1  ;;  %1020 = vmatprep.subr.bf16.mxu1 %v1556_v2 }
  0x7d   :  { %1106 = vmatprep.subr.bf16.mxu0 %v1559_v3 }
  0x7f   :  { %1021 = vmatpush1.bf16.msra.mxu1 %v1554_v4 }
  0x80   :  { %1107 = vmatpush1.bf16.msra.mxu0 %v1557_v5 }
  0x81   :  { %1119 = vmatprep.subr.bf16.mxu0 %v1568_v6 }
  0x82   :  { %1023 = vmatmul.mubr.bf16.vlgmr.msra.gmra.mrb[0].mxu1 %v1560_v7 }
  0x83   :  { %1109 = vmatmul.mubr.bf16.vlgmr.msra.gmra.mrb[0].mxu0 %v1563_v8 }
  0x84   :  { %1120 = vmatpush1.bf16.msra.mxu0 %v1566_v9  ;;  %1151 = vmatprep.mubr.bf16.mxu0 %v1591_v12 }
  0x85   :  { %1121 = vmatprep.subr.bf16.mxu0 %v1571_v10 }
  0x88   :  { %1122 = vmatpush1.bf16.msra.mxu0 %v1569_v11 }
  0x89   :  { %1123 = vmatprep.subr.bf16.mxu0 %v1574_v13 }
  0x8c   :  { %1124 = vmatpush1.bf16.msra.mxu0 %v1572_v14 }
  0x8d   :  { %1125 = vmatprep.subr.bf16.mxu0 %v1577_v15 }
  0x90   :  { %1126 = vmatpush1.bf16.msra.mxu0 %v1575_v16 }
  0x91   :  { %1127 = vmatprep.subr.bf16.mxu0 %v1580_v17 }
  0x94   :  { %1128 = vmatpush1.bf16.msra.mxu0 %v1578_v18 }
  0x95   :  { %1129 = vmatprep.subr.bf16.mxu0 %v1583_v19 }
  0x98   :  { %1130 = vmatpush1.bf16.msra.mxu0 %v1581_v20 }
  0x99   :  { %1131 = vmatprep.subr.bf16.mxu0 %v1586_v21 }
  0x9c   :  { %1132 = vmatpush1.bf16.msra.mxu0 %v1584_v22 }
  0x9d   :  { %1133 = vmatprep.subr.bf16.mxu0 %v1589_v23 }
  0xa0   :  { %1134 = vmatpush1.bf16.msra.mxu0 %v1587_v24 }
  0xa3   :  { %1152 = vmatmul.mubr.bf16.vlgmr.msra.gmra.mrb[0].mxu0 %v1590_v25 }
 0x155   :  { %v1024_v26 = vpop.f32.mrb[0].mxu1 }
 0x156   :  { %v1026_v27 = vpop.f32.mrb[1].mxu1  ;;  %v1341_v37 = vadd.f32 %v1024_v26, %v174_v35 }
 0x157   :  { %v1028_v28 = vpop.f32.mrb[2].mxu1  ;;  %v1343_v38 = vadd.f32 %v1026_v27, %v178_v36 }
 0x158   :  { %v1030_v29 = vpop.f32.mrb[3].mxu1  ;;  %v1345_v40 = vadd.f32 %v1028_v28, %v174_v35 }
 0x159   :  { %v1347_v43 = vadd.f32 %v1030_v29, %v178_v36 }
 0x176   :  { %v1153_v39 = vpop.f32.mrb[0].mxu0 }
 0x177   :  { %v1342_v41 = vadd.f32 %v1341_v37, %v1153_v39  ;;  %v1155_v42 = vpop.f32.mrb[1].mxu0 }
 0x178   :  { %v1344_v44 = vadd.f32 %v1343_v38, %v1155_v42  ;;  %v1157_v45 = vpop.f32.mrb[2].mxu0 }
 0x179   :  { %v1162_v46 = vmax.f32 %v1342_v41, 0.0  ;;  %v1346_v47 = vadd.f32 %v1345_v40, %v1157_v45  ;;  %v1159_v48 = vpop.f32.mrb[3].mxu0 }
 0x17a   :  { %v1163_v49 = vmax.f32 %v1344_v44, 0.0  ;;  %v1348_v50 = vadd.f32 %v1347_v43, %v1159_v48 }
 0x17b   :  { %v1164_v51 = vmax.f32 %v1346_v47, 0.0 }
 0x17c   :  { %v1339_v52 = vpack.c.bf16 %v1163_v49, %v1162_v46  ;;  %v1165_v53 = vmax.f32 %v1348_v50, 0.0 }
 0x17e   :  { %1178 = vst [vmem:[%s2083_s3] sm:$0xff] %v1339_v52  ;;  %v1340_v54 = vpack.c.bf16 %v1165_v53, %v1164_v51 }
 0x180   :  { %1179 = vst [vmem:[%s2083_s3 + $0x8] sm:$0xff] %v1340_v54 }

// kernel: pose_exp_net_forward.15
= control target key start
LH: loop header
LB: loop body
LE: loop exit
PB: predicated region body
PF: predicated region fallthrough
CT: control target
= control target key end

     0   :  { %v23_v5 = vlaneseq  ;;  %vm95_vm0 = vcmask 1041409   ;;  %vm240_vm1 = vcmask 91136   ;;  %s381_s1 = inlined_call_operand.vmem [shape: bf16[256,12], index: 1, kind: input, shape index: {}]   ;;  %s382_s0 = inlined_call_operand.vmem [shape: bf16[2,1,256], index: 0, kind: input, shape index: {}]   ;;  %s383_s2 = inlined_call_operand.vmem [shape: f32[1,12], index: 2, kind: input, shape index: {}]   ;;  %s384_s3 = inlined_call_operand.vmem [shape: f32[2,12], index: 3, kind: output, shape index: {}]  }
   0x1   :  { %v285_v0 = vld [vmem:[%s381_s1 + $0x40] sm:$0xff]   ;;  %v287_v2 = vld [vmem:[%s381_s1 + $0x48] sm:$0xff]   ;;  %v289_v4 = vld [vmem:[%s381_s1 + $0x50] sm:$0xff]  }
   0x2   :  { %v286_v1 = vld [vmem:[%s381_s1] sm:$0xff]   ;;  %263 = vmatprep.subr.bf16.mxu0 %v285_v0  ;;  %v288_v3 = vld [vmem:[%s381_s1 + $0x8] sm:$0xff]   ;;  %v290_v6 = vld [vmem:[%s381_s1 + $0x10] sm:$0xff]   ;;  %v24_v8 = vshrl.u32 %v23_v5, 7 }
   0x3   :  { %264 = vmatpush3.bf16.msra.mxu0 %v286_v1  ;;  %v291_v7 = vld [vmem:[%s381_s1 + $0x58] sm:$0xff]   ;;  %v293_v10 = vld [vmem:[%s381_s1 + $0x60] sm:$0xff]   ;;  %v295_v14 = vld [vmem:[%s381_s1 + $0x68] sm:$0xff]  }
   0x4   :  { %265 = vmatprep.subr.bf16.mxu0 %v287_v2  ;;  %v292_v9 = vld [vmem:[%s381_s1 + $0x18] sm:$0xff]   ;;  %v29_v11 = vsub.s32 2, %v24_v8  ;;  %v294_v12 = vld [vmem:[%s381_s1 + $0x20] sm:$0xff]   ;;  %v25_v13 = vsub.s32 0, %v24_v8  ;;  %v296_v19 = vld [vmem:[%s381_s1 + $0x28] sm:$0xff]  }
   0x5   :  { %v15_v15 = vld [vmem:[%s382_s0] sm:$0x3]  ;;  %v16_v16 = vld [vmem:[%s382_s0 + $0x2] sm:$0x3]  ;;  %v297_v24 = vld [vmem:[%s381_s1 + $0x70] sm:$0xff]  }
   0x6   :  { %v17_v17 = vunpack.c.l.bf16 %v15_v15  ;;  %v18_v18 = vunpack.c.l.bf16 %v16_v16  ;;  %v298_v29 = vld [vmem:[%s381_s1 + $0x30] sm:$0xff]   ;;  %v299_v34 = vld [vmem:[%s381_s1 + $0x78] sm:$0xff]   ;;  %v246_v43 = vld [vmem:[%s383_s2] ss:$0 sm:$0xff] }
   0x7   :  { %266 = vmatpush3.bf16.msra.mxu0 %v288_v3  ;;  %v300_v37 = vld [vmem:[%s381_s1 + $0x38] sm:$0xff]  }
   0x8   :  { %267 = vmatprep.subr.bf16.mxu0 %v289_v4  ;;  %v30_v20 = vrot.slane %v17_v17, %v29_v11  ;;  %v38_v21 = vrot.slane %v18_v18, %v29_v11  ;;  %v26_v22 = vrot.slane %v17_v17, %v25_v13  ;;  %v34_v23 = vrot.slane %v18_v18, %v25_v13 }
   0xa   :  { %v44_v25 = vpack.c.bf16 %v30_v20, %v30_v20  ;;  %v46_v26 = vpack.c.bf16 %v38_v21, %v38_v21  ;;  %v43_v27 = vpack.c.bf16 %v26_v22, %v26_v22  ;;  %v45_v28 = vpack.c.bf16 %v34_v23, %v34_v23 }
   0xb   :  { %268 = vmatpush3.bf16.msra.mxu0 %v290_v6 }
   0xc   :  { %269 = vmatprep.subr.bf16.mxu0 %v291_v7  ;;  %v91_v30 = vunpack.c.l.b16 %v44_v25  ;;  %v93_v31 = vunpack.c.l.b16 %v46_v26  ;;  %v90_v32 = vunpack.c.l.b16 %v43_v27  ;;  %v92_v33 = vunpack.c.l.b16 %v45_v28 }
   0xe   :  { %v97_v35 = vrot.slane %v93_v31, 7  ;;  %v94_v36 = vrot.slane %v92_v33, 7 }
   0xf   :  { %270 = vmatpush3.bf16.msra.mxu0 %v292_v9 }
  0x10   :  { %271 = vmatprep.subr.bf16.mxu0 %v293_v10  ;;  %v98_v38 = vsel %vm95_vm0, %v97_v35, %v91_v30  ;;  %v96_v39 = vsel %vm95_vm0, %v94_v36, %v90_v32 }
  0x11   :  { %v100_v40 = vpack.c.b16 %v98_v38, %v98_v38  ;;  %v99_v41 = vpack.c.b16 %v96_v39, %v96_v39 }
  0x13   :  { %272 = vmatpush3.bf16.msra.mxu0 %v294_v12  ;;  %231 = vmatprep.mubr.bf16.mxu0 %v100_v40 }
  0x14   :  { %273 = vmatprep.subr.bf16.mxu0 %v295_v14 }
  0x17   :  { %274 = vmatpush3.bf16.msra.mxu0 %v296_v19 }
  0x18   :  { %275 = vmatprep.subr.bf16.mxu0 %v297_v24 }
  0x1b   :  { %276 = vmatpush3.bf16.msra.mxu0 %v298_v29 }
  0x1c   :  { %277 = vmatprep.subr.bf16.mxu0 %v299_v34 }
  0x1f   :  { %278 = vmatpush3.bf16.msra.mxu0 %v300_v37 }
  0x22   :  { %232 = vmatmul.mubr.bf16.vlgmr.msra.gmra.mrb[0].mxu0 %v99_v41 }
  0xf5   :  { %v279_v42 = vpop.f32.mrb[0].mxu0 }
  0xf6   :  { %v280_v44 = vpop.f32.mrb[1].mxu0 }
  0xf7   :  { %v281_v45 = vadd.f32 %v280_v44, %v279_v42  ;;  %v282_v46 = vpop.f32.mrb[2].mxu0 }
  0xf8   :  { %v283_v47 = vpop.f32.mrb[3].mxu0 }
  0xf9   :  { %v234_v48 = vadd.f32 %v281_v45, %v246_v43 }
  0xfb   :  { %v239_v49 = vmul.f32 0.01, %v234_v48 }
  0xfd   :  { %241 = vst.msk [vmem:[%s384_s3] sm:$0x3] %vm240_vm1, %v239_v49 }

// kernel: pose_exp_net_forward.13
= control target key start
LH: loop header
LB: loop body
LE: loop exit
PB: predicated region body
PF: predicated region fallthrough
CT: control target
= control target key end

     0   :  { %s4023_s1 = inlined_call_operand.vmem [shape: bf16[2304,256], index: 1, kind: input, shape index: {}]   ;;  %s4024_s0 = inlined_call_operand.vmem [shape: bf16[16,2304], index: 0, kind: input, shape index: {}]   ;;  %s4025_s2 = inlined_call_operand.vmem [shape: f32[1,256], index: 2, kind: input, shape index: {}]   ;;  %s4026_s3 = inlined_call_operand.vmem [shape: bf16[16,256], index: 3, kind: output, shape index: {}]  }
   0x1   :  { %v2617_v0 = vld [vmem:[%s4023_s1 + $0x4] ss:$8 sps:$4 sm:$0xff]   ;;  %v2621_v2 = vld [vmem:[%s4023_s1] ss:$8 sps:$4 sm:$0xff]   ;;  %v2623_v4 = vld [vmem:[%s4023_s1 + $0x14] ss:$8 sps:$4 sm:$0xff]  }
   0x2   :  { %v2619_v1 = vld [vmem:[%s4023_s1 + $0x404] ss:$8 sps:$4 sm:$0xff]   ;;  %1862 = vmatprep.subr.bf16.mxu1 %v2617_v0  ;;  %v2622_v3 = vld [vmem:[%s4023_s1 + $0x400] ss:$8 sps:$4 sm:$0xff]   ;;  %v2625_v5 = vld [vmem:[%s4023_s1 + $0x414] ss:$8 sps:$4 sm:$0xff]  }
   0x3   :  { %2034 = vmatprep.subr.bf16.mxu0 %v2619_v1  ;;  %1863 = vmatpush1.bf16.msra.mxu1 %v2621_v2  ;;  %v2627_v6 = vld [vmem:[%s4023_s1 + $0x10] ss:$8 sps:$4 sm:$0xff]   ;;  %v2629_v8 = vld [vmem:[%s4023_s1 + $0x24] ss:$8 sps:$4 sm:$0xff]   ;;  %v2633_v10 = vld [vmem:[%s4023_s1 + $0x20] ss:$8 sps:$4 sm:$0xff]  }
   0x4   :  { %2035 = vmatpush1.bf16.msra.mxu0 %v2622_v3  ;;  %1864 = vmatprep.subr.bf16.mxu1 %v2623_v4  ;;  %v2628_v7 = vld [vmem:[%s4023_s1 + $0x410] ss:$8 sps:$4 sm:$0xff]   ;;  %v2631_v9 = vld [vmem:[%s4023_s1 + $0x424] ss:$8 sps:$4 sm:$0xff]   ;;  %v2634_v11 = vld [vmem:[%s4023_s1 + $0x420] ss:$8 sps:$4 sm:$0xff]  }
   0x5   :  { %2036 = vmatprep.subr.bf16.mxu0 %v2625_v5  ;;  %v2635_v12 = vld [vmem:[%s4023_s1 + $0x34] ss:$8 sps:$4 sm:$0xff]   ;;  %v2639_v14 = vld [vmem:[%s4023_s1 + $0x30] ss:$8 sps:$4 sm:$0xff]   ;;  %v2641_v16 = vld [vmem:[%s4023_s1 + $0x44] ss:$8 sps:$4 sm:$0xff]  }
   0x6   :  { %v2637_v13 = vld [vmem:[%s4023_s1 + $0x434] ss:$8 sps:$4 sm:$0xff]   ;;  %v2640_v15 = vld [vmem:[%s4023_s1 + $0x430] ss:$8 sps:$4 sm:$0xff]   ;;  %v2643_v17 = vld [vmem:[%s4023_s1 + $0x444] ss:$8 sps:$4 sm:$0xff]  }
   0x7   :  { %1865 = vmatpush1.bf16.msra.mxu1 %v2627_v6  ;;  %v2645_v18 = vld [vmem:[%s4023_s1 + $0x40] ss:$8 sps:$4 sm:$0xff]   ;;  %v2647_v20 = vld [vmem:[%s4023_s1 + $0x54] ss:$8 sps:$4 sm:$0xff]   ;;  %v2651_v22 = vld [vmem:[%s4023_s1 + $0x50] ss:$8 sps:$4 sm:$0xff]  }
   0x8   :  { %2037 = vmatpush1.bf16.msra.mxu0 %v2628_v7  ;;  %1866 = vmatprep.subr.bf16.mxu1 %v2629_v8  ;;  %v2646_v19 = vld [vmem:[%s4023_s1 + $0x440] ss:$8 sps:$4 sm:$0xff]   ;;  %v2649_v21 = vld [vmem:[%s4023_s1 + $0x454] ss:$8 sps:$4 sm:$0xff]   ;;  %v2652_v23 = vld [vmem:[%s4023_s1 + $0x450] ss:$8 sps:$4 sm:$0xff]  }
   0x9   :  { %2038 = vmatprep.subr.bf16.mxu0 %v2631_v9  ;;  %v2653_v24 = vld [vmem:[%s4023_s1 + $0x64] ss:$8 sps:$4 sm:$0xff]   ;;  %v2657_v26 = vld [vmem:[%s4023_s1 + $0x60] ss:$8 sps:$4 sm:$0xff]   ;;  %v2659_v28 = vld [vmem:[%s4023_s1 + $0x74] ss:$8 sps:$4 sm:$0xff]  }
   0xa   :  { %v2655_v25 = vld [vmem:[%s4023_s1 + $0x464] ss:$8 sps:$4 sm:$0xff]   ;;  %v2658_v27 = vld [vmem:[%s4023_s1 + $0x460] ss:$8 sps:$4 sm:$0xff]   ;;  %v2661_v29 = vld [vmem:[%s4023_s1 + $0x474] ss:$8 sps:$4 sm:$0xff]  }
   0xb   :  { %1867 = vmatpush1.bf16.msra.mxu1 %v2633_v10  ;;  %v2663_v30 = vld [vmem:[%s4023_s1 + $0x70] ss:$8 sps:$4 sm:$0xff]   ;;  %v2665_v32 = vld [vmem:[%s4023_s1 + $0x84] ss:$8 sps:$4 sm:$0xff]   ;;  %v2669_v34 = vld [vmem:[%s4023_s1 + $0x80] ss:$8 sps:$4 sm:$0xff]  }
   0xc   :  { %2039 = vmatpush1.bf16.msra.mxu0 %v2634_v11  ;;  %1868 = vmatprep.subr.bf16.mxu1 %v2635_v12  ;;  %v2664_v31 = vld [vmem:[%s4023_s1 + $0x470] ss:$8 sps:$4 sm:$0xff]   ;;  %v2667_v33 = vld [vmem:[%s4023_s1 + $0x484] ss:$8 sps:$4 sm:$0xff]   ;;  %v2670_v35 = vld [vmem:[%s4023_s1 + $0x480] ss:$8 sps:$4 sm:$0xff]  }
   0xd   :  { %2040 = vmatprep.subr.bf16.mxu0 %v2637_v13  ;;  %v2671_v36 = vld [vmem:[%s4023_s1 + $0x94] ss:$8 sps:$4 sm:$0xff]   ;;  %v2675_v38 = vld [vmem:[%s4023_s1 + $0x90] ss:$8 sps:$4 sm:$0xff]   ;;  %v2677_v40 = vld [vmem:[%s4023_s1 + $0xa4] ss:$8 sps:$4 sm:$0xff]  }
   0xe   :  { %v2673_v37 = vld [vmem:[%s4023_s1 + $0x494] ss:$8 sps:$4 sm:$0xff]   ;;  %v2676_v39 = vld [vmem:[%s4023_s1 + $0x490] ss:$8 sps:$4 sm:$0xff]   ;;  %v2679_v41 = vld [vmem:[%s4023_s1 + $0x4a4] ss:$8 sps:$4 sm:$0xff]  }
   0xf   :  { %1869 = vmatpush1.bf16.msra.mxu1 %v2639_v14  ;;  %v2681_v42 = vld [vmem:[%s4023_s1 + $0xa0] ss:$8 sps:$4 sm:$0xff]   ;;  %v2683_v44 = vld [vmem:[%s4023_s1 + $0xb4] ss:$8 sps:$4 sm:$0xff]   ;;  %v2687_v46 = vld [vmem:[%s4023_s1 + $0xb0] ss:$8 sps:$4 sm:$0xff]  }
  0x10   :  { %2041 = vmatpush1.bf16.msra.mxu0 %v2640_v15  ;;  %1870 = vmatprep.subr.bf16.mxu1 %v2641_v16  ;;  %v2682_v43 = vld [vmem:[%s4023_s1 + $0x4a0] ss:$8 sps:$4 sm:$0xff]   ;;  %v2685_v45 = vld [vmem:[%s4023_s1 + $0x4b4] ss:$8 sps:$4 sm:$0xff]   ;;  %v2688_v47 = vld [vmem:[%s4023_s1 + $0x4b0] ss:$8 sps:$4 sm:$0xff]  }
  0x11   :  { %2042 = vmatprep.subr.bf16.mxu0 %v2643_v17  ;;  %v2715_v48 = vld [vmem:[%s4024_s0 + $0x4] ss:$72 sps:$4 sm:$0xff]   ;;  %v2693_v52 = vld [vmem:[%s4023_s1 + $0xc0] ss:$8 sps:$4 sm:$0xff]   ;;  %v2695_v54 = vld [vmem:[%s4023_s1 + $0xd4] ss:$8 sps:$4 sm:$0xff]  }
  0x12   :  { %v2689_v49 = vld [vmem:[%s4023_s1 + $0xc4] ss:$8 sps:$4 sm:$0xff]   ;;  %1894 = vmatprep.mubr.bf16.mxu1 %v2715_v48  ;;  %v2694_v53 = vld [vmem:[%s4023_s1 + $0x4c0] ss:$8 sps:$4 sm:$0xff]   ;;  %v2697_v55 = vld [vmem:[%s4023_s1 + $0x4d4] ss:$8 sps:$4 sm:$0xff]  }
  0x13   :  { %1871 = vmatpush1.bf16.msra.mxu1 %v2645_v18  ;;  %v2691_v50 = vld [vmem:[%s4023_s1 + $0x4c4] ss:$8 sps:$4 sm:$0xff]   ;;  %v2699_v56 = vld [vmem:[%s4023_s1 + $0xd0] ss:$8 sps:$4 sm:$0xff]   ;;  %v2705_v60 = vld [vmem:[%s4023_s1 + $0xe0] ss:$8 sps:$4 sm:$0xff]  }
  0x14   :  { %2043 = vmatpush1.bf16.msra.mxu0 %v2646_v19  ;;  %1872 = vmatprep.subr.bf16.mxu1 %v2647_v20  ;;  %v2721_v51 = vld [vmem:[%s4024_s0 + $0x24] ss:$72 sps:$4 sm:$0xff]   ;;  %v2700_v57 = vld [vmem:[%s4023_s1 + $0x4d0] ss:$8 sps:$4 sm:$0xff]   ;;  %v2706_v61 = vld [vmem:[%s4023_s1 + $0x4e0] ss:$8 sps:$4 sm:$0xff]  }
  0x15   :  { %2044 = vmatprep.subr.bf16.mxu0 %v2649_v21  ;;  %2066 = vmatprep.mubr.bf16.mxu0 %v2721_v51  ;;  %v2701_v58 = vld [vmem:[%s4023_s1 + $0xe4] ss:$8 sps:$4 sm:$0xff]   ;;  %v2707_v62 = vld [vmem:[%s4023_s1 + $0xf4] ss:$8 sps:$4 sm:$0xff]   ;;  %v2711_v0 = vld [vmem:[%s4023_s1 + $0xf0] ss:$8 sps:$4 sm:$0xff]  }
  0x16   :  { %v2703_v59 = vld [vmem:[%s4023_s1 + $0x4e4] ss:$8 sps:$4 sm:$0xff]   ;;  %v2709_v63 = vld [vmem:[%s4023_s1 + $0x4f4] ss:$8 sps:$4 sm:$0xff]   ;;  %v2712_v1 = vld [vmem:[%s4023_s1 + $0x4f0] ss:$8 sps:$4 sm:$0xff]  }
  0x17   :  { %1873 = vmatpush1.bf16.msra.mxu1 %v2651_v22  ;;  %v2718_v2 = vld [vmem:[%s4023_s1 + $0x104] ss:$8 sps:$4 sm:$0xff]   ;;  %v2713_v4 = vld [vmem:[%s4024_s0] ss:$72 sps:$4 sm:$0xff]   ;;  %v2727_v8 = vld [vmem:[%s4023_s1 + $0x114] ss:$8 sps:$4 sm:$0xff]  }
  0x18   :  { %2045 = vmatpush1.bf16.msra.mxu0 %v2652_v23  ;;  %1874 = vmatprep.subr.bf16.mxu1 %v2653_v24  ;;  %v2724_v3 = vld [vmem:[%s4023_s1 + $0x504] ss:$8 sps:$4 sm:$0xff]   ;;  %v2716_v5 = vld [vmem:[%s4023_s1 + $0x100] ss:$8 sps:$4 sm:$0xff]   ;;  %v2730_v9 = vld [vmem:[%s4023_s1 + $0x514] ss:$8 sps:$4 sm:$0xff]  }
  0x19   :  { %2046 = vmatprep.subr.bf16.mxu0 %v2655_v25  ;;  %v2719_v6 = vld [vmem:[%s4024_s0 + $0x20] ss:$72 sps:$4 sm:$0xff]   ;;  %v2725_v10 = vld [vmem:[%s4023_s1 + $0x110] ss:$8 sps:$4 sm:$0xff]   ;;  %v2733_v12 = vld [vmem:[%s4023_s1 + $0x124] ss:$8 sps:$4 sm:$0xff]  }
  0x1a   :  { %v2722_v7 = vld [vmem:[%s4023_s1 + $0x500] ss:$8 sps:$4 sm:$0xff]   ;;  %v2728_v11 = vld [vmem:[%s4023_s1 + $0x510] ss:$8 sps:$4 sm:$0xff]   ;;  %v2736_v13 = vld [vmem:[%s4023_s1 + $0x524] ss:$8 sps:$4 sm:$0xff]  }
  0x1b   :  { %1875 = vmatpush1.bf16.msra.mxu1 %v2657_v26  ;;  %v2731_v14 = vld [vmem:[%s4023_s1 + $0x120] ss:$8 sps:$4 sm:$0xff]   ;;  %v2739_v16 = vld [vmem:[%s4023_s1 + $0x134] ss:$8 sps:$4 sm:$0xff]   ;;  %v2737_v18 = vld [vmem:[%s4023_s1 + $0x130] ss:$8 sps:$4 sm:$0xff]  }
  0x1c   :  { %2047 = vmatpush1.bf16.msra.mxu0 %v2658_v27  ;;  %1876 = vmatprep.subr.bf16.mxu1 %v2659_v28  ;;  %v2734_v15 = vld [vmem:[%s4023_s1 + $0x520] ss:$8 sps:$4 sm:$0xff]   ;;  %v2742_v17 = vld [vmem:[%s4023_s1 + $0x534] ss:$8 sps:$4 sm:$0xff]   ;;  %v2740_v19 = vld [vmem:[%s4023_s1 + $0x530] ss:$8 sps:$4 sm:$0xff]  }
  0x1d   :  { %2048 = vmatprep.subr.bf16.mxu0 %v2661_v29  ;;  %v2745_v20 = vld [vmem:[%s4023_s1 + $0x144] ss:$8 sps:$4 sm:$0xff]   ;;  %v2743_v22 = vld [vmem:[%s4023_s1 + $0x140] ss:$8 sps:$4 sm:$0xff]   ;;  %v2751_v24 = vld [vmem:[%s4023_s1 + $0x154] ss:$8 sps:$4 sm:$0xff]  }
  0x1e   :  { %v2748_v21 = vld [vmem:[%s4023_s1 + $0x544] ss:$8 sps:$4 sm:$0xff]   ;;  %v2746_v23 = vld [vmem:[%s4023_s1 + $0x540] ss:$8 sps:$4 sm:$0xff]   ;;  %v2754_v25 = vld [vmem:[%s4023_s1 + $0x554] ss:$8 sps:$4 sm:$0xff]  }
  0x1f   :  { %1877 = vmatpush1.bf16.msra.mxu1 %v2663_v30  ;;  %v2749_v26 = vld [vmem:[%s4023_s1 + $0x150] ss:$8 sps:$4 sm:$0xff]   ;;  %v2757_v28 = vld [vmem:[%s4023_s1 + $0x164] ss:$8 sps:$4 sm:$0xff]   ;;  %v2755_v30 = vld [vmem:[%s4023_s1 + $0x160] ss:$8 sps:$4 sm:$0xff]  }
  0x20   :  { %2049 = vmatpush1.bf16.msra.mxu0 %v2664_v31  ;;  %1878 = vmatprep.subr.bf16.mxu1 %v2665_v32  ;;  %v2752_v27 = vld [vmem:[%s4023_s1 + $0x550] ss:$8 sps:$4 sm:$0xff]   ;;  %v2760_v29 = vld [vmem:[%s4023_s1 + $0x564] ss:$8 sps:$4 sm:$0xff]   ;;  %v2758_v31 = vld [vmem:[%s4023_s1 + $0x560] ss:$8 sps:$4 sm:$0xff]  }
  0x21   :  { %2050 = vmatprep.subr.bf16.mxu0 %v2667_v33  ;;  %v2763_v32 = vld [vmem:[%s4023_s1 + $0x174] ss:$8 sps:$4 sm:$0xff]   ;;  %v2779_v48 = vld [vmem:[%s4023_s1 + $0x1a0] ss:$8 sps:$4 sm:$0xff]  }
  0x22   :  { %v2766_v33 = vld [vmem:[%s4023_s1 + $0x574] ss:$8 sps:$4 sm:$0xff]  }
  0x23   :  { %1879 = vmatpush1.bf16.msra.mxu1 %v2669_v34  ;;  %v2817_v34 = vld [vmem:[%s4024_s0 + $0xc] ss:$72 sps:$4 sm:$0xff]  }
  0x24   :  { %2051 = vmatpush1.bf16.msra.mxu0 %v2670_v35  ;;  %1880 = vmatprep.subr.bf16.mxu1 %v2671_v36  ;;  %v2761_v35 = vld [vmem:[%s4023_s1 + $0x170] ss:$8 sps:$4 sm:$0xff]   ;;  %v2790_v51 = vld [vmem:[%s4023_s1 + $0x5b4] ss:$8 sps:$4 sm:$0xff]  }
  0x25   :  { %2052 = vmatprep.subr.bf16.mxu0 %v2673_v37  ;;  %v2764_v36 = vld [vmem:[%s4023_s1 + $0x570] ss:$8 sps:$4 sm:$0xff]   ;;  %v2823_v37 = vld [vmem:[%s4024_s0 + $0x2c] ss:$72 sps:$4 sm:$0xff]  }
  0x27   :  { %1881 = vmatpush1.bf16.msra.mxu1 %v2675_v38  ;;  %v2769_v38 = vld [vmem:[%s4023_s1 + $0x184] ss:$8 sps:$4 sm:$0xff]  }
  0x28   :  { %2053 = vmatpush1.bf16.msra.mxu0 %v2676_v39  ;;  %1882 = vmatprep.subr.bf16.mxu1 %v2677_v40  ;;  %v2772_v39 = vld [vmem:[%s4023_s1 + $0x584] ss:$8 sps:$4 sm:$0xff]   ;;  %v2767_v40 = vld [vmem:[%s4023_s1 + $0x180] ss:$8 sps:$4 sm:$0xff]  }
  0x29   :  { %2054 = vmatprep.subr.bf16.mxu0 %v2679_v41  ;;  %v2770_v41 = vld [vmem:[%s4023_s1 + $0x580] ss:$8 sps:$4 sm:$0xff]  }
  0x2b   :  { %1883 = vmatpush1.bf16.msra.mxu1 %v2681_v42  ;;  %v2775_v42 = vld [vmem:[%s4023_s1 + $0x194] ss:$8 sps:$4 sm:$0xff]  }
  0x2c   :  { %2055 = vmatpush1.bf16.msra.mxu0 %v2682_v43  ;;  %1884 = vmatprep.subr.bf16.mxu1 %v2683_v44  ;;  %v2778_v43 = vld [vmem:[%s4023_s1 + $0x594] ss:$8 sps:$4 sm:$0xff]   ;;  %v2773_v44 = vld [vmem:[%s4023_s1 + $0x190] ss:$8 sps:$4 sm:$0xff]  }
  0x2d   :  { %2056 = vmatprep.subr.bf16.mxu0 %v2685_v45  ;;  %v2776_v45 = vld [vmem:[%s4023_s1 + $0x590] ss:$8 sps:$4 sm:$0xff]  }
  0x2f   :  { %1885 = vmatpush1.bf16.msra.mxu1 %v2687_v46  ;;  %v2781_v46 = vld [vmem:[%s4023_s1 + $0x1a4] ss:$8 sps:$4 sm:$0xff]  }
  0x30   :  { %2057 = vmatpush1.bf16.msra.mxu0 %v2688_v47  ;;  %1886 = vmatprep.subr.bf16.mxu1 %v2689_v49  ;;  %v2784_v47 = vld [vmem:[%s4023_s1 + $0x5a4] ss:$8 sps:$4 sm:$0xff]   ;;  %v2782_v49 = vld [vmem:[%s4023_s1 + $0x5a0] ss:$8 sps:$4 sm:$0xff]  }
  0x31   :  { %2058 = vmatprep.subr.bf16.mxu0 %v2691_v50  ;;  %v2787_v50 = vld [vmem:[%s4023_s1 + $0x1b4] ss:$8 sps:$4 sm:$0xff]  }
  0x33   :  { %1887 = vmatpush1.bf16.msra.mxu1 %v2693_v52  ;;  %v2785_v52 = vld [vmem:[%s4023_s1 + $0x1b0] ss:$8 sps:$4 sm:$0xff]  }
  0x34   :  { %2059 = vmatpush1.bf16.msra.mxu0 %v2694_v53  ;;  %1888 = vmatprep.subr.bf16.mxu1 %v2695_v54  ;;  %v2788_v53 = vld [vmem:[%s4023_s1 + $0x5b0] ss:$8 sps:$4 sm:$0xff]   ;;  %v2793_v54 = vld [vmem:[%s4023_s1 + $0x1c4] ss:$8 sps:$4 sm:$0xff]  }
  0x35   :  { %2060 = vmatprep.subr.bf16.mxu0 %v2697_v55  ;;  %v2796_v55 = vld [vmem:[%s4023_s1 + $0x5c4] ss:$8 sps:$4 sm:$0xff]  }
  0x37   :  { %1889 = vmatpush1.bf16.msra.mxu1 %v2699_v56  ;;  %v2791_v56 = vld [vmem:[%s4023_s1 + $0x1c0] ss:$8 sps:$4 sm:$0xff]  }
  0x38   :  { %2061 = vmatpush1.bf16.msra.mxu0 %v2700_v57  ;;  %1890 = vmatprep.subr.bf16.mxu1 %v2701_v58  ;;  %v2794_v57 = vld [vmem:[%s4023_s1 + $0x5c0] ss:$8 sps:$4 sm:$0xff]   ;;  %v2799_v58 = vld [vmem:[%s4023_s1 + $0x1d4] ss:$8 sps:$4 sm:$0xff]  }
  0x39   :  { %2062 = vmatprep.subr.bf16.mxu0 %v2703_v59  ;;  %v2802_v59 = vld [vmem:[%s4023_s1 + $0x5d4] ss:$8 sps:$4 sm:$0xff]  }
  0x3b   :  { %1891 = vmatpush1.bf16.msra.mxu1 %v2705_v60  ;;  %v2797_v60 = vld [vmem:[%s4023_s1 + $0x1d0] ss:$8 sps:$4 sm:$0xff]  }
  0x3c   :  { %2063 = vmatpush1.bf16.msra.mxu0 %v2706_v61  ;;  %1892 = vmatprep.subr.bf16.mxu1 %v2707_v62  ;;  %v2800_v61 = vld [vmem:[%s4023_s1 + $0x5d0] ss:$8 sps:$4 sm:$0xff]   ;;  %v2805_v62 = vld [vmem:[%s4023_s1 + $0x1e4] ss:$8 sps:$4 sm:$0xff]  }
  0x3d   :  { %2064 = vmatprep.subr.bf16.mxu0 %v2709_v63  ;;  %v2808_v63 = vld [vmem:[%s4023_s1 + $0x5e4] ss:$8 sps:$4 sm:$0xff]  }
  0x3f   :  { %1893 = vmatpush1.bf16.msra.mxu1 %v2711_v0  ;;  %v2803_v0 = vld [vmem:[%s4023_s1 + $0x1e0] ss:$8 sps:$4 sm:$0xff]  }
  0x40   :  { %2065 = vmatpush1.bf16.msra.mxu0 %v2712_v1  ;;  %1905 = vmatprep.subr.bf16.mxu1 %v2718_v2  ;;  %v2806_v1 = vld [vmem:[%s4023_s1 + $0x5e0] ss:$8 sps:$4 sm:$0xff]   ;;  %v2811_v2 = vld [vmem:[%s4023_s1 + $0x1f4] ss:$8 sps:$4 sm:$0xff]  }
  0x41   :  { %2077 = vmatprep.subr.bf16.mxu0 %v2724_v3  ;;  %v2814_v3 = vld [vmem:[%s4023_s1 + $0x5f4] ss:$8 sps:$4 sm:$0xff]  }
  0x42   :  { %1895 = vmatmul.mubr.bf16.vlgmr.msra.gmra.mrb[0].mxu1 %v2713_v4  ;;  %v2809_v4 = vld [vmem:[%s4023_s1 + $0x1f0] ss:$8 sps:$4 sm:$0xff]  }
  0x43   :  { %2067 = vmatmul.mubr.bf16.vlgmr.msra.gmra.mrb[0].mxu0 %v2719_v6  ;;  %1906 = vmatpush1.bf16.msra.mxu1 %v2716_v5  ;;  %v2812_v5 = vld [vmem:[%s4023_s1 + $0x5f0] ss:$8 sps:$4 sm:$0xff]   ;;  %v2820_v6 = vld [vmem:[%s4023_s1 + $0x204] ss:$8 sps:$4 sm:$0xff]  }
  0x44   :  { %2078 = vmatpush1.bf16.msra.mxu0 %v2722_v7  ;;  %1907 = vmatprep.subr.bf16.mxu1 %v2727_v8  ;;  %v2826_v7 = vld [vmem:[%s4023_s1 + $0x604] ss:$8 sps:$4 sm:$0xff]   ;;  %v2815_v8 = vld [vmem:[%s4024_s0 + $0x8] ss:$72 sps:$4 sm:$0xff]  }
  0x45   :  { %2079 = vmatprep.subr.bf16.mxu0 %v2730_v9  ;;  %1937 = vmatprep.mubr.bf16.mxu1 %v2817_v34  ;;  %v2818_v9 = vld [vmem:[%s4023_s1 + $0x200] ss:$8 sps:$4 sm:$0xff]   ;;  %v2859_v34 = vld [vmem:[%s4023_s1 + $0x264] ss:$8 sps:$4 sm:$0xff]  }
  0x46   :  { %2109 = vmatprep.mubr.bf16.mxu0 %v2823_v37  ;;  %v2860_v37 = vld [vmem:[%s4023_s1 + $0x660] ss:$8 sps:$4 sm:$0xff]  }
  0x47   :  { %1908 = vmatpush1.bf16.msra.mxu1 %v2725_v10  ;;  %v2821_v10 = vld [vmem:[%s4024_s0 + $0x28] ss:$72 sps:$4 sm:$0xff]  }
  0x48   :  { %2080 = vmatpush1.bf16.msra.mxu0 %v2728_v11  ;;  %1909 = vmatprep.subr.bf16.mxu1 %v2733_v12  ;;  %v2824_v11 = vld [vmem:[%s4023_s1 + $0x600] ss:$8 sps:$4 sm:$0xff]   ;;  %v2829_v12 = vld [vmem:[%s4023_s1 + $0x214] ss:$8 sps:$4 sm:$0xff]  }
  0x49   :  { %2081 = vmatprep.subr.bf16.mxu0 %v2736_v13  ;;  %v2832_v13 = vld [vmem:[%s4023_s1 + $0x614] ss:$8 sps:$4 sm:$0xff]  }
  0x4b   :  { %1910 = vmatpush1.bf16.msra.mxu1 %v2731_v14  ;;  %v2827_v14 = vld [vmem:[%s4023_s1 + $0x210] ss:$8 sps:$4 sm:$0xff]  }
  0x4c   :  { %2082 = vmatpush1.bf16.msra.mxu0 %v2734_v15  ;;  %1911 = vmatprep.subr.bf16.mxu1 %v2739_v16  ;;  %v2830_v15 = vld [vmem:[%s4023_s1 + $0x610] ss:$8 sps:$4 sm:$0xff]   ;;  %v2835_v16 = vld [vmem:[%s4023_s1 + $0x224] ss:$8 sps:$4 sm:$0xff]  }
  0x4d   :  { %2083 = vmatprep.subr.bf16.mxu0 %v2742_v17  ;;  %v2838_v17 = vld [vmem:[%s4023_s1 + $0x624] ss:$8 sps:$4 sm:$0xff]  }
  0x4f   :  { %1912 = vmatpush1.bf16.msra.mxu1 %v2737_v18  ;;  %v2833_v18 = vld [vmem:[%s4023_s1 + $0x220] ss:$8 sps:$4 sm:$0xff]  }
  0x50   :  { %2084 = vmatpush1.bf16.msra.mxu0 %v2740_v19  ;;  %1913 = vmatprep.subr.bf16.mxu1 %v2745_v20  ;;  %v2919_v19 = vld [vmem:[%s4024_s0 + $0x14] ss:$72 sps:$4 sm:$0xff]   ;;  %v2836_v20 = vld [vmem:[%s4023_s1 + $0x620] ss:$8 sps:$4 sm:$0xff]  }
  0x51   :  { %2085 = vmatprep.subr.bf16.mxu0 %v2748_v21  ;;  %v2841_v21 = vld [vmem:[%s4023_s1 + $0x234] ss:$8 sps:$4 sm:$0xff]  }
  0x53   :  { %1914 = vmatpush1.bf16.msra.mxu1 %v2743_v22  ;;  %v2844_v22 = vld [vmem:[%s4023_s1 + $0x634] ss:$8 sps:$4 sm:$0xff]  }
  0x54   :  { %2086 = vmatpush1.bf16.msra.mxu0 %v2746_v23  ;;  %1915 = vmatprep.subr.bf16.mxu1 %v2751_v24  ;;  %v2925_v23 = vld [vmem:[%s4024_s0 + $0x34] ss:$72 sps:$4 sm:$0xff]   ;;  %v2839_v24 = vld [vmem:[%s4023_s1 + $0x230] ss:$8 sps:$4 sm:$0xff]  }
  0x55   :  { %2087 = vmatprep.subr.bf16.mxu0 %v2754_v25  ;;  %v2842_v25 = vld [vmem:[%s4023_s1 + $0x630] ss:$8 sps:$4 sm:$0xff]  }
  0x57   :  { %1916 = vmatpush1.bf16.msra.mxu1 %v2749_v26  ;;  %v2847_v26 = vld [vmem:[%s4023_s1 + $0x244] ss:$8 sps:$4 sm:$0xff]  }
  0x58   :  { %2088 = vmatpush1.bf16.msra.mxu0 %v2752_v27  ;;  %1917 = vmatprep.subr.bf16.mxu1 %v2757_v28  ;;  %v2850_v27 = vld [vmem:[%s4023_s1 + $0x644] ss:$8 sps:$4 sm:$0xff]   ;;  %v2845_v28 = vld [vmem:[%s4023_s1 + $0x240] ss:$8 sps:$4 sm:$0xff]  }
  0x59   :  { %2089 = vmatprep.subr.bf16.mxu0 %v2760_v29  ;;  %v2848_v29 = vld [vmem:[%s4023_s1 + $0x640] ss:$8 sps:$4 sm:$0xff]  }
  0x5b   :  { %1918 = vmatpush1.bf16.msra.mxu1 %v2755_v30  ;;  %v2853_v30 = vld [vmem:[%s4023_s1 + $0x254] ss:$8 sps:$4 sm:$0xff]  }
  0x5c   :  { %2090 = vmatpush1.bf16.msra.mxu0 %v2758_v31  ;;  %1919 = vmatprep.subr.bf16.mxu1 %v2763_v32  ;;  %v2856_v31 = vld [vmem:[%s4023_s1 + $0x654] ss:$8 sps:$4 sm:$0xff]   ;;  %v2851_v32 = vld [vmem:[%s4023_s1 + $0x250] ss:$8 sps:$4 sm:$0xff]  }
  0x5d   :  { %2091 = vmatprep.subr.bf16.mxu0 %v2766_v33  ;;  %v2854_v33 = vld [vmem:[%s4023_s1 + $0x650] ss:$8 sps:$4 sm:$0xff]  }
  0x5f   :  { %1920 = vmatpush1.bf16.msra.mxu1 %v2761_v35  ;;  %v2862_v35 = vld [vmem:[%s4023_s1 + $0x664] ss:$8 sps:$4 sm:$0xff]  }
  0x60   :  { %2092 = vmatpush1.bf16.msra.mxu0 %v2764_v36  ;;  %1921 = vmatprep.subr.bf16.mxu1 %v2769_v38  ;;  %v2857_v36 = vld [vmem:[%s4023_s1 + $0x260] ss:$8 sps:$4 sm:$0xff]   ;;  %v2865_v38 = vld [vmem:[%s4023_s1 + $0x274] ss:$8 sps:$4 sm:$0xff]  }
  0x61   :  { %2093 = vmatprep.subr.bf16.mxu0 %v2772_v39  ;;  %v2868_v39 = vld [vmem:[%s4023_s1 + $0x674] ss:$8 sps:$4 sm:$0xff]  }
  0x63   :  { %1922 = vmatpush1.bf16.msra.mxu1 %v2767_v40  ;;  %v2863_v40 = vld [vmem:[%s4023_s1 + $0x270] ss:$8 sps:$4 sm:$0xff]  }
  0x64   :  { %2094 = vmatpush1.bf16.msra.mxu0 %v2770_v41  ;;  %1923 = vmatprep.subr.bf16.mxu1 %v2775_v42  ;;  %v2866_v41 = vld [vmem:[%s4023_s1 + $0x670] ss:$8 sps:$4 sm:$0xff]   ;;  %v2871_v42 = vld [vmem:[%s4023_s1 + $0x284] ss:$8 sps:$4 sm:$0xff]  }
  0x65   :  { %2095 = vmatprep.subr.bf16.mxu0 %v2778_v43  ;;  %v2874_v43 = vld [vmem:[%s4023_s1 + $0x684] ss:$8 sps:$4 sm:$0xff]  }
  0x67   :  { %1924 = vmatpush1.bf16.msra.mxu1 %v2773_v44  ;;  %v2869_v44 = vld [vmem:[%s4023_s1 + $0x280] ss:$8 sps:$4 sm:$0xff]  }
  0x68   :  { %2096 = vmatpush1.bf16.msra.mxu0 %v2776_v45  ;;  %1925 = vmatprep.subr.bf16.mxu1 %v2781_v46  ;;  %v2872_v45 = vld [vmem:[%s4023_s1 + $0x680] ss:$8 sps:$4 sm:$0xff]   ;;  %v2877_v46 = vld [vmem:[%s4023_s1 + $0x294] ss:$8 sps:$4 sm:$0xff]  }
  0x69   :  { %2097 = vmatprep.subr.bf16.mxu0 %v2784_v47  ;;  %v2880_v47 = vld [vmem:[%s4023_s1 + $0x694] ss:$8 sps:$4 sm:$0xff]  }
  0x6b   :  { %1926 = vmatpush1.bf16.msra.mxu1 %v2779_v48  ;;  %v2875_v48 = vld [vmem:[%s4023_s1 + $0x290] ss:$8 sps:$4 sm:$0xff]  }
  0x6c   :  { %2098 = vmatpush1.bf16.msra.mxu0 %v2782_v49  ;;  %1927 = vmatprep.subr.bf16.mxu1 %v2787_v50  ;;  %v2878_v49 = vld [vmem:[%s4023_s1 + $0x690] ss:$8 sps:$4 sm:$0xff]   ;;  %v2883_v50 = vld [vmem:[%s4023_s1 + $0x2a4] ss:$8 sps:$4 sm:$0xff]  }
  0x6d   :  { %2099 = vmatprep.subr.bf16.mxu0 %v2790_v51  ;;  %v2886_v51 = vld [vmem:[%s4023_s1 + $0x6a4] ss:$8 sps:$4 sm:$0xff]  }
  0x6f   :  { %1928 = vmatpush1.bf16.msra.mxu1 %v2785_v52  ;;  %v2881_v52 = vld [vmem:[%s4023_s1 + $0x2a0] ss:$8 sps:$4 sm:$0xff]  }
  0x70   :  { %2100 = vmatpush1.bf16.msra.mxu0 %v2788_v53  ;;  %1929 = vmatprep.subr.bf16.mxu1 %v2793_v54  ;;  %v2884_v53 = vld [vmem:[%s4023_s1 + $0x6a0] ss:$8 sps:$4 sm:$0xff]   ;;  %v2889_v54 = vld [vmem:[%s4023_s1 + $0x2b4] ss:$8 sps:$4 sm:$0xff]  }
  0x71   :  { %2101 = vmatprep.subr.bf16.mxu0 %v2796_v55  ;;  %v2892_v55 = vld [vmem:[%s4023_s1 + $0x6b4] ss:$8 sps:$4 sm:$0xff]  }
  0x73   :  { %1930 = vmatpush1.bf16.msra.mxu1 %v2791_v56  ;;  %v2887_v56 = vld [vmem:[%s4023_s1 + $0x2b0] ss:$8 sps:$4 sm:$0xff]  }
  0x74   :  { %2102 = vmatpush1.bf16.msra.mxu0 %v2794_v57  ;;  %1931 = vmatprep.subr.bf16.mxu1 %v2799_v58  ;;  %v2890_v57 = vld [vmem:[%s4023_s1 + $0x6b0] ss:$8 sps:$4 sm:$0xff]   ;;  %v2895_v58 = vld [vmem:[%s4023_s1 + $0x2c4] ss:$8 sps:$4 sm:$0xff]  }
  0x75   :  { %2103 = vmatprep.subr.bf16.mxu0 %v2802_v59  ;;  %v2898_v59 = vld [vmem:[%s4023_s1 + $0x6c4] ss:$8 sps:$4 sm:$0xff]  }
  0x77   :  { %1932 = vmatpush1.bf16.msra.mxu1 %v2797_v60  ;;  %v2893_v60 = vld [vmem:[%s4023_s1 + $0x2c0] ss:$8 sps:$4 sm:$0xff]  }
  0x78   :  { %2104 = vmatpush1.bf16.msra.mxu0 %v2800_v61  ;;  %1933 = vmatprep.subr.bf16.mxu1 %v2805_v62  ;;  %v2896_v61 = vld [vmem:[%s4023_s1 + $0x6c0] ss:$8 sps:$4 sm:$0xff]   ;;  %v2901_v62 = vld [vmem:[%s4023_s1 + $0x2d4] ss:$8 sps:$4 sm:$0xff]  }
  0x79   :  { %2105 = vmatprep.subr.bf16.mxu0 %v2808_v63  ;;  %v2904_v63 = vld [vmem:[%s4023_s1 + $0x6d4] ss:$8 sps:$4 sm:$0xff]  }
  0x7b   :  { %1934 = vmatpush1.bf16.msra.mxu1 %v2803_v0  ;;  %v2899_v0 = vld [vmem:[%s4023_s1 + $0x2d0] ss:$8 sps:$4 sm:$0xff]  }
  0x7c   :  { %2106 = vmatpush1.bf16.msra.mxu0 %v2806_v1  ;;  %1935 = vmatprep.subr.bf16.mxu1 %v2811_v2  ;;  %v2902_v1 = vld [vmem:[%s4023_s1 + $0x6d0] ss:$8 sps:$4 sm:$0xff]   ;;  %v2907_v2 = vld [vmem:[%s4023_s1 + $0x2e4] ss:$8 sps:$4 sm:$0xff]  }
  0x7d   :  { %2107 = vmatprep.subr.bf16.mxu0 %v2814_v3  ;;  %v2910_v3 = vld [vmem:[%s4023_s1 + $0x6e4] ss:$8 sps:$4 sm:$0xff]  }
  0x7f   :  { %1936 = vmatpush1.bf16.msra.mxu1 %v2809_v4  ;;  %v2905_v4 = vld [vmem:[%s4023_s1 + $0x2e0] ss:$8 sps:$4 sm:$0xff]  }
  0x80   :  { %2108 = vmatpush1.bf16.msra.mxu0 %v2812_v5  ;;  %1948 = vmatprep.subr.bf16.mxu1 %v2820_v6  ;;  %v2908_v5 = vld [vmem:[%s4023_s1 + $0x6e0] ss:$8 sps:$4 sm:$0xff]   ;;  %v2913_v6 = vld [vmem:[%s4023_s1 + $0x2f4] ss:$8 sps:$4 sm:$0xff]  }
  0x81   :  { %2120 = vmatprep.subr.bf16.mxu0 %v2826_v7  ;;  %v2916_v7 = vld [vmem:[%s4023_s1 + $0x6f4] ss:$8 sps:$4 sm:$0xff]  }
  0x82   :  { %1938 = vmatmul.mubr.bf16.vlgmr.msra.gmra.mrb[0].mxu1 %v2815_v8  ;;  %v2911_v8 = vld [vmem:[%s4023_s1 + $0x2f0] ss:$8 sps:$4 sm:$0xff]  }
  0x83   :  { %2110 = vmatmul.mubr.bf16.vlgmr.msra.gmra.mrb[0].mxu0 %v2821_v10  ;;  %1949 = vmatpush1.bf16.msra.mxu1 %v2818_v9  ;;  %v2914_v9 = vld [vmem:[%s4023_s1 + $0x6f0] ss:$8 sps:$4 sm:$0xff]   ;;  %v2922_v10 = vld [vmem:[%s4023_s1 + $0x304] ss:$8 sps:$4 sm:$0xff]  }
  0x84   :  { %2121 = vmatpush1.bf16.msra.mxu0 %v2824_v11  ;;  %1950 = vmatprep.subr.bf16.mxu1 %v2829_v12  ;;  %v2928_v11 = vld [vmem:[%s4023_s1 + $0x704] ss:$8 sps:$4 sm:$0xff]   ;;  %v2917_v12 = vld [vmem:[%s4024_s0 + $0x10] ss:$72 sps:$4 sm:$0xff]  }
  0x85   :  { %2122 = vmatprep.subr.bf16.mxu0 %v2832_v13  ;;  %1980 = vmatprep.mubr.bf16.mxu1 %v2919_v19  ;;  %v2920_v13 = vld [vmem:[%s4023_s1 + $0x300] ss:$8 sps:$4 sm:$0xff]   ;;  %v3024_v19 = vld [vmem:[%s4024_s0 + $0x3c] ss:$72 sps:$4 sm:$0xff]  }
  0x86   :  { %2152 = vmatprep.mubr.bf16.mxu0 %v2925_v23  ;;  %v2940_v23 = vld [vmem:[%s4023_s1 + $0x724] ss:$8 sps:$4 sm:$0xff]  }
  0x87   :  { %1951 = vmatpush1.bf16.msra.mxu1 %v2827_v14  ;;  %v2923_v14 = vld [vmem:[%s4024_s0 + $0x30] ss:$72 sps:$4 sm:$0xff]  }
  0x88   :  { %2123 = vmatpush1.bf16.msra.mxu0 %v2830_v15  ;;  %1952 = vmatprep.subr.bf16.mxu1 %v2835_v16  ;;  %v2926_v15 = vld [vmem:[%s4023_s1 + $0x700] ss:$8 sps:$4 sm:$0xff]   ;;  %v2931_v16 = vld [vmem:[%s4023_s1 + $0x314] ss:$8 sps:$4 sm:$0xff]  }
  0x89   :  { %2124 = vmatprep.subr.bf16.mxu0 %v2838_v17  ;;  %v2934_v17 = vld [vmem:[%s4023_s1 + $0x714] ss:$8 sps:$4 sm:$0xff]  }
  0x8b   :  { %1953 = vmatpush1.bf16.msra.mxu1 %v2833_v18  ;;  %v3021_v18 = vld [vmem:[%s4024_s0 + $0x1c] ss:$72 sps:$4 sm:$0xff]  }
  0x8c   :  { %2125 = vmatpush1.bf16.msra.mxu0 %v2836_v20  ;;  %1954 = vmatprep.subr.bf16.mxu1 %v2841_v21  ;;  %v2929_v20 = vld [vmem:[%s4023_s1 + $0x310] ss:$8 sps:$4 sm:$0xff]  }
  0x8d   :  { %2126 = vmatprep.subr.bf16.mxu0 %v2844_v22  ;;  %v2932_v21 = vld [vmem:[%s4023_s1 + $0x710] ss:$8 sps:$4 sm:$0xff]   ;;  %v2937_v22 = vld [vmem:[%s4023_s1 + $0x324] ss:$8 sps:$4 sm:$0xff]  }
  0x8f   :  { %1955 = vmatpush1.bf16.msra.mxu1 %v2839_v24  ;;  %v2935_v24 = vld [vmem:[%s4023_s1 + $0x320] ss:$8 sps:$4 sm:$0xff]  }
  0x90   :  { %2127 = vmatpush1.bf16.msra.mxu0 %v2842_v25  ;;  %1956 = vmatprep.subr.bf16.mxu1 %v2847_v26  ;;  %v2938_v25 = vld [vmem:[%s4023_s1 + $0x720] ss:$8 sps:$4 sm:$0xff]   ;;  %v2943_v26 = vld [vmem:[%s4023_s1 + $0x334] ss:$8 sps:$4 sm:$0xff]  }
  0x91   :  { %2128 = vmatprep.subr.bf16.mxu0 %v2850_v27  ;;  %v2946_v27 = vld [vmem:[%s4023_s1 + $0x734] ss:$8 sps:$4 sm:$0xff]  }
  0x93   :  { %1957 = vmatpush1.bf16.msra.mxu1 %v2845_v28  ;;  %v2941_v28 = vld [vmem:[%s4023_s1 + $0x330] ss:$8 sps:$4 sm:$0xff]  }
  0x94   :  { %2129 = vmatpush1.bf16.msra.mxu0 %v2848_v29  ;;  %1958 = vmatprep.subr.bf16.mxu1 %v2853_v30  ;;  %v2944_v29 = vld [vmem:[%s4023_s1 + $0x730] ss:$8 sps:$4 sm:$0xff]   ;;  %v2949_v30 = vld [vmem:[%s4023_s1 + $0x344] ss:$8 sps:$4 sm:$0xff]  }
  0x95   :  { %2130 = vmatprep.subr.bf16.mxu0 %v2856_v31  ;;  %v2952_v31 = vld [vmem:[%s4023_s1 + $0x744] ss:$8 sps:$4 sm:$0xff]  }
  0x97   :  { %1959 = vmatpush1.bf16.msra.mxu1 %v2851_v32  ;;  %v2947_v32 = vld [vmem:[%s4023_s1 + $0x340] ss:$8 sps:$4 sm:$0xff]  }
  0x98   :  { %2131 = vmatpush1.bf16.msra.mxu0 %v2854_v33  ;;  %1960 = vmatprep.subr.bf16.mxu1 %v2859_v34  ;;  %v2950_v33 = vld [vmem:[%s4023_s1 + $0x740] ss:$8 sps:$4 sm:$0xff]   ;;  %v2955_v34 = vld [vmem:[%s4023_s1 + $0x354] ss:$8 sps:$4 sm:$0xff]  }
  0x99   :  { %2132 = vmatprep.subr.bf16.mxu0 %v2862_v35  ;;  %v2958_v35 = vld [vmem:[%s4023_s1 + $0x754] ss:$8 sps:$4 sm:$0xff]  }
  0x9b   :  { %1961 = vmatpush1.bf16.msra.mxu1 %v2857_v36  ;;  %v2953_v36 = vld [vmem:[%s4023_s1 + $0x350] ss:$8 sps:$4 sm:$0xff]  }
  0x9c   :  { %2133 = vmatpush1.bf16.msra.mxu0 %v2860_v37  ;;  %1962 = vmatprep.subr.bf16.mxu1 %v2865_v38  ;;  %v2956_v37 = vld [vmem:[%s4023_s1 + $0x750] ss:$8 sps:$4 sm:$0xff]   ;;  %v2961_v38 = vld [vmem:[%s4023_s1 + $0x364] ss:$8 sps:$4 sm:$0xff]  }
  0x9d   :  { %2134 = vmatprep.subr.bf16.mxu0 %v2868_v39  ;;  %v2964_v39 = vld [vmem:[%s4023_s1 + $0x764] ss:$8 sps:$4 sm:$0xff]  }
  0x9f   :  { %1963 = vmatpush1.bf16.msra.mxu1 %v2863_v40  ;;  %v2959_v40 = vld [vmem:[%s4023_s1 + $0x360] ss:$8 sps:$4 sm:$0xff]  }
  0xa0   :  { %2135 = vmatpush1.bf16.msra.mxu0 %v2866_v41  ;;  %1964 = vmatprep.subr.bf16.mxu1 %v2871_v42  ;;  %v2962_v41 = vld [vmem:[%s4023_s1 + $0x760] ss:$8 sps:$4 sm:$0xff]   ;;  %v2967_v42 = vld [vmem:[%s4023_s1 + $0x374] ss:$8 sps:$4 sm:$0xff]  }
  0xa1   :  { %2136 = vmatprep.subr.bf16.mxu0 %v2874_v43  ;;  %v2970_v43 = vld [vmem:[%s4023_s1 + $0x774] ss:$8 sps:$4 sm:$0xff]  }
  0xa3   :  { %1965 = vmatpush1.bf16.msra.mxu1 %v2869_v44  ;;  %v2965_v44 = vld [vmem:[%s4023_s1 + $0x370] ss:$8 sps:$4 sm:$0xff]  }
  0xa4   :  { %2137 = vmatpush1.bf16.msra.mxu0 %v2872_v45  ;;  %1966 = vmatprep.subr.bf16.mxu1 %v2877_v46  ;;  %v2968_v45 = vld [vmem:[%s4023_s1 + $0x770] ss:$8 sps:$4 sm:$0xff]   ;;  %v2973_v46 = vld [vmem:[%s4023_s1 + $0x384] ss:$8 sps:$4 sm:$0xff]  }
  0xa5   :  { %2138 = vmatprep.subr.bf16.mxu0 %v2880_v47  ;;  %v2976_v47 = vld [vmem:[%s4023_s1 + $0x784] ss:$8 sps:$4 sm:$0xff]  }
  0xa7   :  { %1967 = vmatpush1.bf16.msra.mxu1 %v2875_v48  ;;  %v2971_v48 = vld [vmem:[%s4023_s1 + $0x380] ss:$8 sps:$4 sm:$0xff]  }
  0xa8   :  { %2139 = vmatpush1.bf16.msra.mxu0 %v2878_v49  ;;  %1968 = vmatprep.subr.bf16.mxu1 %v2883_v50  ;;  %v2974_v49 = vld [vmem:[%s4023_s1 + $0x780] ss:$8 sps:$4 sm:$0xff]   ;;  %v2979_v50 = vld [vmem:[%s4023_s1 + $0x394] ss:$8 sps:$4 sm:$0xff]  }
  0xa9   :  { %2140 = vmatprep.subr.bf16.mxu0 %v2886_v51  ;;  %v2982_v51 = vld [vmem:[%s4023_s1 + $0x794] ss:$8 sps:$4 sm:$0xff]  }
  0xab   :  { %1969 = vmatpush1.bf16.msra.mxu1 %v2881_v52  ;;  %v2977_v52 = vld [vmem:[%s4023_s1 + $0x390] ss:$8 sps:$4 sm:$0xff]  }
  0xac   :  { %2141 = vmatpush1.bf16.msra.mxu0 %v2884_v53  ;;  %1970 = vmatprep.subr.bf16.mxu1 %v2889_v54  ;;  %v2980_v53 = vld [vmem:[%s4023_s1 + $0x790] ss:$8 sps:$4 sm:$0xff]   ;;  %v2985_v54 = vld [vmem:[%s4023_s1 + $0x3a4] ss:$8 sps:$4 sm:$0xff]  }
  0xad   :  { %2142 = vmatprep.subr.bf16.mxu0 %v2892_v55  ;;  %v2988_v55 = vld [vmem:[%s4023_s1 + $0x7a4] ss:$8 sps:$4 sm:$0xff]  }
  0xaf   :  { %1971 = vmatpush1.bf16.msra.mxu1 %v2887_v56  ;;  %v2983_v56 = vld [vmem:[%s4023_s1 + $0x3a0] ss:$8 sps:$4 sm:$0xff]  }
  0xb0   :  { %2143 = vmatpush1.bf16.msra.mxu0 %v2890_v57  ;;  %1972 = vmatprep.subr.bf16.mxu1 %v2895_v58  ;;  %v2986_v57 = vld [vmem:[%s4023_s1 + $0x7a0] ss:$8 sps:$4 sm:$0xff]   ;;  %v2991_v58 = vld [vmem:[%s4023_s1 + $0x3b4] ss:$8 sps:$4 sm:$0xff]  }
  0xb1   :  { %2144 = vmatprep.subr.bf16.mxu0 %v2898_v59  ;;  %v2994_v59 = vld [vmem:[%s4023_s1 + $0x7b4] ss:$8 sps:$4 sm:$0xff]  }
  0xb3   :  { %1973 = vmatpush1.bf16.msra.mxu1 %v2893_v60  ;;  %v2989_v60 = vld [vmem:[%s4023_s1 + $0x3b0] ss:$8 sps:$4 sm:$0xff]  }
  0xb4   :  { %2145 = vmatpush1.bf16.msra.mxu0 %v2896_v61  ;;  %1974 = vmatprep.subr.bf16.mxu1 %v2901_v62  ;;  %v2992_v61 = vld [vmem:[%s4023_s1 + $0x7b0] ss:$8 sps:$4 sm:$0xff]   ;;  %v2997_v62 = vld [vmem:[%s4023_s1 + $0x3c4] ss:$8 sps:$4 sm:$0xff]  }
  0xb5   :  { %2146 = vmatprep.subr.bf16.mxu0 %v2904_v63  ;;  %v3000_v63 = vld [vmem:[%s4023_s1 + $0x7c4] ss:$8 sps:$4 sm:$0xff]  }
  0xb7   :  { %1975 = vmatpush1.bf16.msra.mxu1 %v2899_v0  ;;  %v2995_v0 = vld [vmem:[%s4023_s1 + $0x3c0] ss:$8 sps:$4 sm:$0xff]  }
  0xb8   :  { %2147 = vmatpush1.bf16.msra.mxu0 %v2902_v1  ;;  %1976 = vmatprep.subr.bf16.mxu1 %v2907_v2  ;;  %v2998_v1 = vld [vmem:[%s4023_s1 + $0x7c0] ss:$8 sps:$4 sm:$0xff]   ;;  %v3003_v2 = vld [vmem:[%s4023_s1 + $0x3d4] ss:$8 sps:$4 sm:$0xff]  }
  0xb9   :  { %2148 = vmatprep.subr.bf16.mxu0 %v2910_v3  ;;  %v3006_v3 = vld [vmem:[%s4023_s1 + $0x7d4] ss:$8 sps:$4 sm:$0xff]  }
  0xbb   :  { %1977 = vmatpush1.bf16.msra.mxu1 %v2905_v4  ;;  %v3001_v4 = vld [vmem:[%s4023_s1 + $0x3d0] ss:$8 sps:$4 sm:$0xff]  }
  0xbc   :  { %2149 = vmatpush1.bf16.msra.mxu0 %v2908_v5  ;;  %1978 = vmatprep.subr.bf16.mxu1 %v2913_v6  ;;  %v3004_v5 = vld [vmem:[%s4023_s1 + $0x7d0] ss:$8 sps:$4 sm:$0xff]   ;;  %v3009_v6 = vld [vmem:[%s4023_s1 + $0x3e4] ss:$8 sps:$4 sm:$0xff]  }
  0xbd   :  { %2150 = vmatprep.subr.bf16.mxu0 %v2916_v7  ;;  %v3012_v7 = vld [vmem:[%s4023_s1 + $0x7e4] ss:$8 sps:$4 sm:$0xff]  }
  0xbf   :  { %1979 = vmatpush1.bf16.msra.mxu1 %v2911_v8  ;;  %v3007_v8 = vld [vmem:[%s4023_s1 + $0x3e0] ss:$8 sps:$4 sm:$0xff]  }
  0xc0   :  { %2151 = vmatpush1.bf16.msra.mxu0 %v2914_v9  ;;  %1991 = vmatprep.subr.bf16.mxu1 %v2922_v10  ;;  %v3010_v9 = vld [vmem:[%s4023_s1 + $0x7e0] ss:$8 sps:$4 sm:$0xff]   ;;  %v3015_v10 = vld [vmem:[%s4023_s1 + $0x3f4] ss:$8 sps:$4 sm:$0xff]  }
  0xc1   :  { %2163 = vmatprep.subr.bf16.mxu0 %v2928_v11  ;;  %v3018_v11 = vld [vmem:[%s4023_s1 + $0x7f4] ss:$8 sps:$4 sm:$0xff]  }
  0xc2   :  { %1981 = vmatmul.mubr.bf16.vlgmr.msra.gmra.mrb[0].mxu1 %v2917_v12  ;;  %v3013_v12 = vld [vmem:[%s4023_s1 + $0x3f0] ss:$8 sps:$4 sm:$0xff]  }
  0xc3   :  { %2153 = vmatmul.mubr.bf16.vlgmr.msra.gmra.mrb[0].mxu0 %v2923_v14  ;;  %1992 = vmatpush1.bf16.msra.mxu1 %v2920_v13  ;;  %v3016_v13 = vld [vmem:[%s4023_s1 + $0x7f0] ss:$8 sps:$4 sm:$0xff]   ;;  %v3027_v14 = vld [vmem:[%s4023_s1 + $0x804] ss:$8 sps:$4 sm:$0xff]  }
  0xc4   :  { %2164 = vmatpush1.bf16.msra.mxu0 %v2926_v15  ;;  %1993 = vmatprep.subr.bf16.mxu1 %v2931_v16  ;;  %v3019_v15 = vld [vmem:[%s4024_s0 + $0x18] ss:$72 sps:$4 sm:$0xff]  }
  0xc5   :  { %2165 = vmatprep.subr.bf16.mxu0 %v2934_v17  ;;  %2023 = vmatprep.mubr.bf16.mxu1 %v3021_v18  ;;  %v3022_v16 = vld [vmem:[%s4024_s0 + $0x38] ss:$72 sps:$4 sm:$0xff]   ;;  %v3075_v18 = vld [vmem:[%s4024_s0 + $0x44] ss:$72 sps:$4 sm:$0xff]  }
  0xc6   :  { %2195 = vmatprep.mubr.bf16.mxu0 %v3024_v19  ;;  %v3025_v17 = vld [vmem:[%s4023_s1 + $0x800] ss:$8 sps:$4 sm:$0xff]   ;;  %v3030_v19 = vld [vmem:[%s4023_s1 + $0x814] ss:$8 sps:$4 sm:$0xff]  }
  0xc7   :  { %1994 = vmatpush1.bf16.msra.mxu1 %v2929_v20  ;;  %v3028_v20 = vld [vmem:[%s4023_s1 + $0x810] ss:$8 sps:$4 sm:$0xff]  }
  0xc8   :  { %2166 = vmatpush1.bf16.msra.mxu0 %v2932_v21  ;;  %1995 = vmatprep.subr.bf16.mxu1 %v2937_v22  ;;  %v3033_v21 = vld [vmem:[%s4023_s1 + $0x824] ss:$8 sps:$4 sm:$0xff]   ;;  %v3031_v22 = vld [vmem:[%s4023_s1 + $0x820] ss:$8 sps:$4 sm:$0xff]  }
  0xc9   :  { %2167 = vmatprep.subr.bf16.mxu0 %v2940_v23  ;;  %v3036_v23 = vld [vmem:[%s4023_s1 + $0x834] ss:$8 sps:$4 sm:$0xff]  }
  0xcb   :  { %1996 = vmatpush1.bf16.msra.mxu1 %v2935_v24  ;;  %v3034_v24 = vld [vmem:[%s4023_s1 + $0x830] ss:$8 sps:$4 sm:$0xff]  }
  0xcc   :  { %2168 = vmatpush1.bf16.msra.mxu0 %v2938_v25  ;;  %1997 = vmatprep.subr.bf16.mxu1 %v2943_v26  ;;  %v3039_v25 = vld [vmem:[%s4023_s1 + $0x844] ss:$8 sps:$4 sm:$0xff]   ;;  %v3037_v26 = vld [vmem:[%s4023_s1 + $0x840] ss:$8 sps:$4 sm:$0xff]  }
  0xcd   :  { %2169 = vmatprep.subr.bf16.mxu0 %v2946_v27  ;;  %v3042_v27 = vld [vmem:[%s4023_s1 + $0x854] ss:$8 sps:$4 sm:$0xff]  }
  0xcf   :  { %1998 = vmatpush1.bf16.msra.mxu1 %v2941_v28  ;;  %v3040_v28 = vld [vmem:[%s4023_s1 + $0x850] ss:$8 sps:$4 sm:$0xff]  }
  0xd0   :  { %2170 = vmatpush1.bf16.msra.mxu0 %v2944_v29  ;;  %1999 = vmatprep.subr.bf16.mxu1 %v2949_v30  ;;  %v3045_v29 = vld [vmem:[%s4023_s1 + $0x864] ss:$8 sps:$4 sm:$0xff]   ;;  %v3043_v30 = vld [vmem:[%s4023_s1 + $0x860] ss:$8 sps:$4 sm:$0xff]  }
  0xd1   :  { %2171 = vmatprep.subr.bf16.mxu0 %v2952_v31  ;;  %v3048_v31 = vld [vmem:[%s4023_s1 + $0x874] ss:$8 sps:$4 sm:$0xff]  }
  0xd3   :  { %2000 = vmatpush1.bf16.msra.mxu1 %v2947_v32  ;;  %v3046_v32 = vld [vmem:[%s4023_s1 + $0x870] ss:$8 sps:$4 sm:$0xff]  }
  0xd4   :  { %2172 = vmatpush1.bf16.msra.mxu0 %v2950_v33  ;;  %2001 = vmatprep.subr.bf16.mxu1 %v2955_v34  ;;  %v3051_v33 = vld [vmem:[%s4023_s1 + $0x884] ss:$8 sps:$4 sm:$0xff]   ;;  %v3049_v34 = vld [vmem:[%s4023_s1 + $0x880] ss:$8 sps:$4 sm:$0xff]  }
  0xd5   :  { %2173 = vmatprep.subr.bf16.mxu0 %v2958_v35  ;;  %v3054_v35 = vld [vmem:[%s4023_s1 + $0x894] ss:$8 sps:$4 sm:$0xff]  }
  0xd7   :  { %2002 = vmatpush1.bf16.msra.mxu1 %v2953_v36  ;;  %v3052_v36 = vld [vmem:[%s4023_s1 + $0x890] ss:$8 sps:$4 sm:$0xff]  }
  0xd8   :  { %2174 = vmatpush1.bf16.msra.mxu0 %v2956_v37  ;;  %2003 = vmatprep.subr.bf16.mxu1 %v2961_v38  ;;  %v3057_v37 = vld [vmem:[%s4023_s1 + $0x8a4] ss:$8 sps:$4 sm:$0xff]   ;;  %v3055_v38 = vld [vmem:[%s4023_s1 + $0x8a0] ss:$8 sps:$4 sm:$0xff]  }
  0xd9   :  { %2175 = vmatprep.subr.bf16.mxu0 %v2964_v39  ;;  %v3060_v39 = vld [vmem:[%s4023_s1 + $0x8b4] ss:$8 sps:$4 sm:$0xff]  }
  0xdb   :  { %2004 = vmatpush1.bf16.msra.mxu1 %v2959_v40  ;;  %v3058_v40 = vld [vmem:[%s4023_s1 + $0x8b0] ss:$8 sps:$4 sm:$0xff]  }
  0xdc   :  { %2176 = vmatpush1.bf16.msra.mxu0 %v2962_v41  ;;  %2005 = vmatprep.subr.bf16.mxu1 %v2967_v42  ;;  %v3063_v41 = vld [vmem:[%s4023_s1 + $0x8c4] ss:$8 sps:$4 sm:$0xff]   ;;  %v3061_v42 = vld [vmem:[%s4023_s1 + $0x8c0] ss:$8 sps:$4 sm:$0xff]  }
  0xdd   :  { %2177 = vmatprep.subr.bf16.mxu0 %v2970_v43  ;;  %v3066_v43 = vld [vmem:[%s4023_s1 + $0x8d4] ss:$8 sps:$4 sm:$0xff]  }
  0xdf   :  { %2006 = vmatpush1.bf16.msra.mxu1 %v2965_v44  ;;  %v3064_v44 = vld [vmem:[%s4023_s1 + $0x8d0] ss:$8 sps:$4 sm:$0xff]  }
  0xe0   :  { %2178 = vmatpush1.bf16.msra.mxu0 %v2968_v45  ;;  %2007 = vmatprep.subr.bf16.mxu1 %v2973_v46  ;;  %v3069_v45 = vld [vmem:[%s4023_s1 + $0x8e4] ss:$8 sps:$4 sm:$0xff]   ;;  %v3067_v46 = vld [vmem:[%s4023_s1 + $0x8e0] ss:$8 sps:$4 sm:$0xff]  }
  0xe1   :  { %2179 = vmatprep.subr.bf16.mxu0 %v2976_v47  ;;  %v3072_v47 = vld [vmem:[%s4023_s1 + $0x8f4] ss:$8 sps:$4 sm:$0xff]  }
  0xe3   :  { %2008 = vmatpush1.bf16.msra.mxu1 %v2971_v48  ;;  %v3070_v48 = vld [vmem:[%s4023_s1 + $0x8f0] ss:$8 sps:$4 sm:$0xff]  }
  0xe4   :  { %2180 = vmatpush1.bf16.msra.mxu0 %v2974_v49  ;;  %2009 = vmatprep.subr.bf16.mxu1 %v2979_v50  ;;  %v3073_v49 = vld [vmem:[%s4024_s0 + $0x40] ss:$72 sps:$4 sm:$0xff]  }
  0xe5   :  { %2181 = vmatprep.subr.bf16.mxu0 %v2982_v51 }
  0xe7   :  { %2010 = vmatpush1.bf16.msra.mxu1 %v2977_v52 }
  0xe8   :  { %2182 = vmatpush1.bf16.msra.mxu0 %v2980_v53  ;;  %2011 = vmatprep.subr.bf16.mxu1 %v2985_v54  ;;  %v322_v54 = vlaneseq }
  0xe9   :  { %2183 = vmatprep.subr.bf16.mxu0 %v2988_v55 }
  0xea   :  { %v323_v55 = vshrl.u32 %v322_v54, 7 }
  0xeb   :  { %2012 = vmatpush1.bf16.msra.mxu1 %v2983_v56 }
  0xec   :  { %2184 = vmatpush1.bf16.msra.mxu0 %v2986_v57  ;;  %2013 = vmatprep.subr.bf16.mxu1 %v2991_v58  ;;  %v324_v56 = vsub.s32 0, %v323_v55  ;;  %v320_v57 = vld [vmem:[%s4025_s2] sm:$0x3]  ;;  %v328_v58 = vsub.s32 1, %v323_v55 }
  0xed   :  { %2185 = vmatprep.subr.bf16.mxu0 %v2994_v59 }
  0xee   :  { %v325_v59 = vrot.slane %v320_v57, %v324_v56 }
  0xef   :  { %2014 = vmatpush1.bf16.msra.mxu1 %v2989_v60  ;;  %v329_v60 = vrot.slane %v320_v57, %v328_v58 }
  0xf0   :  { %2186 = vmatpush1.bf16.msra.mxu0 %v2992_v61  ;;  %2015 = vmatprep.subr.bf16.mxu1 %v2997_v62 }
  0xf1   :  { %2187 = vmatprep.subr.bf16.mxu0 %v3000_v63 }
  0xf3   :  { %2016 = vmatpush1.bf16.msra.mxu1 %v2995_v0 }
  0xf4   :  { %2188 = vmatpush1.bf16.msra.mxu0 %v2998_v1  ;;  %2017 = vmatprep.subr.bf16.mxu1 %v3003_v2 }
  0xf5   :  { %2189 = vmatprep.subr.bf16.mxu0 %v3006_v3 }
  0xf7   :  { %2018 = vmatpush1.bf16.msra.mxu1 %v3001_v4 }
  0xf8   :  { %2190 = vmatpush1.bf16.msra.mxu0 %v3004_v5  ;;  %2019 = vmatprep.subr.bf16.mxu1 %v3009_v6 }
  0xf9   :  { %2191 = vmatprep.subr.bf16.mxu0 %v3012_v7 }
  0xfb   :  { %2020 = vmatpush1.bf16.msra.mxu1 %v3007_v8 }
  0xfc   :  { %2192 = vmatpush1.bf16.msra.mxu0 %v3010_v9  ;;  %2021 = vmatprep.subr.bf16.mxu1 %v3015_v10 }
  0xfd   :  { %2193 = vmatprep.subr.bf16.mxu0 %v3018_v11 }
  0xff   :  { %2022 = vmatpush1.bf16.msra.mxu1 %v3013_v12 }
 0x100   :  { %2194 = vmatpush1.bf16.msra.mxu0 %v3016_v13 }
 0x101   :  { %2206 = vmatprep.subr.bf16.mxu0 %v3027_v14 }
 0x102   :  { %2024 = vmatmul.mubr.bf16.vlgmr.msra.gmra.mrb[0].mxu1 %v3019_v15 }
 0x103   :  { %2196 = vmatmul.mubr.bf16.vlgmr.msra.gmra.mrb[0].mxu0 %v3022_v16 }
 0x104   :  { %2207 = vmatpush1.bf16.msra.mxu0 %v3025_v17  ;;  %2238 = vmatprep.mubr.bf16.mxu0 %v3075_v18 }
 0x105   :  { %2208 = vmatprep.subr.bf16.mxu0 %v3030_v19 }
 0x108   :  { %2209 = vmatpush1.bf16.msra.mxu0 %v3028_v20 }
 0x109   :  { %2210 = vmatprep.subr.bf16.mxu0 %v3033_v21 }
 0x10c   :  { %2211 = vmatpush1.bf16.msra.mxu0 %v3031_v22 }
 0x10d   :  { %2212 = vmatprep.subr.bf16.mxu0 %v3036_v23 }
 0x110   :  { %2213 = vmatpush1.bf16.msra.mxu0 %v3034_v24 }
 0x111   :  { %2214 = vmatprep.subr.bf16.mxu0 %v3039_v25 }
 0x114   :  { %2215 = vmatpush1.bf16.msra.mxu0 %v3037_v26 }
 0x115   :  { %2216 = vmatprep.subr.bf16.mxu0 %v3042_v27 }
 0x118   :  { %2217 = vmatpush1.bf16.msra.mxu0 %v3040_v28 }
 0x119   :  { %2218 = vmatprep.subr.bf16.mxu0 %v3045_v29 }
 0x11c   :  { %2219 = vmatpush1.bf16.msra.mxu0 %v3043_v30 }
 0x11d   :  { %2220 = vmatprep.subr.bf16.mxu0 %v3048_v31 }
 0x120   :  { %2221 = vmatpush1.bf16.msra.mxu0 %v3046_v32 }
 0x121   :  { %2222 = vmatprep.subr.bf16.mxu0 %v3051_v33 }
 0x124   :  { %2223 = vmatpush1.bf16.msra.mxu0 %v3049_v34 }
 0x125   :  { %2224 = vmatprep.subr.bf16.mxu0 %v3054_v35 }
 0x128   :  { %2225 = vmatpush1.bf16.msra.mxu0 %v3052_v36 }
 0x129   :  { %2226 = vmatprep.subr.bf16.mxu0 %v3057_v37 }
 0x12c   :  { %2227 = vmatpush1.bf16.msra.mxu0 %v3055_v38 }
 0x12d   :  { %2228 = vmatprep.subr.bf16.mxu0 %v3060_v39 }
 0x130   :  { %2229 = vmatpush1.bf16.msra.mxu0 %v3058_v40 }
 0x131   :  { %2230 = vmatprep.subr.bf16.mxu0 %v3063_v41 }
 0x134   :  { %2231 = vmatpush1.bf16.msra.mxu0 %v3061_v42 }
 0x135   :  { %2232 = vmatprep.subr.bf16.mxu0 %v3066_v43 }
 0x138   :  { %2233 = vmatpush1.bf16.msra.mxu0 %v3064_v44 }
 0x139   :  { %2234 = vmatprep.subr.bf16.mxu0 %v3069_v45 }
 0x13c   :  { %2235 = vmatpush1.bf16.msra.mxu0 %v3067_v46 }
 0x13d   :  { %2236 = vmatprep.subr.bf16.mxu0 %v3072_v47 }
 0x140   :  { %2237 = vmatpush1.bf16.msra.mxu0 %v3070_v48 }
 0x143   :  { %2239 = vmatmul.mubr.bf16.vlgmr.msra.gmra.mrb[0].mxu0 %v3073_v49 }
 0x1d5   :  { %v2025_v50 = vpop.f32.mrb[0].mxu1 }
 0x1d6   :  { %v2027_v51 = vpop.f32.mrb[1].mxu1  ;;  %v2581_v61 = vadd.f32 %v2025_v50, %v325_v59 }
 0x1d7   :  { %v2029_v52 = vpop.f32.mrb[2].mxu1  ;;  %v2583_v62 = vadd.f32 %v2027_v51, %v329_v60 }
 0x1d8   :  { %v2031_v53 = vpop.f32.mrb[3].mxu1  ;;  %v2585_v0 = vadd.f32 %v2029_v52, %v325_v59 }
 0x1d9   :  { %v2587_v3 = vadd.f32 %v2031_v53, %v329_v60 }
 0x216   :  { %v2240_v63 = vpop.f32.mrb[0].mxu0 }
 0x217   :  { %v2582_v1 = vadd.f32 %v2581_v61, %v2240_v63  ;;  %v2242_v2 = vpop.f32.mrb[1].mxu0 }
 0x218   :  { %v2584_v4 = vadd.f32 %v2583_v62, %v2242_v2  ;;  %v2244_v5 = vpop.f32.mrb[2].mxu0 }
 0x219   :  { %v2249_v6 = vmax.f32 %v2582_v1, 0.0  ;;  %v2586_v7 = vadd.f32 %v2585_v0, %v2244_v5  ;;  %v2246_v8 = vpop.f32.mrb[3].mxu0 }
 0x21a   :  { %v2250_v9 = vmax.f32 %v2584_v4, 0.0  ;;  %v2588_v10 = vadd.f32 %v2587_v3, %v2246_v8 }
 0x21b   :  { %v2251_v11 = vmax.f32 %v2586_v7, 0.0 }
 0x21c   :  { %v2579_v12 = vpack.c.bf16 %v2250_v9, %v2249_v6  ;;  %v2252_v13 = vmax.f32 %v2588_v10, 0.0 }
 0x21e   :  { %2265 = vst [vmem:[%s4026_s3] sm:$0xff] %v2579_v12  ;;  %v2580_v14 = vpack.c.bf16 %v2252_v13, %v2251_v11 }
 0x220   :  { %2266 = vst [vmem:[%s4026_s3 + $0x8] sm:$0xff] %v2580_v14 }

</bundles_post_ra>
